<compile_context>
chip_gen: v7x
topology: tpu7x:2x2x1
jax: 0.10.0
libtpu: 0.0.40
codegen_flags: <defaults>
</compile_context>

<pallas_src>
import functools

import jax
import jax.numpy as jnp
from jax import lax
from jax.experimental import pallas as pl
from jax.experimental.pallas import tpu as pltpu


def _stconv_kernel(x_ref, w_ref, b_ref, o_ref, xpad_ref, pt_ref, *,
                   stride, padding, dilation, kh, kw, ho, wo, neg_slope):
    """One batch element of Conv2d + bias + LeakyReLU.

    x_ref   : (1, Cin, H, W)           un-padded NCHW input block
    w_ref   : (Cout, KH*KW*Cin)        im2col-flattened weights
    b_ref   : (Cout, 1)                bias (f32, broadcast over lanes)
    o_ref   : (1, Cout, Ho*Wo)         lane-dense NCHW-flat output block
    xpad_ref: (Cin, Hp, Wp)     VMEM   zero-padded copy of the input
    pt_ref  : (KH*KW*Cin, Ho*Wo) VMEM  im2col patch matrix
    """
    cin = x_ref.shape[1]
    h = x_ref.shape[2]
    w = x_ref.shape[3]

    # ---- fused zero padding (no jnp.pad / extra HBM pass in the wrapper) ---
    if padding > 0:
        xpad_ref[...] = jnp.zeros(xpad_ref.shape, xpad_ref.dtype)
        xpad_ref[:, padding:padding + h, padding:padding + w] = (
            x_ref[0].astype(xpad_ref.dtype))
    else:
        xpad_ref[...] = x_ref[0].astype(xpad_ref.dtype)

    # ---- im2col into a lane-dense (KH*KW*Cin, Ho*Wo) patch matrix ----------
    # Built row-by-row with static slices only; each temporary is stored
    # immediately so live ranges are bounded.  For large H this unrolled loop
    # (and the whole-image input block) should become a row-strip grid axis.
    for t in range(kh * kw):
        i, j = divmod(t, kw)
        c0 = j * dilation
        for r in range(ho):
            row = r * stride + i * dilation
            if stride == 1:
                vals = xpad_ref[:, row:row + 1, c0:c0 + wo]
            else:
                vals = xpad_ref[:, row:row + 1, pl.ds(c0, wo, stride)]
            pt_ref[t * cin:(t + 1) * cin, r * wo:(r + 1) * wo] = (
                vals.reshape(cin, wo))

    # ---- single MXU contraction: (Cout, K) @ (K, Ho*Wo) --------------------
    acc = jnp.dot(w_ref[...], pt_ref[...],
                  preferred_element_type=jnp.float32)        # (Cout, Ho*Wo)
    acc = acc + b_ref[...].astype(jnp.float32)               # bias
    acc = jnp.where(acc > 0, acc, neg_slope * acc)           # LeakyReLU(0.2)
    o_ref[0] = acc.astype(o_ref.dtype)                       # lane-dense store


def stconv_forward(x_nchw, w_oihw, b, *, stride, padding, dilation=1,
                   neg_slope=0.2):
    """NCHW Conv2d + bias + LeakyReLU via one Pallas kernel (grid over batch)."""
    n, cin, h, w = x_nchw.shape
    cout, cin_w, kh, kw = w_oihw.shape
    assert cin_w == cin, (cin_w, cin)

    hp, wp = h + 2 * padding, w + 2 * padding
    ho = (hp - dilation * (kh - 1) - 1) // stride + 1
    wo = (wp - dilation * (kw - 1) - 1) // stride + 1

    # im2col weight layout: W_flat[co, (i*kw + j)*cin + ci] = W[co, ci, i, j].
    w_flat = jnp.transpose(w_oihw, (0, 2, 3, 1)).reshape(cout, kh * kw * cin)
    w_flat = w_flat.astype(x_nchw.dtype)
    b_col = b.reshape(cout, 1).astype(jnp.float32)

    kernel = functools.partial(
        _stconv_kernel, stride=stride, padding=padding, dilation=dilation,
        kh=kh, kw=kw, ho=ho, wo=wo, neg_slope=neg_slope)

    itemsize = x_nchw.dtype.itemsize
    flops = 2 * n * ho * wo * kh * kw * cin * cout
    bytes_accessed = (x_nchw.size * itemsize
                      + w_flat.size * w_flat.dtype.itemsize
                      + b_col.size * 4
                      + n * cout * ho * wo * itemsize)

    out_flat = pl.pallas_call(
        kernel,
        out_shape=jax.ShapeDtypeStruct((n, cout, ho * wo), x_nchw.dtype),
        grid_spec=pltpu.PrefetchScalarGridSpec(
            num_scalar_prefetch=0,
            grid=(n,),
            in_specs=[
                pl.BlockSpec((1, cin, h, w), lambda i: (i, 0, 0, 0)),
                pl.BlockSpec((cout, kh * kw * cin), lambda i: (0, 0)),
                pl.BlockSpec((cout, 1), lambda i: (0, 0)),
            ],
            out_specs=pl.BlockSpec((1, cout, ho * wo), lambda i: (i, 0, 0)),
            scratch_shapes=[
                pltpu.VMEM((cin, hp, wp), x_nchw.dtype),          # padded input
                pltpu.VMEM((kh * kw * cin, ho * wo), x_nchw.dtype),  # im2col
            ],
        ),
        compiler_params=pltpu.CompilerParams(
            dimension_semantics=("parallel",)),
        cost_estimate=pl.CostEstimate(
            flops=flops, transcendentals=0, bytes_accessed=bytes_accessed),
    )(x_nchw, w_flat, b_col)

    # Free metadata reshape: (N, Cout, Ho*Wo) -> (N, Cout, Ho, Wo) == NCHW.
    return out_flat.reshape(n, cout, ho, wo)


class STconvPallas:
    """Pallas/JAX re-implementation of the PyTorch STconv module."""

    def __init__(self, in_channels, out_channels, kernel_size, stride,
                 padding, dilation=1, key=None):
        if key is None:
            key = jax.random.PRNGKey(0)
        self.stride = stride
        self.padding = padding
        self.dilation = dilation
        wk, bk = jax.random.split(key)
        fan_in = in_channels * kernel_size * kernel_size
        bound = 1.0 / float(jnp.sqrt(fan_in))
        self.weight = jax.random.uniform(
            wk, (out_channels, in_channels, kernel_size, kernel_size),
            minval=-bound, maxval=bound, dtype=jnp.float32)
        self.bias = jax.random.uniform(
            bk, (out_channels,), minval=-bound, maxval=bound,
            dtype=jnp.float32)

    def __call__(self, x_nchw):
        return stconv_forward(x_nchw, self.weight, self.bias,
                              stride=self.stride, padding=self.padding,
                              dilation=self.dilation)


if __name__ == "__main__":
    # Small shapes consistent with the module: N=2, Cin=4, H=W=16,
    # out_channels=8, kernel_size=3, stride=1, padding=1, dilation=1.
    key = jax.random.PRNGKey(0)
    x_key, p_key = jax.random.split(key)
    x = jax.random.normal(x_key, (2, 4, 16, 16), dtype=jnp.float32)  # NCHW

    model = STconvPallas(in_channels=4, out_channels=8, kernel_size=3,
                         stride=1, padding=1, dilation=1, key=p_key)
    out = jax.block_until_ready(model(x))
    assert out.shape == (2, 8, 16, 16), out.shape

    # Numerical check against XLA's full-precision conv reference.
    ref = lax.conv_general_dilated(
        x, model.weight, window_strides=(1, 1),
        padding=((1, 1), (1, 1)), rhs_dilation=(1, 1),
        dimension_numbers=("NCHW", "OIHW", "NCHW"),
        precision=lax.Precision.HIGHEST)
    ref = ref + model.bias[None, :, None, None]
    ref = jnp.where(ref > 0, ref, 0.2 * ref)
    max_err = float(jnp.max(jnp.abs(out - ref)))
    assert jnp.allclose(out, ref, atol=1e-3, rtol=1e-3), max_err

    print("KERNEL_OK")
</pallas_src>

<mosaic_0001>
module attributes {stable_mosaic.version = 11 : i64} {
  func.func @_stconv_kernel(%arg0: i32, %arg1: memref<1x4x16x16xf32, #tpu.memory_space<vmem>>, %arg2: memref<8x36xf32, #tpu.memory_space<vmem>>, %arg3: memref<8x1xf32, #tpu.memory_space<vmem>>, %arg4: memref<1x8x256xf32, #tpu.memory_space<vmem>>, %arg5: memref<4x18x18xf32, #tpu.memory_space<vmem>>, %arg6: memref<36x256xf32, #tpu.memory_space<vmem>>) attributes {dimension_semantics = [#tpu.dimension_semantics<parallel>], iteration_bounds = array<i64: 2>, scalar_prefetch = 0 : i64, scratch_operands = 2 : i64, tpu.core_type = #tpu.core_type<tc>, window_params = [{transform_indices = @transform_0, window_bounds = array<i64: 1, 4, 16, 16>}, {pipeline_mode = #tpu.pipeline_mode<synchronous>, transform_indices = @transform_1, window_bounds = array<i64: 8, 36>}, {pipeline_mode = #tpu.pipeline_mode<synchronous>, transform_indices = @transform_2, window_bounds = array<i64: 8, 1>}, {transform_indices = @transform_3, window_bounds = array<i64: 1, 8, 256>}]} {
    %cst = arith.constant 0.000000e+00 : f32
    %0 = vector.broadcast %cst : f32 to vector<4x18x18xf32>
    %c0 = arith.constant 0 : index
    %c0_0 = arith.constant 0 : index
    %c0_1 = arith.constant 0 : index
    %1 = vector.load %arg5[%c0, %c0_0, %c0_1] : memref<4x18x18xf32, #tpu.memory_space<vmem>>, vector<4x18x18xf32>
    tpu.vector_store %arg5[%c0, %c0_0, %c0_1], %0 {strides = array<i32>} : memref<4x18x18xf32, #tpu.memory_space<vmem>>, vector<4x18x18xf32>,
    %c0_2 = arith.constant 0 : index
    %c0_3 = arith.constant 0 : index
    %c0_4 = arith.constant 0 : index
    %c0_5 = arith.constant 0 : index
    %2 = vector.load %arg1[%c0_2, %c0_3, %c0_4, %c0_5] : memref<1x4x16x16xf32, #tpu.memory_space<vmem>>, vector<1x4x16x16xf32>
    %3 = vector.shape_cast %2 : vector<1x4x16x16xf32> to vector<4x16x16xf32>
    %c0_6 = arith.constant 0 : index
    %c1 = arith.constant 1 : index
    %c1_7 = arith.constant 1 : index
    %4 = vector.load %arg5[%c0_6, %c1, %c1_7] : memref<4x18x18xf32, #tpu.memory_space<vmem>>, vector<4x16x16xf32>
    tpu.vector_store %arg5[%c0_6, %c1, %c1_7], %3 {strides = array<i32>} : memref<4x18x18xf32, #tpu.memory_space<vmem>>, vector<4x16x16xf32>,
    %c0_8 = arith.constant 0 : index
    %c0_9 = arith.constant 0 : index
    %c0_10 = arith.constant 0 : index
    %5 = vector.load %arg5[%c0_8, %c0_9, %c0_10] : memref<4x18x18xf32, #tpu.memory_space<vmem>>, vector<4x1x16xf32>
    %6 = vector.shape_cast %5 : vector<4x1x16xf32> to vector<4x16xf32>
    %c0_11 = arith.constant 0 : index
    %c0_12 = arith.constant 0 : index
    %7 = vector.load %arg6[%c0_11, %c0_12] : memref<36x256xf32, #tpu.memory_space<vmem>>, vector<4x16xf32>
    tpu.vector_store %arg6[%c0_11, %c0_12], %6 {strides = array<i32>} : memref<36x256xf32, #tpu.memory_space<vmem>>, vector<4x16xf32>,
    %c0_13 = arith.constant 0 : index
    %c1_14 = arith.constant 1 : index
    %c0_15 = arith.constant 0 : index
    %8 = vector.load %arg5[%c0_13, %c1_14, %c0_15] : memref<4x18x18xf32, #tpu.memory_space<vmem>>, vector<4x1x16xf32>
    %9 = vector.shape_cast %8 : vector<4x1x16xf32> to vector<4x16xf32>
    %c0_16 = arith.constant 0 : index
    %c16 = arith.constant 16 : index
    %10 = vector.load %arg6[%c0_16, %c16] : memref<36x256xf32, #tpu.memory_space<vmem>>, vector<4x16xf32>
    tpu.vector_store %arg6[%c0_16, %c16], %9 {strides = array<i32>} : memref<36x256xf32, #tpu.memory_space<vmem>>, vector<4x16xf32>,
    %c0_17 = arith.constant 0 : index
    %c2 = arith.constant 2 : index
    %c0_18 = arith.constant 0 : index
    %11 = vector.load %arg5[%c0_17, %c2, %c0_18] : memref<4x18x18xf32, #tpu.memory_space<vmem>>, vector<4x1x16xf32>
    %12 = vector.shape_cast %11 : vector<4x1x16xf32> to vector<4x16xf32>
    %c0_19 = arith.constant 0 : index
    %c32 = arith.constant 32 : index
    %13 = vector.load %arg6[%c0_19, %c32] : memref<36x256xf32, #tpu.memory_space<vmem>>, vector<4x16xf32>
    tpu.vector_store %arg6[%c0_19, %c32], %12 {strides = array<i32>} : memref<36x256xf32, #tpu.memory_space<vmem>>, vector<4x16xf32>,
    %c0_20 = arith.constant 0 : index
    %c3 = arith.constant 3 : index
    %c0_21 = arith.constant 0 : index
    %14 = vector.load %arg5[%c0_20, %c3, %c0_21] : memref<4x18x18xf32, #tpu.memory_space<vmem>>, vector<4x1x16xf32>
    %15 = vector.shape_cast %14 : vector<4x1x16xf32> to vector<4x16xf32>
    %c0_22 = arith.constant 0 : index
    %c48 = arith.constant 48 : index
    %16 = vector.load %arg6[%c0_22, %c48] : memref<36x256xf32, #tpu.memory_space<vmem>>, vector<4x16xf32>
    tpu.vector_store %arg6[%c0_22, %c48], %15 {strides = array<i32>} : memref<36x256xf32, #tpu.memory_space<vmem>>, vector<4x16xf32>,
    %c0_23 = arith.constant 0 : index
    %c4 = arith.constant 4 : index
    %c0_24 = arith.constant 0 : index
    %17 = vector.load %arg5[%c0_23, %c4, %c0_24] : memref<4x18x18xf32, #tpu.memory_space<vmem>>, vector<4x1x16xf32>
    %18 = vector.shape_cast %17 : vector<4x1x16xf32> to vector<4x16xf32>
    %c0_25 = arith.constant 0 : index
    %c64 = arith.constant 64 : index
    %19 = vector.load %arg6[%c0_25, %c64] : memref<36x256xf32, #tpu.memory_space<vmem>>, vector<4x16xf32>
    tpu.vector_store %arg6[%c0_25, %c64], %18 {strides = array<i32>} : memref<36x256xf32, #tpu.memory_space<vmem>>, vector<4x16xf32>,
    %c0_26 = arith.constant 0 : index
    %c5 = arith.constant 5 : index
    %c0_27 = arith.constant 0 : index
    %20 = vector.load %arg5[%c0_26, %c5, %c0_27] : memref<4x18x18xf32, #tpu.memory_space<vmem>>, vector<4x1x16xf32>
    %21 = vector.shape_cast %20 : vector<4x1x16xf32> to vector<4x16xf32>
    %c0_28 = arith.constant 0 : index
    %c80 = arith.constant 80 : index
    %22 = vector.load %arg6[%c0_28, %c80] : memref<36x256xf32, #tpu.memory_space<vmem>>, vector<4x16xf32>
    tpu.vector_store %arg6[%c0_28, %c80], %21 {strides = array<i32>} : memref<36x256xf32, #tpu.memory_space<vmem>>, vector<4x16xf32>,
    %c0_29 = arith.constant 0 : index
    %c6 = arith.constant 6 : index
    %c0_30 = arith.constant 0 : index
    %23 = vector.load %arg5[%c0_29, %c6, %c0_30] : memref<4x18x18xf32, #tpu.memory_space<vmem>>, vector<4x1x16xf32>
    %24 = vector.shape_cast %23 : vector<4x1x16xf32> to vector<4x16xf32>
    %c0_31 = arith.constant 0 : index
    %c96 = arith.constant 96 : index
    %25 = vector.load %arg6[%c0_31, %c96] : memref<36x256xf32, #tpu.memory_space<vmem>>, vector<4x16xf32>
    tpu.vector_store %arg6[%c0_31, %c96], %24 {strides = array<i32>} : memref<36x256xf32, #tpu.memory_space<vmem>>, vector<4x16xf32>,
    %c0_32 = arith.constant 0 : index
    %c7 = arith.constant 7 : index
    %c0_33 = arith.constant 0 : index
    %26 = vector.load %arg5[%c0_32, %c7, %c0_33] : memref<4x18x18xf32, #tpu.memory_space<vmem>>, vector<4x1x16xf32>
    %27 = vector.shape_cast %26 : vector<4x1x16xf32> to vector<4x16xf32>
    %c0_34 = arith.constant 0 : index
    %c112 = arith.constant 112 : index
    %28 = vector.load %arg6[%c0_34, %c112] : memref<36x256xf32, #tpu.memory_space<vmem>>, vector<4x16xf32>
    tpu.vector_store %arg6[%c0_34, %c112], %27 {strides = array<i32>} : memref<36x256xf32, #tpu.memory_space<vmem>>, vector<4x16xf32>,
    %c0_35 = arith.constant 0 : index
    %c8 = arith.constant 8 : index
    %c0_36 = arith.constant 0 : index
    %29 = vector.load %arg5[%c0_35, %c8, %c0_36] : memref<4x18x18xf32, #tpu.memory_space<vmem>>, vector<4x1x16xf32>
    %30 = vector.shape_cast %29 : vector<4x1x16xf32> to vector<4x16xf32>
    %c0_37 = arith.constant 0 : index
    %c128 = arith.constant 128 : index
    %31 = vector.load %arg6[%c0_37, %c128] : memref<36x256xf32, #tpu.memory_space<vmem>>, vector<4x16xf32>
    tpu.vector_store %arg6[%c0_37, %c128], %30 {strides = array<i32>} : memref<36x256xf32, #tpu.memory_space<vmem>>, vector<4x16xf32>,
    %c0_38 = arith.constant 0 : index
    %c9 = arith.constant 9 : index
    %c0_39 = arith.constant 0 : index
    %32 = vector.load %arg5[%c0_38, %c9, %c0_39] : memref<4x18x18xf32, #tpu.memory_space<vmem>>, vector<4x1x16xf32>
    %33 = vector.shape_cast %32 : vector<4x1x16xf32> to vector<4x16xf32>
    %c0_40 = arith.constant 0 : index
    %c144 = arith.constant 144 : index
    %34 = vector.load %arg6[%c0_40, %c144] : memref<36x256xf32, #tpu.memory_space<vmem>>, vector<4x16xf32>
    tpu.vector_store %arg6[%c0_40, %c144], %33 {strides = array<i32>} : memref<36x256xf32, #tpu.memory_space<vmem>>, vector<4x16xf32>,
    %c0_41 = arith.constant 0 : index
    %c10 = arith.constant 10 : index
    %c0_42 = arith.constant 0 : index
    %35 = vector.load %arg5[%c0_41, %c10, %c0_42] : memref<4x18x18xf32, #tpu.memory_space<vmem>>, vector<4x1x16xf32>
    %36 = vector.shape_cast %35 : vector<4x1x16xf32> to vector<4x16xf32>
    %c0_43 = arith.constant 0 : index
    %c160 = arith.constant 160 : index
    %37 = vector.load %arg6[%c0_43, %c160] : memref<36x256xf32, #tpu.memory_space<vmem>>, vector<4x16xf32>
    tpu.vector_store %arg6[%c0_43, %c160], %36 {strides = array<i32>} : memref<36x256xf32, #tpu.memory_space<vmem>>, vector<4x16xf32>,
    %c0_44 = arith.constant 0 : index
    %c11 = arith.constant 11 : index
    %c0_45 = arith.constant 0 : index
    %38 = vector.load %arg5[%c0_44, %c11, %c0_45] : memref<4x18x18xf32, #tpu.memory_space<vmem>>, vector<4x1x16xf32>
    %39 = vector.shape_cast %38 : vector<4x1x16xf32> to vector<4x16xf32>
    %c0_46 = arith.constant 0 : index
    %c176 = arith.constant 176 : index
    %40 = vector.load %arg6[%c0_46, %c176] : memref<36x256xf32, #tpu.memory_space<vmem>>, vector<4x16xf32>
    tpu.vector_store %arg6[%c0_46, %c176], %39 {strides = array<i32>} : memref<36x256xf32, #tpu.memory_space<vmem>>, vector<4x16xf32>,
    %c0_47 = arith.constant 0 : index
    %c12 = arith.constant 12 : index
    %c0_48 = arith.constant 0 : index
    %41 = vector.load %arg5[%c0_47, %c12, %c0_48] : memref<4x18x18xf32, #tpu.memory_space<vmem>>, vector<4x1x16xf32>
    %42 = vector.shape_cast %41 : vector<4x1x16xf32> to vector<4x16xf32>
    %c0_49 = arith.constant 0 : index
    %c192 = arith.constant 192 : index
    %43 = vector.load %arg6[%c0_49, %c192] : memref<36x256xf32, #tpu.memory_space<vmem>>, vector<4x16xf32>
    tpu.vector_store %arg6[%c0_49, %c192], %42 {strides = array<i32>} : memref<36x256xf32, #tpu.memory_space<vmem>>, vector<4x16xf32>,
    %c0_50 = arith.constant 0 : index
    %c13 = arith.constant 13 : index
    %c0_51 = arith.constant 0 : index
    %44 = vector.load %arg5[%c0_50, %c13, %c0_51] : memref<4x18x18xf32, #tpu.memory_space<vmem>>, vector<4x1x16xf32>
    %45 = vector.shape_cast %44 : vector<4x1x16xf32> to vector<4x16xf32>
    %c0_52 = arith.constant 0 : index
    %c208 = arith.constant 208 : index
    %46 = vector.load %arg6[%c0_52, %c208] : memref<36x256xf32, #tpu.memory_space<vmem>>, vector<4x16xf32>
    tpu.vector_store %arg6[%c0_52, %c208], %45 {strides = array<i32>} : memref<36x256xf32, #tpu.memory_space<vmem>>, vector<4x16xf32>,
    %c0_53 = arith.constant 0 : index
    %c14 = arith.constant 14 : index
    %c0_54 = arith.constant 0 : index
    %47 = vector.load %arg5[%c0_53, %c14, %c0_54] : memref<4x18x18xf32, #tpu.memory_space<vmem>>, vector<4x1x16xf32>
    %48 = vector.shape_cast %47 : vector<4x1x16xf32> to vector<4x16xf32>
    %c0_55 = arith.constant 0 : index
    %c224 = arith.constant 224 : index
    %49 = vector.load %arg6[%c0_55, %c224] : memref<36x256xf32, #tpu.memory_space<vmem>>, vector<4x16xf32>
    tpu.vector_store %arg6[%c0_55, %c224], %48 {strides = array<i32>} : memref<36x256xf32, #tpu.memory_space<vmem>>, vector<4x16xf32>,
    %c0_56 = arith.constant 0 : index
    %c15 = arith.constant 15 : index
    %c0_57 = arith.constant 0 : index
    %50 = vector.load %arg5[%c0_56, %c15, %c0_57] : memref<4x18x18xf32, #tpu.memory_space<vmem>>, vector<4x1x16xf32>
    %51 = vector.shape_cast %50 : vector<4x1x16xf32> to vector<4x16xf32>
    %c0_58 = arith.constant 0 : index
    %c240 = arith.constant 240 : index
    %52 = vector.load %arg6[%c0_58, %c240] : memref<36x256xf32, #tpu.memory_space<vmem>>, vector<4x16xf32>
    tpu.vector_store %arg6[%c0_58, %c240], %51 {strides = array<i32>} : memref<36x256xf32, #tpu.memory_space<vmem>>, vector<4x16xf32>,
    %c0_59 = arith.constant 0 : index
    %c0_60 = arith.constant 0 : index
    %c1_61 = arith.constant 1 : index
    %53 = vector.load %arg5[%c0_59, %c0_60, %c1_61] : memref<4x18x18xf32, #tpu.memory_space<vmem>>, vector<4x1x16xf32>
    %54 = vector.shape_cast %53 : vector<4x1x16xf32> to vector<4x16xf32>
    %c4_62 = arith.constant 4 : index
    %c0_63 = arith.constant 0 : index
    %55 = vector.load %arg6[%c4_62, %c0_63] : memref<36x256xf32, #tpu.memory_space<vmem>>, vector<4x16xf32>
    tpu.vector_store %arg6[%c4_62, %c0_63], %54 {strides = array<i32>} : memref<36x256xf32, #tpu.memory_space<vmem>>, vector<4x16xf32>,
    %c0_64 = arith.constant 0 : index
    %c1_65 = arith.constant 1 : index
    %c1_66 = arith.constant 1 : index
    %56 = vector.load %arg5[%c0_64, %c1_65, %c1_66] : memref<4x18x18xf32, #tpu.memory_space<vmem>>, vector<4x1x16xf32>
    %57 = vector.shape_cast %56 : vector<4x1x16xf32> to vector<4x16xf32>
    %c4_67 = arith.constant 4 : index
    %c16_68 = arith.constant 16 : index
    %58 = vector.load %arg6[%c4_67, %c16_68] : memref<36x256xf32, #tpu.memory_space<vmem>>, vector<4x16xf32>
    tpu.vector_store %arg6[%c4_67, %c16_68], %57 {strides = array<i32>} : memref<36x256xf32, #tpu.memory_space<vmem>>, vector<4x16xf32>,
    %c0_69 = arith.constant 0 : index
    %c2_70 = arith.constant 2 : index
    %c1_71 = arith.constant 1 : index
    %59 = vector.load %arg5[%c0_69, %c2_70, %c1_71] : memref<4x18x18xf32, #tpu.memory_space<vmem>>, vector<4x1x16xf32>
    %60 = vector.shape_cast %59 : vector<4x1x16xf32> to vector<4x16xf32>
    %c4_72 = arith.constant 4 : index
    %c32_73 = arith.constant 32 : index
    %61 = vector.load %arg6[%c4_72, %c32_73] : memref<36x256xf32, #tpu.memory_space<vmem>>, vector<4x16xf32>
    tpu.vector_store %arg6[%c4_72, %c32_73], %60 {strides = array<i32>} : memref<36x256xf32, #tpu.memory_space<vmem>>, vector<4x16xf32>,
    %c0_74 = arith.constant 0 : index
    %c3_75 = arith.constant 3 : index
    %c1_76 = arith.constant 1 : index
    %62 = vector.load %arg5[%c0_74, %c3_75, %c1_76] : memref<4x18x18xf32, #tpu.memory_space<vmem>>, vector<4x1x16xf32>
    %63 = vector.shape_cast %62 : vector<4x1x16xf32> to vector<4x16xf32>
    %c4_77 = arith.constant 4 : index
    %c48_78 = arith.constant 48 : index
    %64 = vector.load %arg6[%c4_77, %c48_78] : memref<36x256xf32, #tpu.memory_space<vmem>>, vector<4x16xf32>
    tpu.vector_store %arg6[%c4_77, %c48_78], %63 {strides = array<i32>} : memref<36x256xf32, #tpu.memory_space<vmem>>, vector<4x16xf32>,
    %c0_79 = arith.constant 0 : index
    %c4_80 = arith.constant 4 : index
    %c1_81 = arith.constant 1 : index
    %65 = vector.load %arg5[%c0_79, %c4_80, %c1_81] : memref<4x18x18xf32, #tpu.memory_space<vmem>>, vector<4x1x16xf32>
    %66 = vector.shape_cast %65 : vector<4x1x16xf32> to vector<4x16xf32>
    %c4_82 = arith.constant 4 : index
    %c64_83 = arith.constant 64 : index
    %67 = vector.load %arg6[%c4_82, %c64_83] : memref<36x256xf32, #tpu.memory_space<vmem>>, vector<4x16xf32>
    tpu.vector_store %arg6[%c4_82, %c64_83], %66 {strides = array<i32>} : memref<36x256xf32, #tpu.memory_space<vmem>>, vector<4x16xf32>,
    %c0_84 = arith.constant 0 : index
    %c5_85 = arith.constant 5 : index
    %c1_86 = arith.constant 1 : index
    %68 = vector.load %arg5[%c0_84, %c5_85, %c1_86] : memref<4x18x18xf32, #tpu.memory_space<vmem>>, vector<4x1x16xf32>
    %69 = vector.shape_cast %68 : vector<4x1x16xf32> to vector<4x16xf32>
    %c4_87 = arith.constant 4 : index
    %c80_88 = arith.constant 80 : index
    %70 = vector.load %arg6[%c4_87, %c80_88] : memref<36x256xf32, #tpu.memory_space<vmem>>, vector<4x16xf32>
    tpu.vector_store %arg6[%c4_87, %c80_88], %69 {strides = array<i32>} : memref<36x256xf32, #tpu.memory_space<vmem>>, vector<4x16xf32>,
    %c0_89 = arith.constant 0 : index
    %c6_90 = arith.constant 6 : index
    %c1_91 = arith.constant 1 : index
    %71 = vector.load %arg5[%c0_89, %c6_90, %c1_91] : memref<4x18x18xf32, #tpu.memory_space<vmem>>, vector<4x1x16xf32>
    %72 = vector.shape_cast %71 : vector<4x1x16xf32> to vector<4x16xf32>
    %c4_92 = arith.constant 4 : index
    %c96_93 = arith.constant 96 : index
    %73 = vector.load %arg6[%c4_92, %c96_93] : memref<36x256xf32, #tpu.memory_space<vmem>>, vector<4x16xf32>
    tpu.vector_store %arg6[%c4_92, %c96_93], %72 {strides = array<i32>} : memref<36x256xf32, #tpu.memory_space<vmem>>, vector<4x16xf32>,
    %c0_94 = arith.constant 0 : index
    %c7_95 = arith.constant 7 : index
    %c1_96 = arith.constant 1 : index
    %74 = vector.load %arg5[%c0_94, %c7_95, %c1_96] : memref<4x18x18xf32, #tpu.memory_space<vmem>>, vector<4x1x16xf32>
    %75 = vector.shape_cast %74 : vector<4x1x16xf32> to vector<4x16xf32>
    %c4_97 = arith.constant 4 : index
    %c112_98 = arith.constant 112 : index
    %76 = vector.load %arg6[%c4_97, %c112_98] : memref<36x256xf32, #tpu.memory_space<vmem>>, vector<4x16xf32>
    tpu.vector_store %arg6[%c4_97, %c112_98], %75 {strides = array<i32>} : memref<36x256xf32, #tpu.memory_space<vmem>>, vector<4x16xf32>,
    %c0_99 = arith.constant 0 : index
    %c8_100 = arith.constant 8 : index
    %c1_101 = arith.constant 1 : index
    %77 = vector.load %arg5[%c0_99, %c8_100, %c1_101] : memref<4x18x18xf32, #tpu.memory_space<vmem>>, vector<4x1x16xf32>
    %78 = vector.shape_cast %77 : vector<4x1x16xf32> to vector<4x16xf32>
    %c4_102 = arith.constant 4 : index
    %c128_103 = arith.constant 128 : index
    %79 = vector.load %arg6[%c4_102, %c128_103] : memref<36x256xf32, #tpu.memory_space<vmem>>, vector<4x16xf32>
    tpu.vector_store %arg6[%c4_102, %c128_103], %78 {strides = array<i32>} : memref<36x256xf32, #tpu.memory_space<vmem>>, vector<4x16xf32>,
    %c0_104 = arith.constant 0 : index
    %c9_105 = arith.constant 9 : index
    %c1_106 = arith.constant 1 : index
    %80 = vector.load %arg5[%c0_104, %c9_105, %c1_106] : memref<4x18x18xf32, #tpu.memory_space<vmem>>, vector<4x1x16xf32>
    %81 = vector.shape_cast %80 : vector<4x1x16xf32> to vector<4x16xf32>
    %c4_107 = arith.constant 4 : index
    %c144_108 = arith.constant 144 : index
    %82 = vector.load %arg6[%c4_107, %c144_108] : memref<36x256xf32, #tpu.memory_space<vmem>>, vector<4x16xf32>
    tpu.vector_store %arg6[%c4_107, %c144_108], %81 {strides = array<i32>} : memref<36x256xf32, #tpu.memory_space<vmem>>, vector<4x16xf32>,
    %c0_109 = arith.constant 0 : index
    %c10_110 = arith.constant 10 : index
    %c1_111 = arith.constant 1 : index
    %83 = vector.load %arg5[%c0_109, %c10_110, %c1_111] : memref<4x18x18xf32, #tpu.memory_space<vmem>>, vector<4x1x16xf32>
    %84 = vector.shape_cast %83 : vector<4x1x16xf32> to vector<4x16xf32>
    %c4_112 = arith.constant 4 : index
    %c160_113 = arith.constant 160 : index
    %85 = vector.load %arg6[%c4_112, %c160_113] : memref<36x256xf32, #tpu.memory_space<vmem>>, vector<4x16xf32>
    tpu.vector_store %arg6[%c4_112, %c160_113], %84 {strides = array<i32>} : memref<36x256xf32, #tpu.memory_space<vmem>>, vector<4x16xf32>,
    %c0_114 = arith.constant 0 : index
    %c11_115 = arith.constant 11 : index
    %c1_116 = arith.constant 1 : index
    %86 = vector.load %arg5[%c0_114, %c11_115, %c1_116] : memref<4x18x18xf32, #tpu.memory_space<vmem>>, vector<4x1x16xf32>
    %87 = vector.shape_cast %86 : vector<4x1x16xf32> to vector<4x16xf32>
    %c4_117 = arith.constant 4 : index
    %c176_118 = arith.constant 176 : index
    %88 = vector.load %arg6[%c4_117, %c176_118] : memref<36x256xf32, #tpu.memory_space<vmem>>, vector<4x16xf32>
    tpu.vector_store %arg6[%c4_117, %c176_118], %87 {strides = array<i32>} : memref<36x256xf32, #tpu.memory_space<vmem>>, vector<4x16xf32>,
    %c0_119 = arith.constant 0 : index
    %c12_120 = arith.constant 12 : index
    %c1_121 = arith.constant 1 : index
    %89 = vector.load %arg5[%c0_119, %c12_120, %c1_121] : memref<4x18x18xf32, #tpu.memory_space<vmem>>, vector<4x1x16xf32>
    %90 = vector.shape_cast %89 : vector<4x1x16xf32> to vector<4x16xf32>
    %c4_122 = arith.constant 4 : index
    %c192_123 = arith.constant 192 : index
    %91 = vector.load %arg6[%c4_122, %c192_123] : memref<36x256xf32, #tpu.memory_space<vmem>>, vector<4x16xf32>
    tpu.vector_store %arg6[%c4_122, %c192_123], %90 {strides = array<i32>} : memref<36x256xf32, #tpu.memory_space<vmem>>, vector<4x16xf32>,
    %c0_124 = arith.constant 0 : index
    %c13_125 = arith.constant 13 : index
    %c1_126 = arith.constant 1 : index
    %92 = vector.load %arg5[%c0_124, %c13_125, %c1_126] : memref<4x18x18xf32, #tpu.memory_space<vmem>>, vector<4x1x16xf32>
    %93 = vector.shape_cast %92 : vector<4x1x16xf32> to vector<4x16xf32>
    %c4_127 = arith.constant 4 : index
    %c208_128 = arith.constant 208 : index
    %94 = vector.load %arg6[%c4_127, %c208_128] : memref<36x256xf32, #tpu.memory_space<vmem>>, vector<4x16xf32>
    tpu.vector_store %arg6[%c4_127, %c208_128], %93 {strides = array<i32>} : memref<36x256xf32, #tpu.memory_space<vmem>>, vector<4x16xf32>,
    %c0_129 = arith.constant 0 : index
    %c14_130 = arith.constant 14 : index
    %c1_131 = arith.constant 1 : index
    %95 = vector.load %arg5[%c0_129, %c14_130, %c1_131] : memref<4x18x18xf32, #tpu.memory_space<vmem>>, vector<4x1x16xf32>
    %96 = vector.shape_cast %95 : vector<4x1x16xf32> to vector<4x16xf32>
    %c4_132 = arith.constant 4 : index
    %c224_133 = arith.constant 224 : index
    %97 = vector.load %arg6[%c4_132, %c224_133] : memref<36x256xf32, #tpu.memory_space<vmem>>, vector<4x16xf32>
    tpu.vector_store %arg6[%c4_132, %c224_133], %96 {strides = array<i32>} : memref<36x256xf32, #tpu.memory_space<vmem>>, vector<4x16xf32>,
    %c0_134 = arith.constant 0 : index
    %c15_135 = arith.constant 15 : index
    %c1_136 = arith.constant 1 : index
    %98 = vector.load %arg5[%c0_134, %c15_135, %c1_136] : memref<4x18x18xf32, #tpu.memory_space<vmem>>, vector<4x1x16xf32>
    %99 = vector.shape_cast %98 : vector<4x1x16xf32> to vector<4x16xf32>
    %c4_137 = arith.constant 4 : index
    %c240_138 = arith.constant 240 : index
    %100 = vector.load %arg6[%c4_137, %c240_138] : memref<36x256xf32, #tpu.memory_space<vmem>>, vector<4x16xf32>
    tpu.vector_store %arg6[%c4_137, %c240_138], %99 {strides = array<i32>} : memref<36x256xf32, #tpu.memory_space<vmem>>, vector<4x16xf32>,
    %c0_139 = arith.constant 0 : index
    %c0_140 = arith.constant 0 : index
    %c2_141 = arith.constant 2 : index
    %101 = vector.load %arg5[%c0_139, %c0_140, %c2_141] : memref<4x18x18xf32, #tpu.memory_space<vmem>>, vector<4x1x16xf32>
    %102 = vector.shape_cast %101 : vector<4x1x16xf32> to vector<4x16xf32>
    %c8_142 = arith.constant 8 : index
    %c0_143 = arith.constant 0 : index
    %103 = vector.load %arg6[%c8_142, %c0_143] : memref<36x256xf32, #tpu.memory_space<vmem>>, vector<4x16xf32>
    tpu.vector_store %arg6[%c8_142, %c0_143], %102 {strides = array<i32>} : memref<36x256xf32, #tpu.memory_space<vmem>>, vector<4x16xf32>,
    %c0_144 = arith.constant 0 : index
    %c1_145 = arith.constant 1 : index
    %c2_146 = arith.constant 2 : index
    %104 = vector.load %arg5[%c0_144, %c1_145, %c2_146] : memref<4x18x18xf32, #tpu.memory_space<vmem>>, vector<4x1x16xf32>
    %105 = vector.shape_cast %104 : vector<4x1x16xf32> to vector<4x16xf32>
    %c8_147 = arith.constant 8 : index
    %c16_148 = arith.constant 16 : index
    %106 = vector.load %arg6[%c8_147, %c16_148] : memref<36x256xf32, #tpu.memory_space<vmem>>, vector<4x16xf32>
    tpu.vector_store %arg6[%c8_147, %c16_148], %105 {strides = array<i32>} : memref<36x256xf32, #tpu.memory_space<vmem>>, vector<4x16xf32>,
    %c0_149 = arith.constant 0 : index
    %c2_150 = arith.constant 2 : index
    %c2_151 = arith.constant 2 : index
    %107 = vector.load %arg5[%c0_149, %c2_150, %c2_151] : memref<4x18x18xf32, #tpu.memory_space<vmem>>, vector<4x1x16xf32>
    %108 = vector.shape_cast %107 : vector<4x1x16xf32> to vector<4x16xf32>
    %c8_152 = arith.constant 8 : index
    %c32_153 = arith.constant 32 : index
    %109 = vector.load %arg6[%c8_152, %c32_153] : memref<36x256xf32, #tpu.memory_space<vmem>>, vector<4x16xf32>
    tpu.vector_store %arg6[%c8_152, %c32_153], %108 {strides = array<i32>} : memref<36x256xf32, #tpu.memory_space<vmem>>, vector<4x16xf32>,
    %c0_154 = arith.constant 0 : index
    %c3_155 = arith.constant 3 : index
    %c2_156 = arith.constant 2 : index
    %110 = vector.load %arg5[%c0_154, %c3_155, %c2_156] : memref<4x18x18xf32, #tpu.memory_space<vmem>>, vector<4x1x16xf32>
    %111 = vector.shape_cast %110 : vector<4x1x16xf32> to vector<4x16xf32>
    %c8_157 = arith.constant 8 : index
    %c48_158 = arith.constant 48 : index
    %112 = vector.load %arg6[%c8_157, %c48_158] : memref<36x256xf32, #tpu.memory_space<vmem>>, vector<4x16xf32>
    tpu.vector_store %arg6[%c8_157, %c48_158], %111 {strides = array<i32>} : memref<36x256xf32, #tpu.memory_space<vmem>>, vector<4x16xf32>,
    %c0_159 = arith.constant 0 : index
    %c4_160 = arith.constant 4 : index
    %c2_161 = arith.constant 2 : index
    %113 = vector.load %arg5[%c0_159, %c4_160, %c2_161] : memref<4x18x18xf32, #tpu.memory_space<vmem>>, vector<4x1x16xf32>
    %114 = vector.shape_cast %113 : vector<4x1x16xf32> to vector<4x16xf32>
    %c8_162 = arith.constant 8 : index
    %c64_163 = arith.constant 64 : index
    %115 = vector.load %arg6[%c8_162, %c64_163] : memref<36x256xf32, #tpu.memory_space<vmem>>, vector<4x16xf32>
    tpu.vector_store %arg6[%c8_162, %c64_163], %114 {strides = array<i32>} : memref<36x256xf32, #tpu.memory_space<vmem>>, vector<4x16xf32>,
    %c0_164 = arith.constant 0 : index
    %c5_165 = arith.constant 5 : index
    %c2_166 = arith.constant 2 : index
    %116 = vector.load %arg5[%c0_164, %c5_165, %c2_166] : memref<4x18x18xf32, #tpu.memory_space<vmem>>, vector<4x1x16xf32>
    %117 = vector.shape_cast %116 : vector<4x1x16xf32> to vector<4x16xf32>
    %c8_167 = arith.constant 8 : index
    %c80_168 = arith.constant 80 : index
    %118 = vector.load %arg6[%c8_167, %c80_168] : memref<36x256xf32, #tpu.memory_space<vmem>>, vector<4x16xf32>
    tpu.vector_store %arg6[%c8_167, %c80_168], %117 {strides = array<i32>} : memref<36x256xf32, #tpu.memory_space<vmem>>, vector<4x16xf32>,
    %c0_169 = arith.constant 0 : index
    %c6_170 = arith.constant 6 : index
    %c2_171 = arith.constant 2 : index
    %119 = vector.load %arg5[%c0_169, %c6_170, %c2_171] : memref<4x18x18xf32, #tpu.memory_space<vmem>>, vector<4x1x16xf32>
    %120 = vector.shape_cast %119 : vector<4x1x16xf32> to vector<4x16xf32>
    %c8_172 = arith.constant 8 : index
    %c96_173 = arith.constant 96 : index
    %121 = vector.load %arg6[%c8_172, %c96_173] : memref<36x256xf32, #tpu.memory_space<vmem>>, vector<4x16xf32>
    tpu.vector_store %arg6[%c8_172, %c96_173], %120 {strides = array<i32>} : memref<36x256xf32, #tpu.memory_space<vmem>>, vector<4x16xf32>,
    %c0_174 = arith.constant 0 : index
    %c7_175 = arith.constant 7 : index
    %c2_176 = arith.constant 2 : index
    %122 = vector.load %arg5[%c0_174, %c7_175, %c2_176] : memref<4x18x18xf32, #tpu.memory_space<vmem>>, vector<4x1x16xf32>
    %123 = vector.shape_cast %122 : vector<4x1x16xf32> to vector<4x16xf32>
    %c8_177 = arith.constant 8 : index
    %c112_178 = arith.constant 112 : index
    %124 = vector.load %arg6[%c8_177, %c112_178] : memref<36x256xf32, #tpu.memory_space<vmem>>, vector<4x16xf32>
    tpu.vector_store %arg6[%c8_177, %c112_178], %123 {strides = array<i32>} : memref<36x256xf32, #tpu.memory_space<vmem>>, vector<4x16xf32>,
    %c0_179 = arith.constant 0 : index
    %c8_180 = arith.constant 8 : index
    %c2_181 = arith.constant 2 : index
    %125 = vector.load %arg5[%c0_179, %c8_180, %c2_181] : memref<4x18x18xf32, #tpu.memory_space<vmem>>, vector<4x1x16xf32>
    %126 = vector.shape_cast %125 : vector<4x1x16xf32> to vector<4x16xf32>
    %c8_182 = arith.constant 8 : index
    %c128_183 = arith.constant 128 : index
    %127 = vector.load %arg6[%c8_182, %c128_183] : memref<36x256xf32, #tpu.memory_space<vmem>>, vector<4x16xf32>
    tpu.vector_store %arg6[%c8_182, %c128_183], %126 {strides = array<i32>} : memref<36x256xf32, #tpu.memory_space<vmem>>, vector<4x16xf32>,
    %c0_184 = arith.constant 0 : index
    %c9_185 = arith.constant 9 : index
    %c2_186 = arith.constant 2 : index
    %128 = vector.load %arg5[%c0_184, %c9_185, %c2_186] : memref<4x18x18xf32, #tpu.memory_space<vmem>>, vector<4x1x16xf32>
    %129 = vector.shape_cast %128 : vector<4x1x16xf32> to vector<4x16xf32>
    %c8_187 = arith.constant 8 : index
    %c144_188 = arith.constant 144 : index
    %130 = vector.load %arg6[%c8_187, %c144_188] : memref<36x256xf32, #tpu.memory_space<vmem>>, vector<4x16xf32>
    tpu.vector_store %arg6[%c8_187, %c144_188], %129 {strides = array<i32>} : memref<36x256xf32, #tpu.memory_space<vmem>>, vector<4x16xf32>,
    %c0_189 = arith.constant 0 : index
    %c10_190 = arith.constant 10 : index
    %c2_191 = arith.constant 2 : index
    %131 = vector.load %arg5[%c0_189, %c10_190, %c2_191] : memref<4x18x18xf32, #tpu.memory_space<vmem>>, vector<4x1x16xf32>
    %132 = vector.shape_cast %131 : vector<4x1x16xf32> to vector<4x16xf32>
    %c8_192 = arith.constant 8 : index
    %c160_193 = arith.constant 160 : index
    %133 = vector.load %arg6[%c8_192, %c160_193] : memref<36x256xf32, #tpu.memory_space<vmem>>, vector<4x16xf32>
    tpu.vector_store %arg6[%c8_192, %c160_193], %132 {strides = array<i32>} : memref<36x256xf32, #tpu.memory_space<vmem>>, vector<4x16xf32>,
    %c0_194 = arith.constant 0 : index
    %c11_195 = arith.constant 11 : index
    %c2_196 = arith.constant 2 : index
    %134 = vector.load %arg5[%c0_194, %c11_195, %c2_196] : memref<4x18x18xf32, #tpu.memory_space<vmem>>, vector<4x1x16xf32>
    %135 = vector.shape_cast %134 : vector<4x1x16xf32> to vector<4x16xf32>
    %c8_197 = arith.constant 8 : index
    %c176_198 = arith.constant 176 : index
    %136 = vector.load %arg6[%c8_197, %c176_198] : memref<36x256xf32, #tpu.memory_space<vmem>>, vector<4x16xf32>
    tpu.vector_store %arg6[%c8_197, %c176_198], %135 {strides = array<i32>} : memref<36x256xf32, #tpu.memory_space<vmem>>, vector<4x16xf32>,
    %c0_199 = arith.constant 0 : index
    %c12_200 = arith.constant 12 : index
    %c2_201 = arith.constant 2 : index
    %137 = vector.load %arg5[%c0_199, %c12_200, %c2_201] : memref<4x18x18xf32, #tpu.memory_space<vmem>>, vector<4x1x16xf32>
    %138 = vector.shape_cast %137 : vector<4x1x16xf32> to vector<4x16xf32>
    %c8_202 = arith.constant 8 : index
    %c192_203 = arith.constant 192 : index
    %139 = vector.load %arg6[%c8_202, %c192_203] : memref<36x256xf32, #tpu.memory_space<vmem>>, vector<4x16xf32>
    tpu.vector_store %arg6[%c8_202, %c192_203], %138 {strides = array<i32>} : memref<36x256xf32, #tpu.memory_space<vmem>>, vector<4x16xf32>,
    %c0_204 = arith.constant 0 : index
    %c13_205 = arith.constant 13 : index
    %c2_206 = arith.constant 2 : index
    %140 = vector.load %arg5[%c0_204, %c13_205, %c2_206] : memref<4x18x18xf32, #tpu.memory_space<vmem>>, vector<4x1x16xf32>
    %141 = vector.shape_cast %140 : vector<4x1x16xf32> to vector<4x16xf32>
    %c8_207 = arith.constant 8 : index
    %c208_208 = arith.constant 208 : index
    %142 = vector.load %arg6[%c8_207, %c208_208] : memref<36x256xf32, #tpu.memory_space<vmem>>, vector<4x16xf32>
    tpu.vector_store %arg6[%c8_207, %c208_208], %141 {strides = array<i32>} : memref<36x256xf32, #tpu.memory_space<vmem>>, vector<4x16xf32>,
    %c0_209 = arith.constant 0 : index
    %c14_210 = arith.constant 14 : index
    %c2_211 = arith.constant 2 : index
    %143 = vector.load %arg5[%c0_209, %c14_210, %c2_211] : memref<4x18x18xf32, #tpu.memory_space<vmem>>, vector<4x1x16xf32>
    %144 = vector.shape_cast %143 : vector<4x1x16xf32> to vector<4x16xf32>
    %c8_212 = arith.constant 8 : index
    %c224_213 = arith.constant 224 : index
    %145 = vector.load %arg6[%c8_212, %c224_213] : memref<36x256xf32, #tpu.memory_space<vmem>>, vector<4x16xf32>
    tpu.vector_store %arg6[%c8_212, %c224_213], %144 {strides = array<i32>} : memref<36x256xf32, #tpu.memory_space<vmem>>, vector<4x16xf32>,
    %c0_214 = arith.constant 0 : index
    %c15_215 = arith.constant 15 : index
    %c2_216 = arith.constant 2 : index
    %146 = vector.load %arg5[%c0_214, %c15_215, %c2_216] : memref<4x18x18xf32, #tpu.memory_space<vmem>>, vector<4x1x16xf32>
    %147 = vector.shape_cast %146 : vector<4x1x16xf32> to vector<4x16xf32>
    %c8_217 = arith.constant 8 : index
    %c240_218 = arith.constant 240 : index
    %148 = vector.load %arg6[%c8_217, %c240_218] : memref<36x256xf32, #tpu.memory_space<vmem>>, vector<4x16xf32>
    tpu.vector_store %arg6[%c8_217, %c240_218], %147 {strides = array<i32>} : memref<36x256xf32, #tpu.memory_space<vmem>>, vector<4x16xf32>,
    %c0_219 = arith.constant 0 : index
    %c1_220 = arith.constant 1 : index
    %c0_221 = arith.constant 0 : index
    %149 = vector.load %arg5[%c0_219, %c1_220, %c0_221] : memref<4x18x18xf32, #tpu.memory_space<vmem>>, vector<4x1x16xf32>
    %150 = vector.shape_cast %149 : vector<4x1x16xf32> to vector<4x16xf32>
    %c12_222 = arith.constant 12 : index
    %c0_223 = arith.constant 0 : index
    %151 = vector.load %arg6[%c12_222, %c0_223] : memref<36x256xf32, #tpu.memory_space<vmem>>, vector<4x16xf32>
    tpu.vector_store %arg6[%c12_222, %c0_223], %150 {strides = array<i32>} : memref<36x256xf32, #tpu.memory_space<vmem>>, vector<4x16xf32>,
    %c0_224 = arith.constant 0 : index
    %c2_225 = arith.constant 2 : index
    %c0_226 = arith.constant 0 : index
    %152 = vector.load %arg5[%c0_224, %c2_225, %c0_226] : memref<4x18x18xf32, #tpu.memory_space<vmem>>, vector<4x1x16xf32>
    %153 = vector.shape_cast %152 : vector<4x1x16xf32> to vector<4x16xf32>
    %c12_227 = arith.constant 12 : index
    %c16_228 = arith.constant 16 : index
    %154 = vector.load %arg6[%c12_227, %c16_228] : memref<36x256xf32, #tpu.memory_space<vmem>>, vector<4x16xf32>
    tpu.vector_store %arg6[%c12_227, %c16_228], %153 {strides = array<i32>} : memref<36x256xf32, #tpu.memory_space<vmem>>, vector<4x16xf32>,
    %c0_229 = arith.constant 0 : index
    %c3_230 = arith.constant 3 : index
    %c0_231 = arith.constant 0 : index
    %155 = vector.load %arg5[%c0_229, %c3_230, %c0_231] : memref<4x18x18xf32, #tpu.memory_space<vmem>>, vector<4x1x16xf32>
    %156 = vector.shape_cast %155 : vector<4x1x16xf32> to vector<4x16xf32>
    %c12_232 = arith.constant 12 : index
    %c32_233 = arith.constant 32 : index
    %157 = vector.load %arg6[%c12_232, %c32_233] : memref<36x256xf32, #tpu.memory_space<vmem>>, vector<4x16xf32>
    tpu.vector_store %arg6[%c12_232, %c32_233], %156 {strides = array<i32>} : memref<36x256xf32, #tpu.memory_space<vmem>>, vector<4x16xf32>,
    %c0_234 = arith.constant 0 : index
    %c4_235 = arith.constant 4 : index
    %c0_236 = arith.constant 0 : index
    %158 = vector.load %arg5[%c0_234, %c4_235, %c0_236] : memref<4x18x18xf32, #tpu.memory_space<vmem>>, vector<4x1x16xf32>
    %159 = vector.shape_cast %158 : vector<4x1x16xf32> to vector<4x16xf32>
    %c12_237 = arith.constant 12 : index
    %c48_238 = arith.constant 48 : index
    %160 = vector.load %arg6[%c12_237, %c48_238] : memref<36x256xf32, #tpu.memory_space<vmem>>, vector<4x16xf32>
    tpu.vector_store %arg6[%c12_237, %c48_238], %159 {strides = array<i32>} : memref<36x256xf32, #tpu.memory_space<vmem>>, vector<4x16xf32>,
    %c0_239 = arith.constant 0 : index
    %c5_240 = arith.constant 5 : index
    %c0_241 = arith.constant 0 : index
    %161 = vector.load %arg5[%c0_239, %c5_240, %c0_241] : memref<4x18x18xf32, #tpu.memory_space<vmem>>, vector<4x1x16xf32>
    %162 = vector.shape_cast %161 : vector<4x1x16xf32> to vector<4x16xf32>
    %c12_242 = arith.constant 12 : index
    %c64_243 = arith.constant 64 : index
    %163 = vector.load %arg6[%c12_242, %c64_243] : memref<36x256xf32, #tpu.memory_space<vmem>>, vector<4x16xf32>
    tpu.vector_store %arg6[%c12_242, %c64_243], %162 {strides = array<i32>} : memref<36x256xf32, #tpu.memory_space<vmem>>, vector<4x16xf32>,
    %c0_244 = arith.constant 0 : index
    %c6_245 = arith.constant 6 : index
    %c0_246 = arith.constant 0 : index
    %164 = vector.load %arg5[%c0_244, %c6_245, %c0_246] : memref<4x18x18xf32, #tpu.memory_space<vmem>>, vector<4x1x16xf32>
    %165 = vector.shape_cast %164 : vector<4x1x16xf32> to vector<4x16xf32>
    %c12_247 = arith.constant 12 : index
    %c80_248 = arith.constant 80 : index
    %166 = vector.load %arg6[%c12_247, %c80_248] : memref<36x256xf32, #tpu.memory_space<vmem>>, vector<4x16xf32>
    tpu.vector_store %arg6[%c12_247, %c80_248], %165 {strides = array<i32>} : memref<36x256xf32, #tpu.memory_space<vmem>>, vector<4x16xf32>,
    %c0_249 = arith.constant 0 : index
    %c7_250 = arith.constant 7 : index
    %c0_251 = arith.constant 0 : index
    %167 = vector.load %arg5[%c0_249, %c7_250, %c0_251] : memref<4x18x18xf32, #tpu.memory_space<vmem>>, vector<4x1x16xf32>
    %168 = vector.shape_cast %167 : vector<4x1x16xf32> to vector<4x16xf32>
    %c12_252 = arith.constant 12 : index
    %c96_253 = arith.constant 96 : index
    %169 = vector.load %arg6[%c12_252, %c96_253] : memref<36x256xf32, #tpu.memory_space<vmem>>, vector<4x16xf32>
    tpu.vector_store %arg6[%c12_252, %c96_253], %168 {strides = array<i32>} : memref<36x256xf32, #tpu.memory_space<vmem>>, vector<4x16xf32>,
    %c0_254 = arith.constant 0 : index
    %c8_255 = arith.constant 8 : index
    %c0_256 = arith.constant 0 : index
    %170 = vector.load %arg5[%c0_254, %c8_255, %c0_256] : memref<4x18x18xf32, #tpu.memory_space<vmem>>, vector<4x1x16xf32>
    %171 = vector.shape_cast %170 : vector<4x1x16xf32> to vector<4x16xf32>
    %c12_257 = arith.constant 12 : index
    %c112_258 = arith.constant 112 : index
    %172 = vector.load %arg6[%c12_257, %c112_258] : memref<36x256xf32, #tpu.memory_space<vmem>>, vector<4x16xf32>
    tpu.vector_store %arg6[%c12_257, %c112_258], %171 {strides = array<i32>} : memref<36x256xf32, #tpu.memory_space<vmem>>, vector<4x16xf32>,
    %c0_259 = arith.constant 0 : index
    %c9_260 = arith.constant 9 : index
    %c0_261 = arith.constant 0 : index
    %173 = vector.load %arg5[%c0_259, %c9_260, %c0_261] : memref<4x18x18xf32, #tpu.memory_space<vmem>>, vector<4x1x16xf32>
    %174 = vector.shape_cast %173 : vector<4x1x16xf32> to vector<4x16xf32>
    %c12_262 = arith.constant 12 : index
    %c128_263 = arith.constant 128 : index
    %175 = vector.load %arg6[%c12_262, %c128_263] : memref<36x256xf32, #tpu.memory_space<vmem>>, vector<4x16xf32>
    tpu.vector_store %arg6[%c12_262, %c128_263], %174 {strides = array<i32>} : memref<36x256xf32, #tpu.memory_space<vmem>>, vector<4x16xf32>,
    %c0_264 = arith.constant 0 : index
    %c10_265 = arith.constant 10 : index
    %c0_266 = arith.constant 0 : index
    %176 = vector.load %arg5[%c0_264, %c10_265, %c0_266] : memref<4x18x18xf32, #tpu.memory_space<vmem>>, vector<4x1x16xf32>
    %177 = vector.shape_cast %176 : vector<4x1x16xf32> to vector<4x16xf32>
    %c12_267 = arith.constant 12 : index
    %c144_268 = arith.constant 144 : index
    %178 = vector.load %arg6[%c12_267, %c144_268] : memref<36x256xf32, #tpu.memory_space<vmem>>, vector<4x16xf32>
    tpu.vector_store %arg6[%c12_267, %c144_268], %177 {strides = array<i32>} : memref<36x256xf32, #tpu.memory_space<vmem>>, vector<4x16xf32>,
    %c0_269 = arith.constant 0 : index
    %c11_270 = arith.constant 11 : index
    %c0_271 = arith.constant 0 : index
    %179 = vector.load %arg5[%c0_269, %c11_270, %c0_271] : memref<4x18x18xf32, #tpu.memory_space<vmem>>, vector<4x1x16xf32>
    %180 = vector.shape_cast %179 : vector<4x1x16xf32> to vector<4x16xf32>
    %c12_272 = arith.constant 12 : index
    %c160_273 = arith.constant 160 : index
    %181 = vector.load %arg6[%c12_272, %c160_273] : memref<36x256xf32, #tpu.memory_space<vmem>>, vector<4x16xf32>
    tpu.vector_store %arg6[%c12_272, %c160_273], %180 {strides = array<i32>} : memref<36x256xf32, #tpu.memory_space<vmem>>, vector<4x16xf32>,
    %c0_274 = arith.constant 0 : index
    %c12_275 = arith.constant 12 : index
    %c0_276 = arith.constant 0 : index
    %182 = vector.load %arg5[%c0_274, %c12_275, %c0_276] : memref<4x18x18xf32, #tpu.memory_space<vmem>>, vector<4x1x16xf32>
    %183 = vector.shape_cast %182 : vector<4x1x16xf32> to vector<4x16xf32>
    %c12_277 = arith.constant 12 : index
    %c176_278 = arith.constant 176 : index
    %184 = vector.load %arg6[%c12_277, %c176_278] : memref<36x256xf32, #tpu.memory_space<vmem>>, vector<4x16xf32>
    tpu.vector_store %arg6[%c12_277, %c176_278], %183 {strides = array<i32>} : memref<36x256xf32, #tpu.memory_space<vmem>>, vector<4x16xf32>,
    %c0_279 = arith.constant 0 : index
    %c13_280 = arith.constant 13 : index
    %c0_281 = arith.constant 0 : index
    %185 = vector.load %arg5[%c0_279, %c13_280, %c0_281] : memref<4x18x18xf32, #tpu.memory_space<vmem>>, vector<4x1x16xf32>
    %186 = vector.shape_cast %185 : vector<4x1x16xf32> to vector<4x16xf32>
    %c12_282 = arith.constant 12 : index
    %c192_283 = arith.constant 192 : index
    %187 = vector.load %arg6[%c12_282, %c192_283] : memref<36x256xf32, #tpu.memory_space<vmem>>, vector<4x16xf32>
    tpu.vector_store %arg6[%c12_282, %c192_283], %186 {strides = array<i32>} : memref<36x256xf32, #tpu.memory_space<vmem>>, vector<4x16xf32>,
    %c0_284 = arith.constant 0 : index
    %c14_285 = arith.constant 14 : index
    %c0_286 = arith.constant 0 : index
    %188 = vector.load %arg5[%c0_284, %c14_285, %c0_286] : memref<4x18x18xf32, #tpu.memory_space<vmem>>, vector<4x1x16xf32>
    %189 = vector.shape_cast %188 : vector<4x1x16xf32> to vector<4x16xf32>
    %c12_287 = arith.constant 12 : index
    %c208_288 = arith.constant 208 : index
    %190 = vector.load %arg6[%c12_287, %c208_288] : memref<36x256xf32, #tpu.memory_space<vmem>>, vector<4x16xf32>
    tpu.vector_store %arg6[%c12_287, %c208_288], %189 {strides = array<i32>} : memref<36x256xf32, #tpu.memory_space<vmem>>, vector<4x16xf32>,
    %c0_289 = arith.constant 0 : index
    %c15_290 = arith.constant 15 : index
    %c0_291 = arith.constant 0 : index
    %191 = vector.load %arg5[%c0_289, %c15_290, %c0_291] : memref<4x18x18xf32, #tpu.memory_space<vmem>>, vector<4x1x16xf32>
    %192 = vector.shape_cast %191 : vector<4x1x16xf32> to vector<4x16xf32>
    %c12_292 = arith.constant 12 : index
    %c224_293 = arith.constant 224 : index
    %193 = vector.load %arg6[%c12_292, %c224_293] : memref<36x256xf32, #tpu.memory_space<vmem>>, vector<4x16xf32>
    tpu.vector_store %arg6[%c12_292, %c224_293], %192 {strides = array<i32>} : memref<36x256xf32, #tpu.memory_space<vmem>>, vector<4x16xf32>,
    %c0_294 = arith.constant 0 : index
    %c16_295 = arith.constant 16 : index
    %c0_296 = arith.constant 0 : index
    %194 = vector.load %arg5[%c0_294, %c16_295, %c0_296] : memref<4x18x18xf32, #tpu.memory_space<vmem>>, vector<4x1x16xf32>
    %195 = vector.shape_cast %194 : vector<4x1x16xf32> to vector<4x16xf32>
    %c12_297 = arith.constant 12 : index
    %c240_298 = arith.constant 240 : index
    %196 = vector.load %arg6[%c12_297, %c240_298] : memref<36x256xf32, #tpu.memory_space<vmem>>, vector<4x16xf32>
    tpu.vector_store %arg6[%c12_297, %c240_298], %195 {strides = array<i32>} : memref<36x256xf32, #tpu.memory_space<vmem>>, vector<4x16xf32>,
    %c0_299 = arith.constant 0 : index
    %c1_300 = arith.constant 1 : index
    %c1_301 = arith.constant 1 : index
    %197 = vector.load %arg5[%c0_299, %c1_300, %c1_301] : memref<4x18x18xf32, #tpu.memory_space<vmem>>, vector<4x1x16xf32>
    %198 = vector.shape_cast %197 : vector<4x1x16xf32> to vector<4x16xf32>
    %c16_302 = arith.constant 16 : index
    %c0_303 = arith.constant 0 : index
    %199 = vector.load %arg6[%c16_302, %c0_303] : memref<36x256xf32, #tpu.memory_space<vmem>>, vector<4x16xf32>
    tpu.vector_store %arg6[%c16_302, %c0_303], %198 {strides = array<i32>} : memref<36x256xf32, #tpu.memory_space<vmem>>, vector<4x16xf32>,
    %c0_304 = arith.constant 0 : index
    %c2_305 = arith.constant 2 : index
    %c1_306 = arith.constant 1 : index
    %200 = vector.load %arg5[%c0_304, %c2_305, %c1_306] : memref<4x18x18xf32, #tpu.memory_space<vmem>>, vector<4x1x16xf32>
    %201 = vector.shape_cast %200 : vector<4x1x16xf32> to vector<4x16xf32>
    %c16_307 = arith.constant 16 : index
    %c16_308 = arith.constant 16 : index
    %202 = vector.load %arg6[%c16_307, %c16_308] : memref<36x256xf32, #tpu.memory_space<vmem>>, vector<4x16xf32>
    tpu.vector_store %arg6[%c16_307, %c16_308], %201 {strides = array<i32>} : memref<36x256xf32, #tpu.memory_space<vmem>>, vector<4x16xf32>,
    %c0_309 = arith.constant 0 : index
    %c3_310 = arith.constant 3 : index
    %c1_311 = arith.constant 1 : index
    %203 = vector.load %arg5[%c0_309, %c3_310, %c1_311] : memref<4x18x18xf32, #tpu.memory_space<vmem>>, vector<4x1x16xf32>
    %204 = vector.shape_cast %203 : vector<4x1x16xf32> to vector<4x16xf32>
    %c16_312 = arith.constant 16 : index
    %c32_313 = arith.constant 32 : index
    %205 = vector.load %arg6[%c16_312, %c32_313] : memref<36x256xf32, #tpu.memory_space<vmem>>, vector<4x16xf32>
    tpu.vector_store %arg6[%c16_312, %c32_313], %204 {strides = array<i32>} : memref<36x256xf32, #tpu.memory_space<vmem>>, vector<4x16xf32>,
    %c0_314 = arith.constant 0 : index
    %c4_315 = arith.constant 4 : index
    %c1_316 = arith.constant 1 : index
    %206 = vector.load %arg5[%c0_314, %c4_315, %c1_316] : memref<4x18x18xf32, #tpu.memory_space<vmem>>, vector<4x1x16xf32>
    %207 = vector.shape_cast %206 : vector<4x1x16xf32> to vector<4x16xf32>
    %c16_317 = arith.constant 16 : index
    %c48_318 = arith.constant 48 : index
    %208 = vector.load %arg6[%c16_317, %c48_318] : memref<36x256xf32, #tpu.memory_space<vmem>>, vector<4x16xf32>
    tpu.vector_store %arg6[%c16_317, %c48_318], %207 {strides = array<i32>} : memref<36x256xf32, #tpu.memory_space<vmem>>, vector<4x16xf32>,
    %c0_319 = arith.constant 0 : index
    %c5_320 = arith.constant 5 : index
    %c1_321 = arith.constant 1 : index
    %209 = vector.load %arg5[%c0_319, %c5_320, %c1_321] : memref<4x18x18xf32, #tpu.memory_space<vmem>>, vector<4x1x16xf32>
    %210 = vector.shape_cast %209 : vector<4x1x16xf32> to vector<4x16xf32>
    %c16_322 = arith.constant 16 : index
    %c64_323 = arith.constant 64 : index
    %211 = vector.load %arg6[%c16_322, %c64_323] : memref<36x256xf32, #tpu.memory_space<vmem>>, vector<4x16xf32>
    tpu.vector_store %arg6[%c16_322, %c64_323], %210 {strides = array<i32>} : memref<36x256xf32, #tpu.memory_space<vmem>>, vector<4x16xf32>,
    %c0_324 = arith.constant 0 : index
    %c6_325 = arith.constant 6 : index
    %c1_326 = arith.constant 1 : index
    %212 = vector.load %arg5[%c0_324, %c6_325, %c1_326] : memref<4x18x18xf32, #tpu.memory_space<vmem>>, vector<4x1x16xf32>
    %213 = vector.shape_cast %212 : vector<4x1x16xf32> to vector<4x16xf32>
    %c16_327 = arith.constant 16 : index
    %c80_328 = arith.constant 80 : index
    %214 = vector.load %arg6[%c16_327, %c80_328] : memref<36x256xf32, #tpu.memory_space<vmem>>, vector<4x16xf32>
    tpu.vector_store %arg6[%c16_327, %c80_328], %213 {strides = array<i32>} : memref<36x256xf32, #tpu.memory_space<vmem>>, vector<4x16xf32>,
    %c0_329 = arith.constant 0 : index
    %c7_330 = arith.constant 7 : index
    %c1_331 = arith.constant 1 : index
    %215 = vector.load %arg5[%c0_329, %c7_330, %c1_331] : memref<4x18x18xf32, #tpu.memory_space<vmem>>, vector<4x1x16xf32>
    %216 = vector.shape_cast %215 : vector<4x1x16xf32> to vector<4x16xf32>
    %c16_332 = arith.constant 16 : index
    %c96_333 = arith.constant 96 : index
    %217 = vector.load %arg6[%c16_332, %c96_333] : memref<36x256xf32, #tpu.memory_space<vmem>>, vector<4x16xf32>
    tpu.vector_store %arg6[%c16_332, %c96_333], %216 {strides = array<i32>} : memref<36x256xf32, #tpu.memory_space<vmem>>, vector<4x16xf32>,
    %c0_334 = arith.constant 0 : index
    %c8_335 = arith.constant 8 : index
    %c1_336 = arith.constant 1 : index
    %218 = vector.load %arg5[%c0_334, %c8_335, %c1_336] : memref<4x18x18xf32, #tpu.memory_space<vmem>>, vector<4x1x16xf32>
    %219 = vector.shape_cast %218 : vector<4x1x16xf32> to vector<4x16xf32>
    %c16_337 = arith.constant 16 : index
    %c112_338 = arith.constant 112 : index
    %220 = vector.load %arg6[%c16_337, %c112_338] : memref<36x256xf32, #tpu.memory_space<vmem>>, vector<4x16xf32>
    tpu.vector_store %arg6[%c16_337, %c112_338], %219 {strides = array<i32>} : memref<36x256xf32, #tpu.memory_space<vmem>>, vector<4x16xf32>,
    %c0_339 = arith.constant 0 : index
    %c9_340 = arith.constant 9 : index
    %c1_341 = arith.constant 1 : index
    %221 = vector.load %arg5[%c0_339, %c9_340, %c1_341] : memref<4x18x18xf32, #tpu.memory_space<vmem>>, vector<4x1x16xf32>
    %222 = vector.shape_cast %221 : vector<4x1x16xf32> to vector<4x16xf32>
    %c16_342 = arith.constant 16 : index
    %c128_343 = arith.constant 128 : index
    %223 = vector.load %arg6[%c16_342, %c128_343] : memref<36x256xf32, #tpu.memory_space<vmem>>, vector<4x16xf32>
    tpu.vector_store %arg6[%c16_342, %c128_343], %222 {strides = array<i32>} : memref<36x256xf32, #tpu.memory_space<vmem>>, vector<4x16xf32>,
    %c0_344 = arith.constant 0 : index
    %c10_345 = arith.constant 10 : index
    %c1_346 = arith.constant 1 : index
    %224 = vector.load %arg5[%c0_344, %c10_345, %c1_346] : memref<4x18x18xf32, #tpu.memory_space<vmem>>, vector<4x1x16xf32>
    %225 = vector.shape_cast %224 : vector<4x1x16xf32> to vector<4x16xf32>
    %c16_347 = arith.constant 16 : index
    %c144_348 = arith.constant 144 : index
    %226 = vector.load %arg6[%c16_347, %c144_348] : memref<36x256xf32, #tpu.memory_space<vmem>>, vector<4x16xf32>
    tpu.vector_store %arg6[%c16_347, %c144_348], %225 {strides = array<i32>} : memref<36x256xf32, #tpu.memory_space<vmem>>, vector<4x16xf32>,
    %c0_349 = arith.constant 0 : index
    %c11_350 = arith.constant 11 : index
    %c1_351 = arith.constant 1 : index
    %227 = vector.load %arg5[%c0_349, %c11_350, %c1_351] : memref<4x18x18xf32, #tpu.memory_space<vmem>>, vector<4x1x16xf32>
    %228 = vector.shape_cast %227 : vector<4x1x16xf32> to vector<4x16xf32>
    %c16_352 = arith.constant 16 : index
    %c160_353 = arith.constant 160 : index
    %229 = vector.load %arg6[%c16_352, %c160_353] : memref<36x256xf32, #tpu.memory_space<vmem>>, vector<4x16xf32>
    tpu.vector_store %arg6[%c16_352, %c160_353], %228 {strides = array<i32>} : memref<36x256xf32, #tpu.memory_space<vmem>>, vector<4x16xf32>,
    %c0_354 = arith.constant 0 : index
    %c12_355 = arith.constant 12 : index
    %c1_356 = arith.constant 1 : index
    %230 = vector.load %arg5[%c0_354, %c12_355, %c1_356] : memref<4x18x18xf32, #tpu.memory_space<vmem>>, vector<4x1x16xf32>
    %231 = vector.shape_cast %230 : vector<4x1x16xf32> to vector<4x16xf32>
    %c16_357 = arith.constant 16 : index
    %c176_358 = arith.constant 176 : index
    %232 = vector.load %arg6[%c16_357, %c176_358] : memref<36x256xf32, #tpu.memory_space<vmem>>, vector<4x16xf32>
    tpu.vector_store %arg6[%c16_357, %c176_358], %231 {strides = array<i32>} : memref<36x256xf32, #tpu.memory_space<vmem>>, vector<4x16xf32>,
    %c0_359 = arith.constant 0 : index
    %c13_360 = arith.constant 13 : index
    %c1_361 = arith.constant 1 : index
    %233 = vector.load %arg5[%c0_359, %c13_360, %c1_361] : memref<4x18x18xf32, #tpu.memory_space<vmem>>, vector<4x1x16xf32>
    %234 = vector.shape_cast %233 : vector<4x1x16xf32> to vector<4x16xf32>
    %c16_362 = arith.constant 16 : index
    %c192_363 = arith.constant 192 : index
    %235 = vector.load %arg6[%c16_362, %c192_363] : memref<36x256xf32, #tpu.memory_space<vmem>>, vector<4x16xf32>
    tpu.vector_store %arg6[%c16_362, %c192_363], %234 {strides = array<i32>} : memref<36x256xf32, #tpu.memory_space<vmem>>, vector<4x16xf32>,
    %c0_364 = arith.constant 0 : index
    %c14_365 = arith.constant 14 : index
    %c1_366 = arith.constant 1 : index
    %236 = vector.load %arg5[%c0_364, %c14_365, %c1_366] : memref<4x18x18xf32, #tpu.memory_space<vmem>>, vector<4x1x16xf32>
    %237 = vector.shape_cast %236 : vector<4x1x16xf32> to vector<4x16xf32>
    %c16_367 = arith.constant 16 : index
    %c208_368 = arith.constant 208 : index
    %238 = vector.load %arg6[%c16_367, %c208_368] : memref<36x256xf32, #tpu.memory_space<vmem>>, vector<4x16xf32>
    tpu.vector_store %arg6[%c16_367, %c208_368], %237 {strides = array<i32>} : memref<36x256xf32, #tpu.memory_space<vmem>>, vector<4x16xf32>,
    %c0_369 = arith.constant 0 : index
    %c15_370 = arith.constant 15 : index
    %c1_371 = arith.constant 1 : index
    %239 = vector.load %arg5[%c0_369, %c15_370, %c1_371] : memref<4x18x18xf32, #tpu.memory_space<vmem>>, vector<4x1x16xf32>
    %240 = vector.shape_cast %239 : vector<4x1x16xf32> to vector<4x16xf32>
    %c16_372 = arith.constant 16 : index
    %c224_373 = arith.constant 224 : index
    %241 = vector.load %arg6[%c16_372, %c224_373] : memref<36x256xf32, #tpu.memory_space<vmem>>, vector<4x16xf32>
    tpu.vector_store %arg6[%c16_372, %c224_373], %240 {strides = array<i32>} : memref<36x256xf32, #tpu.memory_space<vmem>>, vector<4x16xf32>,
    %c0_374 = arith.constant 0 : index
    %c16_375 = arith.constant 16 : index
    %c1_376 = arith.constant 1 : index
    %242 = vector.load %arg5[%c0_374, %c16_375, %c1_376] : memref<4x18x18xf32, #tpu.memory_space<vmem>>, vector<4x1x16xf32>
    %243 = vector.shape_cast %242 : vector<4x1x16xf32> to vector<4x16xf32>
    %c16_377 = arith.constant 16 : index
    %c240_378 = arith.constant 240 : index
    %244 = vector.load %arg6[%c16_377, %c240_378] : memref<36x256xf32, #tpu.memory_space<vmem>>, vector<4x16xf32>
    tpu.vector_store %arg6[%c16_377, %c240_378], %243 {strides = array<i32>} : memref<36x256xf32, #tpu.memory_space<vmem>>, vector<4x16xf32>,
    %c0_379 = arith.constant 0 : index
    %c1_380 = arith.constant 1 : index
    %c2_381 = arith.constant 2 : index
    %245 = vector.load %arg5[%c0_379, %c1_380, %c2_381] : memref<4x18x18xf32, #tpu.memory_space<vmem>>, vector<4x1x16xf32>
    %246 = vector.shape_cast %245 : vector<4x1x16xf32> to vector<4x16xf32>
    %c20 = arith.constant 20 : index
    %c0_382 = arith.constant 0 : index
    %247 = vector.load %arg6[%c20, %c0_382] : memref<36x256xf32, #tpu.memory_space<vmem>>, vector<4x16xf32>
    tpu.vector_store %arg6[%c20, %c0_382], %246 {strides = array<i32>} : memref<36x256xf32, #tpu.memory_space<vmem>>, vector<4x16xf32>,
    %c0_383 = arith.constant 0 : index
    %c2_384 = arith.constant 2 : index
    %c2_385 = arith.constant 2 : index
    %248 = vector.load %arg5[%c0_383, %c2_384, %c2_385] : memref<4x18x18xf32, #tpu.memory_space<vmem>>, vector<4x1x16xf32>
    %249 = vector.shape_cast %248 : vector<4x1x16xf32> to vector<4x16xf32>
    %c20_386 = arith.constant 20 : index
    %c16_387 = arith.constant 16 : index
    %250 = vector.load %arg6[%c20_386, %c16_387] : memref<36x256xf32, #tpu.memory_space<vmem>>, vector<4x16xf32>
    tpu.vector_store %arg6[%c20_386, %c16_387], %249 {strides = array<i32>} : memref<36x256xf32, #tpu.memory_space<vmem>>, vector<4x16xf32>,
    %c0_388 = arith.constant 0 : index
    %c3_389 = arith.constant 3 : index
    %c2_390 = arith.constant 2 : index
    %251 = vector.load %arg5[%c0_388, %c3_389, %c2_390] : memref<4x18x18xf32, #tpu.memory_space<vmem>>, vector<4x1x16xf32>
    %252 = vector.shape_cast %251 : vector<4x1x16xf32> to vector<4x16xf32>
    %c20_391 = arith.constant 20 : index
    %c32_392 = arith.constant 32 : index
    %253 = vector.load %arg6[%c20_391, %c32_392] : memref<36x256xf32, #tpu.memory_space<vmem>>, vector<4x16xf32>
    tpu.vector_store %arg6[%c20_391, %c32_392], %252 {strides = array<i32>} : memref<36x256xf32, #tpu.memory_space<vmem>>, vector<4x16xf32>,
    %c0_393 = arith.constant 0 : index
    %c4_394 = arith.constant 4 : index
    %c2_395 = arith.constant 2 : index
    %254 = vector.load %arg5[%c0_393, %c4_394, %c2_395] : memref<4x18x18xf32, #tpu.memory_space<vmem>>, vector<4x1x16xf32>
    %255 = vector.shape_cast %254 : vector<4x1x16xf32> to vector<4x16xf32>
    %c20_396 = arith.constant 20 : index
    %c48_397 = arith.constant 48 : index
    %256 = vector.load %arg6[%c20_396, %c48_397] : memref<36x256xf32, #tpu.memory_space<vmem>>, vector<4x16xf32>
    tpu.vector_store %arg6[%c20_396, %c48_397], %255 {strides = array<i32>} : memref<36x256xf32, #tpu.memory_space<vmem>>, vector<4x16xf32>,
    %c0_398 = arith.constant 0 : index
    %c5_399 = arith.constant 5 : index
    %c2_400 = arith.constant 2 : index
    %257 = vector.load %arg5[%c0_398, %c5_399, %c2_400] : memref<4x18x18xf32, #tpu.memory_space<vmem>>, vector<4x1x16xf32>
    %258 = vector.shape_cast %257 : vector<4x1x16xf32> to vector<4x16xf32>
    %c20_401 = arith.constant 20 : index
    %c64_402 = arith.constant 64 : index
    %259 = vector.load %arg6[%c20_401, %c64_402] : memref<36x256xf32, #tpu.memory_space<vmem>>, vector<4x16xf32>
    tpu.vector_store %arg6[%c20_401, %c64_402], %258 {strides = array<i32>} : memref<36x256xf32, #tpu.memory_space<vmem>>, vector<4x16xf32>,
    %c0_403 = arith.constant 0 : index
    %c6_404 = arith.constant 6 : index
    %c2_405 = arith.constant 2 : index
    %260 = vector.load %arg5[%c0_403, %c6_404, %c2_405] : memref<4x18x18xf32, #tpu.memory_space<vmem>>, vector<4x1x16xf32>
    %261 = vector.shape_cast %260 : vector<4x1x16xf32> to vector<4x16xf32>
    %c20_406 = arith.constant 20 : index
    %c80_407 = arith.constant 80 : index
    %262 = vector.load %arg6[%c20_406, %c80_407] : memref<36x256xf32, #tpu.memory_space<vmem>>, vector<4x16xf32>
    tpu.vector_store %arg6[%c20_406, %c80_407], %261 {strides = array<i32>} : memref<36x256xf32, #tpu.memory_space<vmem>>, vector<4x16xf32>,
    %c0_408 = arith.constant 0 : index
    %c7_409 = arith.constant 7 : index
    %c2_410 = arith.constant 2 : index
    %263 = vector.load %arg5[%c0_408, %c7_409, %c2_410] : memref<4x18x18xf32, #tpu.memory_space<vmem>>, vector<4x1x16xf32>
    %264 = vector.shape_cast %263 : vector<4x1x16xf32> to vector<4x16xf32>
    %c20_411 = arith.constant 20 : index
    %c96_412 = arith.constant 96 : index
    %265 = vector.load %arg6[%c20_411, %c96_412] : memref<36x256xf32, #tpu.memory_space<vmem>>, vector<4x16xf32>
    tpu.vector_store %arg6[%c20_411, %c96_412], %264 {strides = array<i32>} : memref<36x256xf32, #tpu.memory_space<vmem>>, vector<4x16xf32>,
    %c0_413 = arith.constant 0 : index
    %c8_414 = arith.constant 8 : index
    %c2_415 = arith.constant 2 : index
    %266 = vector.load %arg5[%c0_413, %c8_414, %c2_415] : memref<4x18x18xf32, #tpu.memory_space<vmem>>, vector<4x1x16xf32>
    %267 = vector.shape_cast %266 : vector<4x1x16xf32> to vector<4x16xf32>
    %c20_416 = arith.constant 20 : index
    %c112_417 = arith.constant 112 : index
    %268 = vector.load %arg6[%c20_416, %c112_417] : memref<36x256xf32, #tpu.memory_space<vmem>>, vector<4x16xf32>
    tpu.vector_store %arg6[%c20_416, %c112_417], %267 {strides = array<i32>} : memref<36x256xf32, #tpu.memory_space<vmem>>, vector<4x16xf32>,
    %c0_418 = arith.constant 0 : index
    %c9_419 = arith.constant 9 : index
    %c2_420 = arith.constant 2 : index
    %269 = vector.load %arg5[%c0_418, %c9_419, %c2_420] : memref<4x18x18xf32, #tpu.memory_space<vmem>>, vector<4x1x16xf32>
    %270 = vector.shape_cast %269 : vector<4x1x16xf32> to vector<4x16xf32>
    %c20_421 = arith.constant 20 : index
    %c128_422 = arith.constant 128 : index
    %271 = vector.load %arg6[%c20_421, %c128_422] : memref<36x256xf32, #tpu.memory_space<vmem>>, vector<4x16xf32>
    tpu.vector_store %arg6[%c20_421, %c128_422], %270 {strides = array<i32>} : memref<36x256xf32, #tpu.memory_space<vmem>>, vector<4x16xf32>,
    %c0_423 = arith.constant 0 : index
    %c10_424 = arith.constant 10 : index
    %c2_425 = arith.constant 2 : index
    %272 = vector.load %arg5[%c0_423, %c10_424, %c2_425] : memref<4x18x18xf32, #tpu.memory_space<vmem>>, vector<4x1x16xf32>
    %273 = vector.shape_cast %272 : vector<4x1x16xf32> to vector<4x16xf32>
    %c20_426 = arith.constant 20 : index
    %c144_427 = arith.constant 144 : index
    %274 = vector.load %arg6[%c20_426, %c144_427] : memref<36x256xf32, #tpu.memory_space<vmem>>, vector<4x16xf32>
    tpu.vector_store %arg6[%c20_426, %c144_427], %273 {strides = array<i32>} : memref<36x256xf32, #tpu.memory_space<vmem>>, vector<4x16xf32>,
    %c0_428 = arith.constant 0 : index
    %c11_429 = arith.constant 11 : index
    %c2_430 = arith.constant 2 : index
    %275 = vector.load %arg5[%c0_428, %c11_429, %c2_430] : memref<4x18x18xf32, #tpu.memory_space<vmem>>, vector<4x1x16xf32>
    %276 = vector.shape_cast %275 : vector<4x1x16xf32> to vector<4x16xf32>
    %c20_431 = arith.constant 20 : index
    %c160_432 = arith.constant 160 : index
    %277 = vector.load %arg6[%c20_431, %c160_432] : memref<36x256xf32, #tpu.memory_space<vmem>>, vector<4x16xf32>
    tpu.vector_store %arg6[%c20_431, %c160_432], %276 {strides = array<i32>} : memref<36x256xf32, #tpu.memory_space<vmem>>, vector<4x16xf32>,
    %c0_433 = arith.constant 0 : index
    %c12_434 = arith.constant 12 : index
    %c2_435 = arith.constant 2 : index
    %278 = vector.load %arg5[%c0_433, %c12_434, %c2_435] : memref<4x18x18xf32, #tpu.memory_space<vmem>>, vector<4x1x16xf32>
    %279 = vector.shape_cast %278 : vector<4x1x16xf32> to vector<4x16xf32>
    %c20_436 = arith.constant 20 : index
    %c176_437 = arith.constant 176 : index
    %280 = vector.load %arg6[%c20_436, %c176_437] : memref<36x256xf32, #tpu.memory_space<vmem>>, vector<4x16xf32>
    tpu.vector_store %arg6[%c20_436, %c176_437], %279 {strides = array<i32>} : memref<36x256xf32, #tpu.memory_space<vmem>>, vector<4x16xf32>,
    %c0_438 = arith.constant 0 : index
    %c13_439 = arith.constant 13 : index
    %c2_440 = arith.constant 2 : index
    %281 = vector.load %arg5[%c0_438, %c13_439, %c2_440] : memref<4x18x18xf32, #tpu.memory_space<vmem>>, vector<4x1x16xf32>
    %282 = vector.shape_cast %281 : vector<4x1x16xf32> to vector<4x16xf32>
    %c20_441 = arith.constant 20 : index
    %c192_442 = arith.constant 192 : index
    %283 = vector.load %arg6[%c20_441, %c192_442] : memref<36x256xf32, #tpu.memory_space<vmem>>, vector<4x16xf32>
    tpu.vector_store %arg6[%c20_441, %c192_442], %282 {strides = array<i32>} : memref<36x256xf32, #tpu.memory_space<vmem>>, vector<4x16xf32>,
    %c0_443 = arith.constant 0 : index
    %c14_444 = arith.constant 14 : index
    %c2_445 = arith.constant 2 : index
    %284 = vector.load %arg5[%c0_443, %c14_444, %c2_445] : memref<4x18x18xf32, #tpu.memory_space<vmem>>, vector<4x1x16xf32>
    %285 = vector.shape_cast %284 : vector<4x1x16xf32> to vector<4x16xf32>
    %c20_446 = arith.constant 20 : index
    %c208_447 = arith.constant 208 : index
    %286 = vector.load %arg6[%c20_446, %c208_447] : memref<36x256xf32, #tpu.memory_space<vmem>>, vector<4x16xf32>
    tpu.vector_store %arg6[%c20_446, %c208_447], %285 {strides = array<i32>} : memref<36x256xf32, #tpu.memory_space<vmem>>, vector<4x16xf32>,
    %c0_448 = arith.constant 0 : index
    %c15_449 = arith.constant 15 : index
    %c2_450 = arith.constant 2 : index
    %287 = vector.load %arg5[%c0_448, %c15_449, %c2_450] : memref<4x18x18xf32, #tpu.memory_space<vmem>>, vector<4x1x16xf32>
    %288 = vector.shape_cast %287 : vector<4x1x16xf32> to vector<4x16xf32>
    %c20_451 = arith.constant 20 : index
    %c224_452 = arith.constant 224 : index
    %289 = vector.load %arg6[%c20_451, %c224_452] : memref<36x256xf32, #tpu.memory_space<vmem>>, vector<4x16xf32>
    tpu.vector_store %arg6[%c20_451, %c224_452], %288 {strides = array<i32>} : memref<36x256xf32, #tpu.memory_space<vmem>>, vector<4x16xf32>,
    %c0_453 = arith.constant 0 : index
    %c16_454 = arith.constant 16 : index
    %c2_455 = arith.constant 2 : index
    %290 = vector.load %arg5[%c0_453, %c16_454, %c2_455] : memref<4x18x18xf32, #tpu.memory_space<vmem>>, vector<4x1x16xf32>
    %291 = vector.shape_cast %290 : vector<4x1x16xf32> to vector<4x16xf32>
    %c20_456 = arith.constant 20 : index
    %c240_457 = arith.constant 240 : index
    %292 = vector.load %arg6[%c20_456, %c240_457] : memref<36x256xf32, #tpu.memory_space<vmem>>, vector<4x16xf32>
    tpu.vector_store %arg6[%c20_456, %c240_457], %291 {strides = array<i32>} : memref<36x256xf32, #tpu.memory_space<vmem>>, vector<4x16xf32>,
    %c0_458 = arith.constant 0 : index
    %c2_459 = arith.constant 2 : index
    %c0_460 = arith.constant 0 : index
    %293 = vector.load %arg5[%c0_458, %c2_459, %c0_460] : memref<4x18x18xf32, #tpu.memory_space<vmem>>, vector<4x1x16xf32>
    %294 = vector.shape_cast %293 : vector<4x1x16xf32> to vector<4x16xf32>
    %c24 = arith.constant 24 : index
    %c0_461 = arith.constant 0 : index
    %295 = vector.load %arg6[%c24, %c0_461] : memref<36x256xf32, #tpu.memory_space<vmem>>, vector<4x16xf32>
    tpu.vector_store %arg6[%c24, %c0_461], %294 {strides = array<i32>} : memref<36x256xf32, #tpu.memory_space<vmem>>, vector<4x16xf32>,
    %c0_462 = arith.constant 0 : index
    %c3_463 = arith.constant 3 : index
    %c0_464 = arith.constant 0 : index
    %296 = vector.load %arg5[%c0_462, %c3_463, %c0_464] : memref<4x18x18xf32, #tpu.memory_space<vmem>>, vector<4x1x16xf32>
    %297 = vector.shape_cast %296 : vector<4x1x16xf32> to vector<4x16xf32>
    %c24_465 = arith.constant 24 : index
    %c16_466 = arith.constant 16 : index
    %298 = vector.load %arg6[%c24_465, %c16_466] : memref<36x256xf32, #tpu.memory_space<vmem>>, vector<4x16xf32>
    tpu.vector_store %arg6[%c24_465, %c16_466], %297 {strides = array<i32>} : memref<36x256xf32, #tpu.memory_space<vmem>>, vector<4x16xf32>,
    %c0_467 = arith.constant 0 : index
    %c4_468 = arith.constant 4 : index
    %c0_469 = arith.constant 0 : index
    %299 = vector.load %arg5[%c0_467, %c4_468, %c0_469] : memref<4x18x18xf32, #tpu.memory_space<vmem>>, vector<4x1x16xf32>
    %300 = vector.shape_cast %299 : vector<4x1x16xf32> to vector<4x16xf32>
    %c24_470 = arith.constant 24 : index
    %c32_471 = arith.constant 32 : index
    %301 = vector.load %arg6[%c24_470, %c32_471] : memref<36x256xf32, #tpu.memory_space<vmem>>, vector<4x16xf32>
    tpu.vector_store %arg6[%c24_470, %c32_471], %300 {strides = array<i32>} : memref<36x256xf32, #tpu.memory_space<vmem>>, vector<4x16xf32>,
    %c0_472 = arith.constant 0 : index
    %c5_473 = arith.constant 5 : index
    %c0_474 = arith.constant 0 : index
    %302 = vector.load %arg5[%c0_472, %c5_473, %c0_474] : memref<4x18x18xf32, #tpu.memory_space<vmem>>, vector<4x1x16xf32>
    %303 = vector.shape_cast %302 : vector<4x1x16xf32> to vector<4x16xf32>
    %c24_475 = arith.constant 24 : index
    %c48_476 = arith.constant 48 : index
    %304 = vector.load %arg6[%c24_475, %c48_476] : memref<36x256xf32, #tpu.memory_space<vmem>>, vector<4x16xf32>
    tpu.vector_store %arg6[%c24_475, %c48_476], %303 {strides = array<i32>} : memref<36x256xf32, #tpu.memory_space<vmem>>, vector<4x16xf32>,
    %c0_477 = arith.constant 0 : index
    %c6_478 = arith.constant 6 : index
    %c0_479 = arith.constant 0 : index
    %305 = vector.load %arg5[%c0_477, %c6_478, %c0_479] : memref<4x18x18xf32, #tpu.memory_space<vmem>>, vector<4x1x16xf32>
    %306 = vector.shape_cast %305 : vector<4x1x16xf32> to vector<4x16xf32>
    %c24_480 = arith.constant 24 : index
    %c64_481 = arith.constant 64 : index
    %307 = vector.load %arg6[%c24_480, %c64_481] : memref<36x256xf32, #tpu.memory_space<vmem>>, vector<4x16xf32>
    tpu.vector_store %arg6[%c24_480, %c64_481], %306 {strides = array<i32>} : memref<36x256xf32, #tpu.memory_space<vmem>>, vector<4x16xf32>,
    %c0_482 = arith.constant 0 : index
    %c7_483 = arith.constant 7 : index
    %c0_484 = arith.constant 0 : index
    %308 = vector.load %arg5[%c0_482, %c7_483, %c0_484] : memref<4x18x18xf32, #tpu.memory_space<vmem>>, vector<4x1x16xf32>
    %309 = vector.shape_cast %308 : vector<4x1x16xf32> to vector<4x16xf32>
    %c24_485 = arith.constant 24 : index
    %c80_486 = arith.constant 80 : index
    %310 = vector.load %arg6[%c24_485, %c80_486] : memref<36x256xf32, #tpu.memory_space<vmem>>, vector<4x16xf32>
    tpu.vector_store %arg6[%c24_485, %c80_486], %309 {strides = array<i32>} : memref<36x256xf32, #tpu.memory_space<vmem>>, vector<4x16xf32>,
    %c0_487 = arith.constant 0 : index
    %c8_488 = arith.constant 8 : index
    %c0_489 = arith.constant 0 : index
    %311 = vector.load %arg5[%c0_487, %c8_488, %c0_489] : memref<4x18x18xf32, #tpu.memory_space<vmem>>, vector<4x1x16xf32>
    %312 = vector.shape_cast %311 : vector<4x1x16xf32> to vector<4x16xf32>
    %c24_490 = arith.constant 24 : index
    %c96_491 = arith.constant 96 : index
    %313 = vector.load %arg6[%c24_490, %c96_491] : memref<36x256xf32, #tpu.memory_space<vmem>>, vector<4x16xf32>
    tpu.vector_store %arg6[%c24_490, %c96_491], %312 {strides = array<i32>} : memref<36x256xf32, #tpu.memory_space<vmem>>, vector<4x16xf32>,
    %c0_492 = arith.constant 0 : index
    %c9_493 = arith.constant 9 : index
    %c0_494 = arith.constant 0 : index
    %314 = vector.load %arg5[%c0_492, %c9_493, %c0_494] : memref<4x18x18xf32, #tpu.memory_space<vmem>>, vector<4x1x16xf32>
    %315 = vector.shape_cast %314 : vector<4x1x16xf32> to vector<4x16xf32>
    %c24_495 = arith.constant 24 : index
    %c112_496 = arith.constant 112 : index
    %316 = vector.load %arg6[%c24_495, %c112_496] : memref<36x256xf32, #tpu.memory_space<vmem>>, vector<4x16xf32>
    tpu.vector_store %arg6[%c24_495, %c112_496], %315 {strides = array<i32>} : memref<36x256xf32, #tpu.memory_space<vmem>>, vector<4x16xf32>,
    %c0_497 = arith.constant 0 : index
    %c10_498 = arith.constant 10 : index
    %c0_499 = arith.constant 0 : index
    %317 = vector.load %arg5[%c0_497, %c10_498, %c0_499] : memref<4x18x18xf32, #tpu.memory_space<vmem>>, vector<4x1x16xf32>
    %318 = vector.shape_cast %317 : vector<4x1x16xf32> to vector<4x16xf32>
    %c24_500 = arith.constant 24 : index
    %c128_501 = arith.constant 128 : index
    %319 = vector.load %arg6[%c24_500, %c128_501] : memref<36x256xf32, #tpu.memory_space<vmem>>, vector<4x16xf32>
    tpu.vector_store %arg6[%c24_500, %c128_501], %318 {strides = array<i32>} : memref<36x256xf32, #tpu.memory_space<vmem>>, vector<4x16xf32>,
    %c0_502 = arith.constant 0 : index
    %c11_503 = arith.constant 11 : index
    %c0_504 = arith.constant 0 : index
    %320 = vector.load %arg5[%c0_502, %c11_503, %c0_504] : memref<4x18x18xf32, #tpu.memory_space<vmem>>, vector<4x1x16xf32>
    %321 = vector.shape_cast %320 : vector<4x1x16xf32> to vector<4x16xf32>
    %c24_505 = arith.constant 24 : index
    %c144_506 = arith.constant 144 : index
    %322 = vector.load %arg6[%c24_505, %c144_506] : memref<36x256xf32, #tpu.memory_space<vmem>>, vector<4x16xf32>
    tpu.vector_store %arg6[%c24_505, %c144_506], %321 {strides = array<i32>} : memref<36x256xf32, #tpu.memory_space<vmem>>, vector<4x16xf32>,
    %c0_507 = arith.constant 0 : index
    %c12_508 = arith.constant 12 : index
    %c0_509 = arith.constant 0 : index
    %323 = vector.load %arg5[%c0_507, %c12_508, %c0_509] : memref<4x18x18xf32, #tpu.memory_space<vmem>>, vector<4x1x16xf32>
    %324 = vector.shape_cast %323 : vector<4x1x16xf32> to vector<4x16xf32>
    %c24_510 = arith.constant 24 : index
    %c160_511 = arith.constant 160 : index
    %325 = vector.load %arg6[%c24_510, %c160_511] : memref<36x256xf32, #tpu.memory_space<vmem>>, vector<4x16xf32>
    tpu.vector_store %arg6[%c24_510, %c160_511], %324 {strides = array<i32>} : memref<36x256xf32, #tpu.memory_space<vmem>>, vector<4x16xf32>,
    %c0_512 = arith.constant 0 : index
    %c13_513 = arith.constant 13 : index
    %c0_514 = arith.constant 0 : index
    %326 = vector.load %arg5[%c0_512, %c13_513, %c0_514] : memref<4x18x18xf32, #tpu.memory_space<vmem>>, vector<4x1x16xf32>
    %327 = vector.shape_cast %326 : vector<4x1x16xf32> to vector<4x16xf32>
    %c24_515 = arith.constant 24 : index
    %c176_516 = arith.constant 176 : index
    %328 = vector.load %arg6[%c24_515, %c176_516] : memref<36x256xf32, #tpu.memory_space<vmem>>, vector<4x16xf32>
    tpu.vector_store %arg6[%c24_515, %c176_516], %327 {strides = array<i32>} : memref<36x256xf32, #tpu.memory_space<vmem>>, vector<4x16xf32>,
    %c0_517 = arith.constant 0 : index
    %c14_518 = arith.constant 14 : index
    %c0_519 = arith.constant 0 : index
    %329 = vector.load %arg5[%c0_517, %c14_518, %c0_519] : memref<4x18x18xf32, #tpu.memory_space<vmem>>, vector<4x1x16xf32>
    %330 = vector.shape_cast %329 : vector<4x1x16xf32> to vector<4x16xf32>
    %c24_520 = arith.constant 24 : index
    %c192_521 = arith.constant 192 : index
    %331 = vector.load %arg6[%c24_520, %c192_521] : memref<36x256xf32, #tpu.memory_space<vmem>>, vector<4x16xf32>
    tpu.vector_store %arg6[%c24_520, %c192_521], %330 {strides = array<i32>} : memref<36x256xf32, #tpu.memory_space<vmem>>, vector<4x16xf32>,
    %c0_522 = arith.constant 0 : index
    %c15_523 = arith.constant 15 : index
    %c0_524 = arith.constant 0 : index
    %332 = vector.load %arg5[%c0_522, %c15_523, %c0_524] : memref<4x18x18xf32, #tpu.memory_space<vmem>>, vector<4x1x16xf32>
    %333 = vector.shape_cast %332 : vector<4x1x16xf32> to vector<4x16xf32>
    %c24_525 = arith.constant 24 : index
    %c208_526 = arith.constant 208 : index
    %334 = vector.load %arg6[%c24_525, %c208_526] : memref<36x256xf32, #tpu.memory_space<vmem>>, vector<4x16xf32>
    tpu.vector_store %arg6[%c24_525, %c208_526], %333 {strides = array<i32>} : memref<36x256xf32, #tpu.memory_space<vmem>>, vector<4x16xf32>,
    %c0_527 = arith.constant 0 : index
    %c16_528 = arith.constant 16 : index
    %c0_529 = arith.constant 0 : index
    %335 = vector.load %arg5[%c0_527, %c16_528, %c0_529] : memref<4x18x18xf32, #tpu.memory_space<vmem>>, vector<4x1x16xf32>
    %336 = vector.shape_cast %335 : vector<4x1x16xf32> to vector<4x16xf32>
    %c24_530 = arith.constant 24 : index
    %c224_531 = arith.constant 224 : index
    %337 = vector.load %arg6[%c24_530, %c224_531] : memref<36x256xf32, #tpu.memory_space<vmem>>, vector<4x16xf32>
    tpu.vector_store %arg6[%c24_530, %c224_531], %336 {strides = array<i32>} : memref<36x256xf32, #tpu.memory_space<vmem>>, vector<4x16xf32>,
    %c0_532 = arith.constant 0 : index
    %c17 = arith.constant 17 : index
    %c0_533 = arith.constant 0 : index
    %338 = vector.load %arg5[%c0_532, %c17, %c0_533] : memref<4x18x18xf32, #tpu.memory_space<vmem>>, vector<4x1x16xf32>
    %339 = vector.shape_cast %338 : vector<4x1x16xf32> to vector<4x16xf32>
    %c24_534 = arith.constant 24 : index
    %c240_535 = arith.constant 240 : index
    %340 = vector.load %arg6[%c24_534, %c240_535] : memref<36x256xf32, #tpu.memory_space<vmem>>, vector<4x16xf32>
    tpu.vector_store %arg6[%c24_534, %c240_535], %339 {strides = array<i32>} : memref<36x256xf32, #tpu.memory_space<vmem>>, vector<4x16xf32>,
    %c0_536 = arith.constant 0 : index
    %c2_537 = arith.constant 2 : index
    %c1_538 = arith.constant 1 : index
    %341 = vector.load %arg5[%c0_536, %c2_537, %c1_538] : memref<4x18x18xf32, #tpu.memory_space<vmem>>, vector<4x1x16xf32>
    %342 = vector.shape_cast %341 : vector<4x1x16xf32> to vector<4x16xf32>
    %c28 = arith.constant 28 : index
    %c0_539 = arith.constant 0 : index
    %343 = vector.load %arg6[%c28, %c0_539] : memref<36x256xf32, #tpu.memory_space<vmem>>, vector<4x16xf32>
    tpu.vector_store %arg6[%c28, %c0_539], %342 {strides = array<i32>} : memref<36x256xf32, #tpu.memory_space<vmem>>, vector<4x16xf32>,
    %c0_540 = arith.constant 0 : index
    %c3_541 = arith.constant 3 : index
    %c1_542 = arith.constant 1 : index
    %344 = vector.load %arg5[%c0_540, %c3_541, %c1_542] : memref<4x18x18xf32, #tpu.memory_space<vmem>>, vector<4x1x16xf32>
    %345 = vector.shape_cast %344 : vector<4x1x16xf32> to vector<4x16xf32>
    %c28_543 = arith.constant 28 : index
    %c16_544 = arith.constant 16 : index
    %346 = vector.load %arg6[%c28_543, %c16_544] : memref<36x256xf32, #tpu.memory_space<vmem>>, vector<4x16xf32>
    tpu.vector_store %arg6[%c28_543, %c16_544], %345 {strides = array<i32>} : memref<36x256xf32, #tpu.memory_space<vmem>>, vector<4x16xf32>,
    %c0_545 = arith.constant 0 : index
    %c4_546 = arith.constant 4 : index
    %c1_547 = arith.constant 1 : index
    %347 = vector.load %arg5[%c0_545, %c4_546, %c1_547] : memref<4x18x18xf32, #tpu.memory_space<vmem>>, vector<4x1x16xf32>
    %348 = vector.shape_cast %347 : vector<4x1x16xf32> to vector<4x16xf32>
    %c28_548 = arith.constant 28 : index
    %c32_549 = arith.constant 32 : index
    %349 = vector.load %arg6[%c28_548, %c32_549] : memref<36x256xf32, #tpu.memory_space<vmem>>, vector<4x16xf32>
    tpu.vector_store %arg6[%c28_548, %c32_549], %348 {strides = array<i32>} : memref<36x256xf32, #tpu.memory_space<vmem>>, vector<4x16xf32>,
    %c0_550 = arith.constant 0 : index
    %c5_551 = arith.constant 5 : index
    %c1_552 = arith.constant 1 : index
    %350 = vector.load %arg5[%c0_550, %c5_551, %c1_552] : memref<4x18x18xf32, #tpu.memory_space<vmem>>, vector<4x1x16xf32>
    %351 = vector.shape_cast %350 : vector<4x1x16xf32> to vector<4x16xf32>
    %c28_553 = arith.constant 28 : index
    %c48_554 = arith.constant 48 : index
    %352 = vector.load %arg6[%c28_553, %c48_554] : memref<36x256xf32, #tpu.memory_space<vmem>>, vector<4x16xf32>
    tpu.vector_store %arg6[%c28_553, %c48_554], %351 {strides = array<i32>} : memref<36x256xf32, #tpu.memory_space<vmem>>, vector<4x16xf32>,
    %c0_555 = arith.constant 0 : index
    %c6_556 = arith.constant 6 : index
    %c1_557 = arith.constant 1 : index
    %353 = vector.load %arg5[%c0_555, %c6_556, %c1_557] : memref<4x18x18xf32, #tpu.memory_space<vmem>>, vector<4x1x16xf32>
    %354 = vector.shape_cast %353 : vector<4x1x16xf32> to vector<4x16xf32>
    %c28_558 = arith.constant 28 : index
    %c64_559 = arith.constant 64 : index
    %355 = vector.load %arg6[%c28_558, %c64_559] : memref<36x256xf32, #tpu.memory_space<vmem>>, vector<4x16xf32>
    tpu.vector_store %arg6[%c28_558, %c64_559], %354 {strides = array<i32>} : memref<36x256xf32, #tpu.memory_space<vmem>>, vector<4x16xf32>,
    %c0_560 = arith.constant 0 : index
    %c7_561 = arith.constant 7 : index
    %c1_562 = arith.constant 1 : index
    %356 = vector.load %arg5[%c0_560, %c7_561, %c1_562] : memref<4x18x18xf32, #tpu.memory_space<vmem>>, vector<4x1x16xf32>
    %357 = vector.shape_cast %356 : vector<4x1x16xf32> to vector<4x16xf32>
    %c28_563 = arith.constant 28 : index
    %c80_564 = arith.constant 80 : index
    %358 = vector.load %arg6[%c28_563, %c80_564] : memref<36x256xf32, #tpu.memory_space<vmem>>, vector<4x16xf32>
    tpu.vector_store %arg6[%c28_563, %c80_564], %357 {strides = array<i32>} : memref<36x256xf32, #tpu.memory_space<vmem>>, vector<4x16xf32>,
    %c0_565 = arith.constant 0 : index
    %c8_566 = arith.constant 8 : index
    %c1_567 = arith.constant 1 : index
    %359 = vector.load %arg5[%c0_565, %c8_566, %c1_567] : memref<4x18x18xf32, #tpu.memory_space<vmem>>, vector<4x1x16xf32>
    %360 = vector.shape_cast %359 : vector<4x1x16xf32> to vector<4x16xf32>
    %c28_568 = arith.constant 28 : index
    %c96_569 = arith.constant 96 : index
    %361 = vector.load %arg6[%c28_568, %c96_569] : memref<36x256xf32, #tpu.memory_space<vmem>>, vector<4x16xf32>
    tpu.vector_store %arg6[%c28_568, %c96_569], %360 {strides = array<i32>} : memref<36x256xf32, #tpu.memory_space<vmem>>, vector<4x16xf32>,
    %c0_570 = arith.constant 0 : index
    %c9_571 = arith.constant 9 : index
    %c1_572 = arith.constant 1 : index
    %362 = vector.load %arg5[%c0_570, %c9_571, %c1_572] : memref<4x18x18xf32, #tpu.memory_space<vmem>>, vector<4x1x16xf32>
    %363 = vector.shape_cast %362 : vector<4x1x16xf32> to vector<4x16xf32>
    %c28_573 = arith.constant 28 : index
    %c112_574 = arith.constant 112 : index
    %364 = vector.load %arg6[%c28_573, %c112_574] : memref<36x256xf32, #tpu.memory_space<vmem>>, vector<4x16xf32>
    tpu.vector_store %arg6[%c28_573, %c112_574], %363 {strides = array<i32>} : memref<36x256xf32, #tpu.memory_space<vmem>>, vector<4x16xf32>,
    %c0_575 = arith.constant 0 : index
    %c10_576 = arith.constant 10 : index
    %c1_577 = arith.constant 1 : index
    %365 = vector.load %arg5[%c0_575, %c10_576, %c1_577] : memref<4x18x18xf32, #tpu.memory_space<vmem>>, vector<4x1x16xf32>
    %366 = vector.shape_cast %365 : vector<4x1x16xf32> to vector<4x16xf32>
    %c28_578 = arith.constant 28 : index
    %c128_579 = arith.constant 128 : index
    %367 = vector.load %arg6[%c28_578, %c128_579] : memref<36x256xf32, #tpu.memory_space<vmem>>, vector<4x16xf32>
    tpu.vector_store %arg6[%c28_578, %c128_579], %366 {strides = array<i32>} : memref<36x256xf32, #tpu.memory_space<vmem>>, vector<4x16xf32>,
    %c0_580 = arith.constant 0 : index
    %c11_581 = arith.constant 11 : index
    %c1_582 = arith.constant 1 : index
    %368 = vector.load %arg5[%c0_580, %c11_581, %c1_582] : memref<4x18x18xf32, #tpu.memory_space<vmem>>, vector<4x1x16xf32>
    %369 = vector.shape_cast %368 : vector<4x1x16xf32> to vector<4x16xf32>
    %c28_583 = arith.constant 28 : index
    %c144_584 = arith.constant 144 : index
    %370 = vector.load %arg6[%c28_583, %c144_584] : memref<36x256xf32, #tpu.memory_space<vmem>>, vector<4x16xf32>
    tpu.vector_store %arg6[%c28_583, %c144_584], %369 {strides = array<i32>} : memref<36x256xf32, #tpu.memory_space<vmem>>, vector<4x16xf32>,
    %c0_585 = arith.constant 0 : index
    %c12_586 = arith.constant 12 : index
    %c1_587 = arith.constant 1 : index
    %371 = vector.load %arg5[%c0_585, %c12_586, %c1_587] : memref<4x18x18xf32, #tpu.memory_space<vmem>>, vector<4x1x16xf32>
    %372 = vector.shape_cast %371 : vector<4x1x16xf32> to vector<4x16xf32>
    %c28_588 = arith.constant 28 : index
    %c160_589 = arith.constant 160 : index
    %373 = vector.load %arg6[%c28_588, %c160_589] : memref<36x256xf32, #tpu.memory_space<vmem>>, vector<4x16xf32>
    tpu.vector_store %arg6[%c28_588, %c160_589], %372 {strides = array<i32>} : memref<36x256xf32, #tpu.memory_space<vmem>>, vector<4x16xf32>,
    %c0_590 = arith.constant 0 : index
    %c13_591 = arith.constant 13 : index
    %c1_592 = arith.constant 1 : index
    %374 = vector.load %arg5[%c0_590, %c13_591, %c1_592] : memref<4x18x18xf32, #tpu.memory_space<vmem>>, vector<4x1x16xf32>
    %375 = vector.shape_cast %374 : vector<4x1x16xf32> to vector<4x16xf32>
    %c28_593 = arith.constant 28 : index
    %c176_594 = arith.constant 176 : index
    %376 = vector.load %arg6[%c28_593, %c176_594] : memref<36x256xf32, #tpu.memory_space<vmem>>, vector<4x16xf32>
    tpu.vector_store %arg6[%c28_593, %c176_594], %375 {strides = array<i32>} : memref<36x256xf32, #tpu.memory_space<vmem>>, vector<4x16xf32>,
    %c0_595 = arith.constant 0 : index
    %c14_596 = arith.constant 14 : index
    %c1_597 = arith.constant 1 : index
    %377 = vector.load %arg5[%c0_595, %c14_596, %c1_597] : memref<4x18x18xf32, #tpu.memory_space<vmem>>, vector<4x1x16xf32>
    %378 = vector.shape_cast %377 : vector<4x1x16xf32> to vector<4x16xf32>
    %c28_598 = arith.constant 28 : index
    %c192_599 = arith.constant 192 : index
    %379 = vector.load %arg6[%c28_598, %c192_599] : memref<36x256xf32, #tpu.memory_space<vmem>>, vector<4x16xf32>
    tpu.vector_store %arg6[%c28_598, %c192_599], %378 {strides = array<i32>} : memref<36x256xf32, #tpu.memory_space<vmem>>, vector<4x16xf32>,
    %c0_600 = arith.constant 0 : index
    %c15_601 = arith.constant 15 : index
    %c1_602 = arith.constant 1 : index
    %380 = vector.load %arg5[%c0_600, %c15_601, %c1_602] : memref<4x18x18xf32, #tpu.memory_space<vmem>>, vector<4x1x16xf32>
    %381 = vector.shape_cast %380 : vector<4x1x16xf32> to vector<4x16xf32>
    %c28_603 = arith.constant 28 : index
    %c208_604 = arith.constant 208 : index
    %382 = vector.load %arg6[%c28_603, %c208_604] : memref<36x256xf32, #tpu.memory_space<vmem>>, vector<4x16xf32>
    tpu.vector_store %arg6[%c28_603, %c208_604], %381 {strides = array<i32>} : memref<36x256xf32, #tpu.memory_space<vmem>>, vector<4x16xf32>,
    %c0_605 = arith.constant 0 : index
    %c16_606 = arith.constant 16 : index
    %c1_607 = arith.constant 1 : index
    %383 = vector.load %arg5[%c0_605, %c16_606, %c1_607] : memref<4x18x18xf32, #tpu.memory_space<vmem>>, vector<4x1x16xf32>
    %384 = vector.shape_cast %383 : vector<4x1x16xf32> to vector<4x16xf32>
    %c28_608 = arith.constant 28 : index
    %c224_609 = arith.constant 224 : index
    %385 = vector.load %arg6[%c28_608, %c224_609] : memref<36x256xf32, #tpu.memory_space<vmem>>, vector<4x16xf32>
    tpu.vector_store %arg6[%c28_608, %c224_609], %384 {strides = array<i32>} : memref<36x256xf32, #tpu.memory_space<vmem>>, vector<4x16xf32>,
    %c0_610 = arith.constant 0 : index
    %c17_611 = arith.constant 17 : index
    %c1_612 = arith.constant 1 : index
    %386 = vector.load %arg5[%c0_610, %c17_611, %c1_612] : memref<4x18x18xf32, #tpu.memory_space<vmem>>, vector<4x1x16xf32>
    %387 = vector.shape_cast %386 : vector<4x1x16xf32> to vector<4x16xf32>
    %c28_613 = arith.constant 28 : index
    %c240_614 = arith.constant 240 : index
    %388 = vector.load %arg6[%c28_613, %c240_614] : memref<36x256xf32, #tpu.memory_space<vmem>>, vector<4x16xf32>
    tpu.vector_store %arg6[%c28_613, %c240_614], %387 {strides = array<i32>} : memref<36x256xf32, #tpu.memory_space<vmem>>, vector<4x16xf32>,
    %c0_615 = arith.constant 0 : index
    %c2_616 = arith.constant 2 : index
    %c2_617 = arith.constant 2 : index
    %389 = vector.load %arg5[%c0_615, %c2_616, %c2_617] : memref<4x18x18xf32, #tpu.memory_space<vmem>>, vector<4x1x16xf32>
    %390 = vector.shape_cast %389 : vector<4x1x16xf32> to vector<4x16xf32>
    %c32_618 = arith.constant 32 : index
    %c0_619 = arith.constant 0 : index
    %391 = vector.load %arg6[%c32_618, %c0_619] : memref<36x256xf32, #tpu.memory_space<vmem>>, vector<4x16xf32>
    tpu.vector_store %arg6[%c32_618, %c0_619], %390 {strides = array<i32>} : memref<36x256xf32, #tpu.memory_space<vmem>>, vector<4x16xf32>,
    %c0_620 = arith.constant 0 : index
    %c3_621 = arith.constant 3 : index
    %c2_622 = arith.constant 2 : index
    %392 = vector.load %arg5[%c0_620, %c3_621, %c2_622] : memref<4x18x18xf32, #tpu.memory_space<vmem>>, vector<4x1x16xf32>
    %393 = vector.shape_cast %392 : vector<4x1x16xf32> to vector<4x16xf32>
    %c32_623 = arith.constant 32 : index
    %c16_624 = arith.constant 16 : index
    %394 = vector.load %arg6[%c32_623, %c16_624] : memref<36x256xf32, #tpu.memory_space<vmem>>, vector<4x16xf32>
    tpu.vector_store %arg6[%c32_623, %c16_624], %393 {strides = array<i32>} : memref<36x256xf32, #tpu.memory_space<vmem>>, vector<4x16xf32>,
    %c0_625 = arith.constant 0 : index
    %c4_626 = arith.constant 4 : index
    %c2_627 = arith.constant 2 : index
    %395 = vector.load %arg5[%c0_625, %c4_626, %c2_627] : memref<4x18x18xf32, #tpu.memory_space<vmem>>, vector<4x1x16xf32>
    %396 = vector.shape_cast %395 : vector<4x1x16xf32> to vector<4x16xf32>
    %c32_628 = arith.constant 32 : index
    %c32_629 = arith.constant 32 : index
    %397 = vector.load %arg6[%c32_628, %c32_629] : memref<36x256xf32, #tpu.memory_space<vmem>>, vector<4x16xf32>
    tpu.vector_store %arg6[%c32_628, %c32_629], %396 {strides = array<i32>} : memref<36x256xf32, #tpu.memory_space<vmem>>, vector<4x16xf32>,
    %c0_630 = arith.constant 0 : index
    %c5_631 = arith.constant 5 : index
    %c2_632 = arith.constant 2 : index
    %398 = vector.load %arg5[%c0_630, %c5_631, %c2_632] : memref<4x18x18xf32, #tpu.memory_space<vmem>>, vector<4x1x16xf32>
    %399 = vector.shape_cast %398 : vector<4x1x16xf32> to vector<4x16xf32>
    %c32_633 = arith.constant 32 : index
    %c48_634 = arith.constant 48 : index
    %400 = vector.load %arg6[%c32_633, %c48_634] : memref<36x256xf32, #tpu.memory_space<vmem>>, vector<4x16xf32>
    tpu.vector_store %arg6[%c32_633, %c48_634], %399 {strides = array<i32>} : memref<36x256xf32, #tpu.memory_space<vmem>>, vector<4x16xf32>,
    %c0_635 = arith.constant 0 : index
    %c6_636 = arith.constant 6 : index
    %c2_637 = arith.constant 2 : index
    %401 = vector.load %arg5[%c0_635, %c6_636, %c2_637] : memref<4x18x18xf32, #tpu.memory_space<vmem>>, vector<4x1x16xf32>
    %402 = vector.shape_cast %401 : vector<4x1x16xf32> to vector<4x16xf32>
    %c32_638 = arith.constant 32 : index
    %c64_639 = arith.constant 64 : index
    %403 = vector.load %arg6[%c32_638, %c64_639] : memref<36x256xf32, #tpu.memory_space<vmem>>, vector<4x16xf32>
    tpu.vector_store %arg6[%c32_638, %c64_639], %402 {strides = array<i32>} : memref<36x256xf32, #tpu.memory_space<vmem>>, vector<4x16xf32>,
    %c0_640 = arith.constant 0 : index
    %c7_641 = arith.constant 7 : index
    %c2_642 = arith.constant 2 : index
    %404 = vector.load %arg5[%c0_640, %c7_641, %c2_642] : memref<4x18x18xf32, #tpu.memory_space<vmem>>, vector<4x1x16xf32>
    %405 = vector.shape_cast %404 : vector<4x1x16xf32> to vector<4x16xf32>
    %c32_643 = arith.constant 32 : index
    %c80_644 = arith.constant 80 : index
    %406 = vector.load %arg6[%c32_643, %c80_644] : memref<36x256xf32, #tpu.memory_space<vmem>>, vector<4x16xf32>
    tpu.vector_store %arg6[%c32_643, %c80_644], %405 {strides = array<i32>} : memref<36x256xf32, #tpu.memory_space<vmem>>, vector<4x16xf32>,
    %c0_645 = arith.constant 0 : index
    %c8_646 = arith.constant 8 : index
    %c2_647 = arith.constant 2 : index
    %407 = vector.load %arg5[%c0_645, %c8_646, %c2_647] : memref<4x18x18xf32, #tpu.memory_space<vmem>>, vector<4x1x16xf32>
    %408 = vector.shape_cast %407 : vector<4x1x16xf32> to vector<4x16xf32>
    %c32_648 = arith.constant 32 : index
    %c96_649 = arith.constant 96 : index
    %409 = vector.load %arg6[%c32_648, %c96_649] : memref<36x256xf32, #tpu.memory_space<vmem>>, vector<4x16xf32>
    tpu.vector_store %arg6[%c32_648, %c96_649], %408 {strides = array<i32>} : memref<36x256xf32, #tpu.memory_space<vmem>>, vector<4x16xf32>,
    %c0_650 = arith.constant 0 : index
    %c9_651 = arith.constant 9 : index
    %c2_652 = arith.constant 2 : index
    %410 = vector.load %arg5[%c0_650, %c9_651, %c2_652] : memref<4x18x18xf32, #tpu.memory_space<vmem>>, vector<4x1x16xf32>
    %411 = vector.shape_cast %410 : vector<4x1x16xf32> to vector<4x16xf32>
    %c32_653 = arith.constant 32 : index
    %c112_654 = arith.constant 112 : index
    %412 = vector.load %arg6[%c32_653, %c112_654] : memref<36x256xf32, #tpu.memory_space<vmem>>, vector<4x16xf32>
    tpu.vector_store %arg6[%c32_653, %c112_654], %411 {strides = array<i32>} : memref<36x256xf32, #tpu.memory_space<vmem>>, vector<4x16xf32>,
    %c0_655 = arith.constant 0 : index
    %c10_656 = arith.constant 10 : index
    %c2_657 = arith.constant 2 : index
    %413 = vector.load %arg5[%c0_655, %c10_656, %c2_657] : memref<4x18x18xf32, #tpu.memory_space<vmem>>, vector<4x1x16xf32>
    %414 = vector.shape_cast %413 : vector<4x1x16xf32> to vector<4x16xf32>
    %c32_658 = arith.constant 32 : index
    %c128_659 = arith.constant 128 : index
    %415 = vector.load %arg6[%c32_658, %c128_659] : memref<36x256xf32, #tpu.memory_space<vmem>>, vector<4x16xf32>
    tpu.vector_store %arg6[%c32_658, %c128_659], %414 {strides = array<i32>} : memref<36x256xf32, #tpu.memory_space<vmem>>, vector<4x16xf32>,
    %c0_660 = arith.constant 0 : index
    %c11_661 = arith.constant 11 : index
    %c2_662 = arith.constant 2 : index
    %416 = vector.load %arg5[%c0_660, %c11_661, %c2_662] : memref<4x18x18xf32, #tpu.memory_space<vmem>>, vector<4x1x16xf32>
    %417 = vector.shape_cast %416 : vector<4x1x16xf32> to vector<4x16xf32>
    %c32_663 = arith.constant 32 : index
    %c144_664 = arith.constant 144 : index
    %418 = vector.load %arg6[%c32_663, %c144_664] : memref<36x256xf32, #tpu.memory_space<vmem>>, vector<4x16xf32>
    tpu.vector_store %arg6[%c32_663, %c144_664], %417 {strides = array<i32>} : memref<36x256xf32, #tpu.memory_space<vmem>>, vector<4x16xf32>,
    %c0_665 = arith.constant 0 : index
    %c12_666 = arith.constant 12 : index
    %c2_667 = arith.constant 2 : index
    %419 = vector.load %arg5[%c0_665, %c12_666, %c2_667] : memref<4x18x18xf32, #tpu.memory_space<vmem>>, vector<4x1x16xf32>
    %420 = vector.shape_cast %419 : vector<4x1x16xf32> to vector<4x16xf32>
    %c32_668 = arith.constant 32 : index
    %c160_669 = arith.constant 160 : index
    %421 = vector.load %arg6[%c32_668, %c160_669] : memref<36x256xf32, #tpu.memory_space<vmem>>, vector<4x16xf32>
    tpu.vector_store %arg6[%c32_668, %c160_669], %420 {strides = array<i32>} : memref<36x256xf32, #tpu.memory_space<vmem>>, vector<4x16xf32>,
    %c0_670 = arith.constant 0 : index
    %c13_671 = arith.constant 13 : index
    %c2_672 = arith.constant 2 : index
    %422 = vector.load %arg5[%c0_670, %c13_671, %c2_672] : memref<4x18x18xf32, #tpu.memory_space<vmem>>, vector<4x1x16xf32>
    %423 = vector.shape_cast %422 : vector<4x1x16xf32> to vector<4x16xf32>
    %c32_673 = arith.constant 32 : index
    %c176_674 = arith.constant 176 : index
    %424 = vector.load %arg6[%c32_673, %c176_674] : memref<36x256xf32, #tpu.memory_space<vmem>>, vector<4x16xf32>
    tpu.vector_store %arg6[%c32_673, %c176_674], %423 {strides = array<i32>} : memref<36x256xf32, #tpu.memory_space<vmem>>, vector<4x16xf32>,
    %c0_675 = arith.constant 0 : index
    %c14_676 = arith.constant 14 : index
    %c2_677 = arith.constant 2 : index
    %425 = vector.load %arg5[%c0_675, %c14_676, %c2_677] : memref<4x18x18xf32, #tpu.memory_space<vmem>>, vector<4x1x16xf32>
    %426 = vector.shape_cast %425 : vector<4x1x16xf32> to vector<4x16xf32>
    %c32_678 = arith.constant 32 : index
    %c192_679 = arith.constant 192 : index
    %427 = vector.load %arg6[%c32_678, %c192_679] : memref<36x256xf32, #tpu.memory_space<vmem>>, vector<4x16xf32>
    tpu.vector_store %arg6[%c32_678, %c192_679], %426 {strides = array<i32>} : memref<36x256xf32, #tpu.memory_space<vmem>>, vector<4x16xf32>,
    %c0_680 = arith.constant 0 : index
    %c15_681 = arith.constant 15 : index
    %c2_682 = arith.constant 2 : index
    %428 = vector.load %arg5[%c0_680, %c15_681, %c2_682] : memref<4x18x18xf32, #tpu.memory_space<vmem>>, vector<4x1x16xf32>
    %429 = vector.shape_cast %428 : vector<4x1x16xf32> to vector<4x16xf32>
    %c32_683 = arith.constant 32 : index
    %c208_684 = arith.constant 208 : index
    %430 = vector.load %arg6[%c32_683, %c208_684] : memref<36x256xf32, #tpu.memory_space<vmem>>, vector<4x16xf32>
    tpu.vector_store %arg6[%c32_683, %c208_684], %429 {strides = array<i32>} : memref<36x256xf32, #tpu.memory_space<vmem>>, vector<4x16xf32>,
    %c0_685 = arith.constant 0 : index
    %c16_686 = arith.constant 16 : index
    %c2_687 = arith.constant 2 : index
    %431 = vector.load %arg5[%c0_685, %c16_686, %c2_687] : memref<4x18x18xf32, #tpu.memory_space<vmem>>, vector<4x1x16xf32>
    %432 = vector.shape_cast %431 : vector<4x1x16xf32> to vector<4x16xf32>
    %c32_688 = arith.constant 32 : index
    %c224_689 = arith.constant 224 : index
    %433 = vector.load %arg6[%c32_688, %c224_689] : memref<36x256xf32, #tpu.memory_space<vmem>>, vector<4x16xf32>
    tpu.vector_store %arg6[%c32_688, %c224_689], %432 {strides = array<i32>} : memref<36x256xf32, #tpu.memory_space<vmem>>, vector<4x16xf32>,
    %c0_690 = arith.constant 0 : index
    %c17_691 = arith.constant 17 : index
    %c2_692 = arith.constant 2 : index
    %434 = vector.load %arg5[%c0_690, %c17_691, %c2_692] : memref<4x18x18xf32, #tpu.memory_space<vmem>>, vector<4x1x16xf32>
    %435 = vector.shape_cast %434 : vector<4x1x16xf32> to vector<4x16xf32>
    %c32_693 = arith.constant 32 : index
    %c240_694 = arith.constant 240 : index
    %436 = vector.load %arg6[%c32_693, %c240_694] : memref<36x256xf32, #tpu.memory_space<vmem>>, vector<4x16xf32>
    tpu.vector_store %arg6[%c32_693, %c240_694], %435 {strides = array<i32>} : memref<36x256xf32, #tpu.memory_space<vmem>>, vector<4x16xf32>,
    %c0_695 = arith.constant 0 : index
    %c0_696 = arith.constant 0 : index
    %437 = vector.load %arg2[%c0_695, %c0_696] : memref<8x36xf32, #tpu.memory_space<vmem>>, vector<8x36xf32>
    %c0_697 = arith.constant 0 : index
    %c0_698 = arith.constant 0 : index
    %438 = vector.load %arg6[%c0_697, %c0_698] : memref<36x256xf32, #tpu.memory_space<vmem>>, vector<36x256xf32>
    %cst_699 = arith.constant dense<0.000000e+00> : vector<8x256xf32>
    %439 = tpu.matmul %437, %438, %cst_699 {dimension_numbers = #tpu.dot_dimension_numbers<[1], [0], [0], [1], [0, 0, 1, 1], [], []>} : vector<8x36xf32>, vector<36x256xf32>, vector<8x256xf32> -> vector<8x256xf32>
    %c0_700 = arith.constant 0 : index
    %c0_701 = arith.constant 0 : index
    %440 = vector.load %arg3[%c0_700, %c0_701] : memref<8x1xf32, #tpu.memory_space<vmem>>, vector<8x1xf32>
    %441 = vector.broadcast %440 : vector<8x1xf32> to vector<8x256xf32>
    %442 = arith.addf %439, %441 : vector<8x256xf32>
    %cst_702 = arith.constant 0.000000e+00 : f32
    %443 = vector.broadcast %cst_702 : f32 to vector<8x256xf32>
    %444 = arith.cmpf ogt, %442, %443 : vector<8x256xf32>
    %cst_703 = arith.constant 2.000000e-01 : f32
    %445 = vector.broadcast %cst_703 : f32 to vector<8x256xf32>
    %446 = arith.mulf %445, %442 : vector<8x256xf32>
    %447 = arith.select %444, %442, %446 : vector<8x256xi1>, vector<8x256xf32>
    %c0_704 = arith.constant 0 : index
    %c0_705 = arith.constant 0 : index
    %c0_706 = arith.constant 0 : index
    %448 = vector.load %arg4[%c0_704, %c0_705, %c0_706] : memref<1x8x256xf32, #tpu.memory_space<vmem>>, vector<1x8x256xf32>
    %449 = vector.shape_cast %448 : vector<1x8x256xf32> to vector<8x256xf32>
    %450 = vector.shape_cast %447 : vector<8x256xf32> to vector<1x8x256xf32>
    tpu.vector_store %arg4[%c0_704, %c0_705, %c0_706], %450 {strides = array<i32>} : memref<1x8x256xf32, #tpu.memory_space<vmem>>, vector<1x8x256xf32>,
    return
  }
  func.func @transform_0(%arg0: i32) -> (i32, i32, i32, i32) {
    %c0_i32 = arith.constant 0 : i32
    %c0_i32_0 = arith.constant 0 : i32
    %c0_i32_1 = arith.constant 0 : i32
    %c0_i32_2 = arith.constant 0 : i32
    return %arg0, %c0_i32, %c0_i32_0, %c0_i32_1 : i32, i32, i32, i32
  }
  func.func @transform_1(%arg0: i32) -> (i32, i32) {
    %c0_i32 = arith.constant 0 : i32
    %c0_i32_0 = arith.constant 0 : i32
    %c0_i32_1 = arith.constant 0 : i32
    return %c0_i32, %c0_i32_0 : i32, i32
  }
  func.func @transform_2(%arg0: i32) -> (i32, i32) {
    %c0_i32 = arith.constant 0 : i32
    %c0_i32_0 = arith.constant 0 : i32
    %c0_i32_1 = arith.constant 0 : i32
    return %c0_i32, %c0_i32_0 : i32, i32
  }
  func.func @transform_3(%arg0: i32) -> (i32, i32, i32) {
    %c0_i32 = arith.constant 0 : i32
    %c0_i32_0 = arith.constant 0 : i32
    %c0_i32_1 = arith.constant 0 : i32
    return %arg0, %c0_i32, %c0_i32_0 : i32, i32, i32
  }
}

</mosaic_0001>

<bundles_post_ra>
// kernel: tpu_custom_call.1
= control target key start
LH: loop header
LB: loop body
LE: loop exit
PB: predicated region body
PF: predicated region fallthrough
CT: control target
= control target key end

     0   :  { %8 = vsyncpa [#allocation5], 0  ;;  %s4338_s0 = inlined_call_operand.hbm [shape: f32[2,4,16,16], index: 0, kind: input, shape index: {}]   ;;  %s4339_s1 = inlined_call_operand.vmem [shape: f32[8,36], index: 1, kind: input, shape index: {}]   ;;  %s4340_s2 = inlined_call_operand.vmem [shape: f32[8,1], index: 2, kind: input, shape index: {}]   ;;  %s4341_s3 = inlined_call_operand.hbm [shape: f32[2,8,256], index: 3, kind: output, shape index: {}]  }
   0x1   :  { %10 = vsyncpa [#allocation5 + $0x1], 0 }
   0x2   :  { %11 = vsyncpa [#allocation6], 0 }
   0x3   :  { %13 = vsyncpa [#allocation6 + $0x1], 0  ;;  %s3360_s12 = smov 0   ;;  %s3362_s13 = smov 0  }
   0x4   :  { %s3364_s14 = smov 0   ;;  %s3366_s15 = smov 0  }
   0x5 LB: > { %s3381_s16 = sadd.s32 4294967295, %s3308_s15   ;;  %s3110_s17 = sadd.s32 4294967294, %s3308_s15   ;;  %s3308_s15 = sphi %s3366_s15, %s4390_s15   ;;  %s3304_s14 = sphi %s3364_s14, %s4389_s14   ;;  %s3300_s13 = sphi %s3362_s13, %s4388_s13   ;;  %s3296_s12 = sphi %s3360_s12, %s4387_s12  }
   0x6   : > { %s3385_s18 = sadd.s32 1, %s3308_s15   ;;  %s26_s19 = sadd.s32 1, %s3304_s14 }
   0x7   : > { %s23_s20 = ssub.s32 %s3308_s15, %s3385_s18  ;;  %p33_p0 = scmp.ne.s32.totalorder %s3304_s14, %s3300_s13 }
   0x8   : > { %p24_p1 = scmp.eq.s32.totalorder %s23_s20, 0  ;;  %p34_p2 = scmp.eq.s32.totalorder %s3308_s15, 0 }
   0x9   : > { %p39_p3 = scmp.ne.s32.totalorder %s3300_s13, %s3296_s12  ;;  %p40_p4 = scmp.eq.s32.totalorder %s3381_s16, 0 }
   0xa   : > { %s3397_s21 = scalar_select %p24_p1, %s3304_s14, %s26_s19  }
   0xb   : > { %p3399_p5 = por %p34_p2, %p33_p0  ;;  %p3403_p6 = por %p40_p4, %p39_p3 }
   0xc   : > { %p105_p7 = scmp.eq.s32.totalorder %s3381_s16, 1  ;;  %p111_p8 = scmp.eq.s32.totalorder %s3110_s17, 1 }
   0xd   : > { %p3149_p10 = scmp.lt.s32.totalorder %s3308_s15, 2  ;;  %s137_s26 = sand.u32 1, %s3304_s14  }
   0xe   : > { %p3410_p11 = por %p105_p7, %p33_p0  ;;  %p3414_p12 = por %p111_p8, %p39_p3 }
   0xf   : > { %s3127_s27 = sshll.u32 %s3308_s15, 10  ;;  %s3113_s28 = sshll.u32 %s137_s26, 6 }
  0x10   : > { %s4356_s24 = scalar_select %p3410_p11, 1, 0 }
  0x11   : > { %s4357_s25 = scalar_select %p3414_p12, 1, 0 }
  0x12   : > { %s3423_s4 = scalar_lea.hbm %s4338_s0, %s3127_s27  ;;  %s141_s5 = scalar_lea.vmem [#allocation4], %s3113_s28 }
  0x13   : > { %s148_s6 = sshll.u32 %s141_s5, 4  ;;  %p3427_p13 = pnand %p3149_p10, %p3399_p5  ;;  %s3431_s6 = int_to_ptr.vmem [resolvable:$true] %s148_s6 }
  0x14   : > { %s3433_s8 = scalar_lea.sflag [#allocation5], %s137_s26  ;;  %s3212_s9 = scalar_lea.hbm %s3423_s4, 1024 }
  0x15   : > { %p3213_p0 = scmp.ne.s32.totalorder %s3423_s4, %s3212_s9  ;;  %p3214_p1 = pneg %p3427_p13 }
  0x16   : > { %s3217_s17 = scalar_lea.hbm %s4338_s0, 2048  ;;  %p3218_p4 = scmp.lt.u32.totalorder %s3423_s4, %s4338_s0 }
  0x17   : > { %p3215_p2 = pnand %p3214_p1, %p3213_p0  ;;  %p3219_p5 = scmp.lt.u32.totalorder %s3217_s17, %s3212_s9 }
  0x18   : > { %p3221_p8 = scmp.lt.u32.totalorder %s3212_s9, %s3423_s4 }
  0x19   : > { %p3216_p3 = pneg %p3215_p2  ;;  %p3220_p7 = por %p3219_p5, %p3218_p4 }
  0x1b   : > { %p3222_p10 = por %p3221_p8, %p3220_p7 }
  0x1d   : > { %p3223_p9 = pnand %p3222_p10, %p3216_p3 }
  0x1f   : > { %3226 = shalt.err (!%p3223_p9)
}
  0x20   : > { %s3227_s22 = scalar_lea.vmem %s3431_s6, 1024  ;;  %s3310_s26 = smov [#allocation4]  }
  0x21   : > { %p3228_p0 = scmp.ne.s32.totalorder %s3431_s6, %s3227_s22  ;;  %s3232_s27 = sshll.u32 %s3310_s26, 4  ;;  %s3233_s27 = int_to_ptr.vmem [resolvable:$false] %s3232_s27 }
  0x22   : > { %s3234_s28 = scalar_lea.vmem %s3233_s27, 2048  ;;  %p3235_p11 = scmp.lt.s32.totalorder %s3431_s6, %s3233_s27 }
  0x23   : > { %p3230_p2 = pnand %p3228_p0, %p3214_p1  ;;  %p3236_p4 = scmp.lt.s32.totalorder %s3234_s28, %s3227_s22 }
  0x25   : > { %p3231_p12 = pneg %p3230_p2  ;;  %p3237_p5 = por %p3236_p4, %p3235_p11 }
  0x27   : > { %p3238_p7 = pnand %p3237_p5, %p3231_p12 }
  0x29   : > { %3241 = shalt.err (!%p3238_p7)
}
  0x2a   : > { %s3311_s29 = smov 128   ;;  %s3312_s30 = smov 8  }
  0x2b   : > { %3144 = dma.hbm_to_vmem [thread:$0]  (!%p3427_p13), %s3423_s4, 1024, %s3431_s6, %s3433_s8, %s3311_s29, %s3311_s29, %s3312_s30  }
  0x2c   : > { %p3116_p9 = scmp.ge.s32.totalorder %s3308_s15, 1  ;;  %p156_p1 = scmp.lt.s32.totalorder %s3308_s15, 3 }
  0x2e   : > { %p157_p3 = pnand %p3116_p9, %p156_p1 }
  0x2f   : > { %s3464_s5 = sand.u32 (!%p157_p3), 1, %s3300_s13  }
  0x30   : > { %160 = sbr.rel (%p157_p3) target bundleno = 859 (0x35b), region = 32  ;;  %s3117_s9 = sshll.u32 (!%p157_p3), %s3464_s5, 6 }
  0x31   : > { %s163_s10 = scalar_lea.sflag (!%p157_p3), [#allocation5], %s3464_s5  ;;  %s3468_s11 = scalar_lea.vmem (!%p157_p3), [#allocation4], %s3117_s9 }
  0x37   : > { %3287 = dma.done.wait (%p3403_p6), %s163_s10, 1024  }
  0x38   : > { %3289 = vsyncadd (%p3403_p6), %s163_s10, 4294966272  ;;  %vm189_vm0 = vcmask 146432   ;;  %vm192_vm1 = vcmask 140288   ;;  %v3313_v0 = vmov 0.0   ;;  %v204_v1 = vld [vmem:[%s3468_s11 + $0x8] sm:$0xff]  ;;  %v203_v2 = vld [vmem:[%s3468_s11] sm:$0xff] }
  0x39   : > { %191 = vst.msk [vmem:[#allocation2 + $0x8] sm:$0xff] %vm189_vm0, %v3313_v0  ;;  %190 = vst.msk [vmem:[#allocation2] sm:$0xff] %vm189_vm0, %v3313_v0  ;;  %3010 = vmatprep.mubr.f32.mxu0 %v3313_v0  ;;  %s3314_s23 = smov 1   ;;  %v206_v4 = vld [vmem:[%s3468_s11 + $0x18] sm:$0xff]  ;;  %v205_v5 = vld [vmem:[%s3468_s11 + $0x10] sm:$0xff]  ;;  %vm557_vm2 = vcmask 1045509  }
  0x3a   : > { %193 = vst.msk [vmem:[#allocation2 + $0x10] sm:$0x3] %vm192_vm1, %v3313_v0  ;;  %196 = vst.msk [vmem:[#allocation2 + $0x28] sm:$0x3] %vm192_vm1, %v3313_v0  ;;  %221 = vrot.lane.b32.xlu1 %v204_v1, %s3314_s23  ;;  %219 = vrot.lane.b32.xlu0 %v203_v2, %s3314_s23  ;;  %v208_v11 = vld [vmem:[%s3468_s11 + $0x28] sm:$0xff]  ;;  %v207_v12 = vld [vmem:[%s3468_s11 + $0x20] sm:$0xff] }
  0x3b   : > { %194 = vst.msk [vmem:[#allocation2 + $0x18] sm:$0xff] %vm189_vm0, %v3313_v0  ;;  %195 = vst.msk [vmem:[#allocation2 + $0x20] sm:$0xff] %vm189_vm0, %v3313_v0  ;;  %vm560_vm3 = vcmask 1046534   ;;  %v210_v19 = vld [vmem:[%s3468_s11 + $0x38] sm:$0xff]  ;;  %v209_v20 = vld [vmem:[%s3468_s11 + $0x30] sm:$0xff]  ;;  %vm563_vm4 = vcmask 1047559  }
  0x3c   : > { %197 = vst.msk [vmem:[#allocation2 + $0x30] sm:$0xff] %vm189_vm0, %v3313_v0  ;;  %198 = vst.msk [vmem:[#allocation2 + $0x38] sm:$0xff] %vm189_vm0, %v3313_v0  ;;  %vm261_vm5 = vcmask 1041409   ;;  %vm264_vm6 = vcmask 1042434   ;;  %vm267_vm7 = vcmask 1043459   ;;  %s3315_s4 = smov 127  }
  0x3d   : > { %199 = vst.msk [vmem:[#allocation2 + $0x40] sm:$0x3] %vm192_vm1, %v3313_v0  ;;  %202 = vst.msk [vmem:[#allocation2 + $0x58] sm:$0x3] %vm192_vm1, %v3313_v0  ;;  %s4343_s6 = smov 126   ;;  %vm243_vm8 = vcmask 138248  }
  0x3e   : > { %200 = vst.msk [vmem:[#allocation2 + $0x48] sm:$0xff] %vm189_vm0, %v3313_v0  ;;  %201 = vst.msk [vmem:[#allocation2 + $0x50] sm:$0xff] %vm189_vm0, %v3313_v0  ;;  %225 = vrot.lane.b32.xlu1 %v206_v4, %s3314_s23  ;;  %223 = vrot.lane.b32.xlu0 %v205_v5, %s3314_s23  ;;  %vm568_vm9 = vcmask 130052   ;;  %vm270_vm10 = vcmask 125952   ;;  %s3317_s7 = smov 16   ;;  %s3318_s8 = smov 32  }
  0x3f   : > { %s3319_s17 = smov 15   ;;  %s3320_s19 = smov 31   ;;  %vm588_vm11 = vcmask 261252   ;;  %vm289_vm12 = vcmask 257152   ;;  %vm308_vm13 = vcmask 388352   ;;  %vm608_vm14 = vcmask 392452  }
  0x40   : > { %v547_v3 = vld [vmem:[#allocation2] sm:$0x1]  ;;  %s4347_s20 = smov 14   ;;  %s3322_s22 = smov 30   ;;  %vm4352_vm15 = vcmask 519552   ;;  %vm4349_vm0 = vcmask 523652  }
  0x41   : > { %v555_v8 = vrot.slane %v547_v3, 4  ;;  %v862_v18 = vld [vmem:[#allocation2] sm:$0x1]  ;;  %s3323_s26 = smov 48   ;;  %s3324_s27 = smov 47   ;;  %vm4350_vm1 = vcmask 650752  }
  0x42   : > { %v548_v6 = vld [vmem:[#allocation2 + $0x18] sm:$0x1]  ;;  %229 = vrot.lane.b32.xlu1 %v208_v11, %s3314_s23  ;;  %227 = vrot.lane.b32.xlu0 %v207_v12, %s3314_s23  ;;  %s3325_s28 = smov 46   ;;  %s4345_s29 = smov 64  }
  0x43   : > { %v549_v7 = vld [vmem:[#allocation2 + $0x30] sm:$0x1]  ;;  %v556_v9 = vrot.slane %v548_v6, 3  ;;  %v863_v10 = vld [vmem:[#allocation2 + $0x18] sm:$0x1]  ;;  %s3327_s30 = smov 63  }
  0x44   : > { %v559_v14 = vrot.slane %v549_v7, 2  ;;  %v864_v16 = vld [vmem:[#allocation2 + $0x30] sm:$0x1]  ;;  %v870_v17 = vrot.slane %v863_v10, 7  ;;  %s3328_s9 = smov 62   ;;  %s3329_s10 = smov 80  }
  0x45   : > { %v550_v13 = vld [vmem:[#allocation2 + $0x48] sm:$0x1]  ;;  %v558_v15 = vsel %vm557_vm2, %v556_v9, %v555_v8  ;;  %v872_v24 = vrot.slane %v864_v16, 6  ;;  %s3330_s11 = smov 79   ;;  %p4384_p11 = scmp.ne.s32.totalorder %s4356_s24, 0 }
  0x46   : > { %v562_v21 = vrot.slane %v550_v13, 1  ;;  %v561_v22 = vsel %vm560_vm3, %v559_v14, %v558_v15  ;;  %v865_v23 = vld [vmem:[#allocation2 + $0x48] sm:$0x1]  ;;  %v871_v25 = vsel %vm261_vm5, %v870_v17, %v862_v18  ;;  %233 = vrot.lane.b32.xlu1 %v210_v19, %s3314_s23  ;;  %231 = vrot.lane.b32.xlu0 %v209_v20, %s3314_s23  ;;  %s3331_s23 = smov 78  }
  0x47   : > { %v874_v27 = vrot.slane %v865_v23, 5  ;;  %v873_v28 = vsel %vm264_vm6, %v872_v24, %v871_v25 }
  0x48   : > { %v564_v26 = vsel %vm563_vm4, %v562_v21, %v561_v22 }
  0x49   : > { %v875_v29 = vsel %vm267_vm7, %v874_v27, %v873_v28 }
  0x4a   : > { %565 = vrot.lane.b32.xlu1 %v564_v26, %s3315_s4 }
  0x4e   : > { %876 = vrot.lane.b32.xlu1 %v875_v29, %s4343_s6 }
  0xac   : > { %v222_v30 = vpop.permute.xlu1 %221  ;;  %v220_v31 = vpop.permute.xlu0 %219 }
  0xad   : > { %245 = vst.msk [vmem:[#allocation2 + $0x9] sm:$0xff] %vm243_vm8, %v222_v30  ;;  %244 = vst.msk [vmem:[#allocation2 + $0x1] sm:$0xff] %vm243_vm8, %v220_v31 }
  0xb0   : > { %v226_v32 = vpop.permute.xlu1 %225  ;;  %v224_v33 = vpop.permute.xlu0 %223 }
  0xb1   : > { %247 = vst.msk [vmem:[#allocation2 + $0x21] sm:$0xff] %vm243_vm8, %v226_v32  ;;  %246 = vst.msk [vmem:[#allocation2 + $0x19] sm:$0xff] %vm243_vm8, %v224_v33 }
  0xb4   : > { %v230_v34 = vpop.permute.xlu1 %229  ;;  %v228_v35 = vpop.permute.xlu0 %227  ;;  %v710_v39 = vld [vmem:[#allocation2 + $0x8] sm:$0x1]  ;;  %v1317_v41 = vld [vmem:[#allocation2 + $0xa] sm:$0x1]  ;;  %v3506_v43 = vld [vmem:[#allocation2 + $0x9] sm:$0x1] }
  0xb5   : > { %249 = vst.msk [vmem:[#allocation2 + $0x39] sm:$0xff] %vm243_vm8, %v230_v34  ;;  %248 = vst.msk [vmem:[#allocation2 + $0x31] sm:$0xff] %vm243_vm8, %v228_v35  ;;  %v718_v49 = vrot.slane %v710_v39, 4  ;;  %v1006_v51 = vld [vmem:[#allocation2 + $0x8] sm:$0x1]  ;;  %v1325_v54 = vrot.slane %v1317_v41, 4 }
  0xb6   : > { %v737_v55 = vrot.slane %v3506_v43, 4  ;;  %v3510_v60 = vld [vmem:[#allocation2 + $0xa] sm:$0x1]  ;;  %v421_v10 = vld [vmem:[#allocation2 + $0x9] sm:$0x1] }
  0xb7   : > { %v756_v23 = vrot.slane %v3510_v60, 4  ;;  %v439_v26 = vld [vmem:[#allocation2 + $0xa] sm:$0x1] }
  0xb8   : > { %v234_v36 = vpop.permute.xlu1 %233  ;;  %v232_v37 = vpop.permute.xlu0 %231  ;;  %v1007_v38 = vld [vmem:[#allocation2 + $0x20] sm:$0x1]  ;;  %v1318_v42 = vld [vmem:[#allocation2 + $0x22] sm:$0x1]  ;;  %v422_v46 = vld [vmem:[#allocation2 + $0x21] sm:$0x1] }
  0xb9   : > { %251 = vst.msk [vmem:[#allocation2 + $0x51] sm:$0xff] %vm243_vm8, %v234_v36  ;;  %250 = vst.msk [vmem:[#allocation2 + $0x49] sm:$0xff] %vm243_vm8, %v232_v37  ;;  %v711_v40 = vld [vmem:[#allocation2 + $0x20] sm:$0x1]  ;;  %v1014_v48 = vrot.slane %v1007_v38, 7  ;;  %v1326_v57 = vrot.slane %v1318_v42, 3 }
  0xba   : > { %v719_v50 = vrot.slane %v711_v40, 3  ;;  %v429_v59 = vrot.slane %v422_v46, 7  ;;  %v440_v6 = vld [vmem:[#allocation2 + $0x22] sm:$0x1]  ;;  %v730_v13 = vld [vmem:[#allocation2 + $0x21] sm:$0x1] }
  0xbb   : > { %v1015_v1 = vsel %vm261_vm5, %v1014_v48, %v1006_v51  ;;  %v447_v20 = vrot.slane %v440_v6, 7  ;;  %v749_v22 = vld [vmem:[#allocation2 + $0x22] sm:$0x1]  ;;  %v1327_v24 = vsel %vm557_vm2, %v1326_v57, %v1325_v54  ;;  %v738_v28 = vrot.slane %v730_v13, 3  ;;  %v1025_v34 = vld [vmem:[#allocation2 + $0x21] sm:$0x1] }
  0xbc   : > { %v1008_v44 = vld [vmem:[#allocation2 + $0x38] sm:$0x1]  ;;  %v566_v47 = vpop.permute.xlu1 %565  ;;  %v1319_v56 = vld [vmem:[#allocation2 + $0x3a] sm:$0x1]  ;;  %v423_v58 = vld [vmem:[#allocation2 + $0x39] sm:$0x1]  ;;  %v720_v3 = vsel %vm557_vm2, %v719_v50, %v718_v49  ;;  %v430_v25 = vsel %vm261_vm5, %v429_v59, %v421_v10 }
  0xbd   : > { %v712_v45 = vld [vmem:[#allocation2 + $0x38] sm:$0x1]  ;;  %569 = vst.msk [vmem:[#allocation3] sm:$0xf0] %vm568_vm9, %v566_v47  ;;  %v1016_v52 = vrot.slane %v1008_v44, 6  ;;  %v1328_v9 = vrot.slane %v1319_v56, 2  ;;  %v448_v42 = vsel %vm261_vm5, %v447_v20, %v439_v26  ;;  %v739_v48 = vsel %vm557_vm2, %v738_v28, %v737_v55 }
  0xbe   : > { %v721_v53 = vrot.slane %v712_v45, 2  ;;  %v431_v11 = vrot.slane %v423_v58, 6  ;;  %v441_v12 = vld [vmem:[#allocation2 + $0x3a] sm:$0x1]  ;;  %v731_v19 = vld [vmem:[#allocation2 + $0x39] sm:$0x1] }
  0xbf   : > { %v1017_v7 = vsel %vm264_vm6, %v1016_v52, %v1015_v1  ;;  %v449_v27 = vrot.slane %v441_v12, 6  ;;  %v750_v29 = vld [vmem:[#allocation2 + $0x3a] sm:$0x1]  ;;  %v1329_v30 = vsel %vm560_vm3, %v1328_v9, %v1327_v24  ;;  %v740_v33 = vrot.slane %v731_v19, 2  ;;  %v1026_v35 = vld [vmem:[#allocation2 + $0x39] sm:$0x1] }
  0xc0   : > { %v1009_v61 = vld [vmem:[#allocation2 + $0x50] sm:$0x1]  ;;  %v1320_v63 = vld [vmem:[#allocation2 + $0x52] sm:$0x1]  ;;  %v877_v0 = vpop.permute.xlu1 %876  ;;  %v424_v5 = vld [vmem:[#allocation2 + $0x51] sm:$0x1]  ;;  %v722_v8 = vsel %vm560_vm3, %v721_v53, %v720_v3  ;;  %v432_v31 = vsel %vm264_vm6, %v431_v11, %v430_v25 }
  0xc1   : > { %v713_v62 = vld [vmem:[#allocation2 + $0x50] sm:$0x1]  ;;  %v1018_v2 = vrot.slane %v1009_v61, 5  ;;  %879 = vst.msk [vmem:[#allocation3 + $0x10] sm:$0xf] %vm270_vm10, %v877_v0  ;;  %v1330_v16 = vrot.slane %v1320_v63, 1  ;;  %v450_v47 = vsel %vm264_vm6, %v449_v27, %v448_v42  ;;  %v741_v53 = vsel %vm560_vm3, %v740_v33, %v739_v48 }
  0xc2   : > { %v723_v4 = vrot.slane %v713_v62, 1  ;;  %v433_v17 = vrot.slane %v424_v5, 5  ;;  %v442_v18 = vld [vmem:[#allocation2 + $0x52] sm:$0x1]  ;;  %v732_v21 = vld [vmem:[#allocation2 + $0x51] sm:$0x1] }
  0xc3   : > { %v1019_v14 = vsel %vm267_vm7, %v1018_v2, %v1017_v7  ;;  %v451_v32 = vrot.slane %v442_v18, 5  ;;  %v1331_v36 = vsel %vm563_vm4, %v1330_v16, %v1329_v30  ;;  %v742_v38 = vrot.slane %v732_v21, 1  ;;  %v751_v39 = vld [vmem:[#allocation2 + $0x52] sm:$0x1]  ;;  %v1027_v41 = vld [vmem:[#allocation2 + $0x51] sm:$0x1] }
  0xc4   : > { %v724_v15 = vsel %vm563_vm4, %v723_v4, %v722_v8  ;;  %1020 = vrot.lane.b32.xlu1 %v1019_v14, %s4343_s6  ;;  %v434_v37 = vsel %vm267_vm7, %v433_v17, %v432_v31  ;;  %v757_v40 = vrot.slane %v749_v22, 3  ;;  %v759_v44 = vrot.slane %v750_v29, 2  ;;  %v1043_v45 = vld [vmem:[#allocation2 + $0x22] sm:$0x1]  ;;  %v1044_v46 = vld [vmem:[#allocation2 + $0x3a] sm:$0x1] }
  0xc5   : > { %725 = vrot.lane.b32.xlu0 %v724_v15, %s3315_s4  ;;  %v1032_v49 = vrot.slane %v1025_v34, 7  ;;  %v1045_v50 = vld [vmem:[#allocation2 + $0x52] sm:$0x1]  ;;  %v273_v51 = vld [vmem:[#allocation2 + $0x19] sm:$0x1]  ;;  %v452_v52 = vsel %vm267_vm7, %v451_v32, %v450_v47  ;;  %v761_v54 = vrot.slane %v751_v39, 1  ;;  %v743_v59 = vsel %vm563_vm4, %v742_v38, %v741_v53 }
  0xc6   : > { %v1034_v56 = vrot.slane %v1026_v35, 6  ;;  %v274_v57 = vld [vmem:[#allocation2 + $0x31] sm:$0x1]  ;;  %v275_v58 = vld [vmem:[#allocation2 + $0x49] sm:$0x1]  ;;  %v758_v60 = vsel %vm557_vm2, %v757_v40, %v756_v23  ;;  %v1036_v62 = vrot.slane %v1027_v41, 5 }
  0xc7   : > { %v1024_v61 = vld [vmem:[#allocation2 + $0x9] sm:$0x1]  ;;  %v1050_v43 = vrot.slane %v1043_v45, 7  ;;  %v760_v55 = vsel %vm560_vm3, %v759_v44, %v758_v60  ;;  %v1042_v63 = vld [vmem:[#allocation2 + $0xa] sm:$0x1]  ;;  %v1052_v0 = vrot.slane %v1044_v46, 6 }
  0xc8   : > { %1332 = vrot.lane.b32.xlu1 %v1331_v36, %s3317_s7  ;;  %v280_v1 = vrot.slane %v273_v51, 7  ;;  %v1336_v2 = vld [vmem:[#allocation2 + $0xb] sm:$0x1]  ;;  %v1337_v3 = vld [vmem:[#allocation2 + $0x23] sm:$0x1]  ;;  %v1033_v4 = vsel %vm261_vm5, %v1032_v49, %v1024_v61  ;;  %v1054_v5 = vrot.slane %v1045_v50, 5  ;;  %v762_v10 = vsel %vm563_vm4, %v761_v54, %v760_v55 }
  0xc9   : > { %435 = vrot.lane.b32.xlu0 %v434_v37, %s3317_s7  ;;  %v272_v6 = vld [vmem:[#allocation2 + $0x1] sm:$0x1]  ;;  %v282_v7 = vrot.slane %v274_v57, 6  ;;  %v284_v8 = vrot.slane %v275_v58, 5  ;;  %v1338_v9 = vld [vmem:[#allocation2 + $0x3b] sm:$0x1]  ;;  %v1035_v11 = vsel %vm264_vm6, %v1034_v56, %v1033_v4  ;;  %v1051_v16 = vsel %vm261_vm5, %v1050_v43, %v1042_v63 }
  0xca   : > { %v1339_v12 = vld [vmem:[#allocation2 + $0x53] sm:$0x1]  ;;  %v570_v13 = vld [vmem:[#allocation2 + $0x1] sm:$0x1]  ;;  %v571_v14 = vld [vmem:[#allocation2 + $0x19] sm:$0x1]  ;;  %v1037_v15 = vsel %vm267_vm7, %v1036_v62, %v1035_v11  ;;  %v1053_v21 = vsel %vm264_vm6, %v1052_v0, %v1051_v16  ;;  %v281_v22 = vsel %vm261_vm5, %v280_v1, %v272_v6 }
  0xcb   : > { %v1344_v17 = vrot.slane %v1336_v2, 4  ;;  %v1345_v18 = vrot.slane %v1337_v3, 3  ;;  %v572_v19 = vld [vmem:[#allocation2 + $0x31] sm:$0x1]  ;;  %v458_v20 = vld [vmem:[#allocation2 + $0x23] sm:$0x1]  ;;  %v1055_v26 = vsel %vm267_vm7, %v1054_v5, %v1053_v21  ;;  %v283_v27 = vsel %vm264_vm6, %v282_v7, %v281_v22 }
  0xcc   : > { %453 = vrot.lane.b32.xlu1 %v452_v52, %s3318_s8  ;;  %v573_v23 = vld [vmem:[#allocation2 + $0x49] sm:$0x1]  ;;  %v459_v24 = vld [vmem:[#allocation2 + $0x3b] sm:$0x1]  ;;  %v460_v25 = vld [vmem:[#allocation2 + $0x53] sm:$0x1]  ;;  %v285_v32 = vsel %vm267_vm7, %v284_v8, %v283_v27 }
  0xcd   : > { %744 = vrot.lane.b32.xlu0 %v743_v59, %s3319_s17  ;;  %v1347_v28 = vrot.slane %v1338_v9, 2  ;;  %v579_v29 = vrot.slane %v571_v14, 3  ;;  %v881_v30 = vld [vmem:[#allocation2 + $0x19] sm:$0x1]  ;;  %v882_v31 = vld [vmem:[#allocation2 + $0x31] sm:$0x1]  ;;  %v1346_v42 = vsel %vm557_vm2, %v1345_v18, %v1344_v17 }
  0xce   : > { %v1349_v33 = vrot.slane %v1339_v12, 1  ;;  %v581_v34 = vrot.slane %v572_v19, 2  ;;  %v465_v35 = vrot.slane %v458_v20, 7  ;;  %v578_v36 = vrot.slane %v570_v13, 4  ;;  %v457_v38 = vld [vmem:[#allocation2 + $0xb] sm:$0x1] }
  0xcf   : > { %v583_v37 = vrot.slane %v573_v23, 1  ;;  %v467_v39 = vrot.slane %v459_v24, 6  ;;  %v469_v40 = vrot.slane %v460_v25, 5  ;;  %v883_v41 = vld [vmem:[#allocation2 + $0x49] sm:$0x1]  ;;  %v888_v44 = vrot.slane %v881_v30, 7 }
  0xd0   : > { %763 = vrot.lane.b32.xlu1 %v762_v10, %s3320_s19  ;;  %v890_v45 = vrot.slane %v882_v31, 6  ;;  %v767_v46 = vld [vmem:[#allocation2 + $0xb] sm:$0x1]  ;;  %v768_v47 = vld [vmem:[#allocation2 + $0x23] sm:$0x1]  ;;  %v1348_v48 = vsel %vm560_vm3, %v1347_v28, %v1346_v42  ;;  %v580_v49 = vsel %vm557_vm2, %v579_v29, %v578_v36  ;;  %v466_v56 = vsel %vm261_vm5, %v465_v35, %v457_v38 }
  0xd1   : > { %1038 = vrot.lane.b32.xlu0 %v1037_v15, %s4347_s20  ;;  %v769_v50 = vld [vmem:[#allocation2 + $0x3b] sm:$0x1]  ;;  %v770_v51 = vld [vmem:[#allocation2 + $0x53] sm:$0x1]  ;;  %v1168_v52 = vld [vmem:[#allocation2 + $0x1a] sm:$0x1]  ;;  %v1350_v53 = vsel %vm563_vm4, %v1349_v33, %v1348_v48  ;;  %v582_v54 = vsel %vm560_vm3, %v581_v34, %v580_v49  ;;  %v468_v63 = vsel %vm264_vm6, %v467_v39, %v466_v56 }
  0xd2   : > { %v1167_v57 = vld [vmem:[#allocation2 + $0x2] sm:$0x1]  ;;  %v1169_v58 = vld [vmem:[#allocation2 + $0x32] sm:$0x1]  ;;  %v1170_v59 = vld [vmem:[#allocation2 + $0x4a] sm:$0x1]  ;;  %v584_v60 = vsel %vm563_vm4, %v583_v37, %v582_v54  ;;  %v470_v9 = vsel %vm267_vm7, %v469_v40, %v468_v63 }
  0xd3   : > { %v880_v61 = vld [vmem:[#allocation2 + $0x1] sm:$0x1]  ;;  %v892_v62 = vrot.slane %v883_v41, 5  ;;  %v775_v43 = vrot.slane %v767_v46, 4  ;;  %v776_v55 = vrot.slane %v768_v47, 3  ;;  %v778_v1 = vrot.slane %v769_v50, 2 }
  0xd4   : > { %1056 = vrot.lane.b32.xlu1 %v1055_v26, %s3322_s22  ;;  %v889_v0 = vsel %vm261_vm5, %v888_v44, %v880_v61  ;;  %v1176_v2 = vrot.slane %v1168_v52, 3  ;;  %v1061_v3 = vld [vmem:[#allocation2 + $0x23] sm:$0x1]  ;;  %v292_v4 = vld [vmem:[#allocation2 + $0x1a] sm:$0x1]  ;;  %v780_v5 = vrot.slane %v770_v51, 1 }
  0xd5   : > { %286 = vrot.lane.b32.xlu0 %v285_v32, %s3317_s7  ;;  %v1175_v6 = vrot.slane %v1167_v57, 4  ;;  %v1178_v7 = vrot.slane %v1169_v58, 2  ;;  %v1180_v8 = vrot.slane %v1170_v59, 1  ;;  %v891_v10 = vsel %vm264_vm6, %v890_v45, %v889_v0  ;;  %v1062_v11 = vld [vmem:[#allocation2 + $0x3b] sm:$0x1] }
  0xd6   : > { %v1063_v12 = vld [vmem:[#allocation2 + $0x53] sm:$0x1]  ;;  %v293_v13 = vld [vmem:[#allocation2 + $0x32] sm:$0x1]  ;;  %v893_v14 = vsel %vm267_vm7, %v892_v62, %v891_v10  ;;  %v777_v15 = vsel %vm557_vm2, %v776_v55, %v775_v43  ;;  %v1068_v16 = vrot.slane %v1061_v3, 7  ;;  %v299_v18 = vrot.slane %v292_v4, 7 }
  0xd7   : > { %v294_v17 = vld [vmem:[#allocation2 + $0x4a] sm:$0x1]  ;;  %v1355_v19 = vld [vmem:[#allocation2 + $0xc] sm:$0x1]  ;;  %v779_v20 = vsel %vm560_vm3, %v778_v1, %v777_v15  ;;  %v1177_v21 = vsel %vm557_vm2, %v1176_v2, %v1175_v6  ;;  %v1356_v22 = vld [vmem:[#allocation2 + $0x24] sm:$0x1] }
  0xd8   : > { %1351 = vrot.lane.b32.xlu1 %v1350_v53, %s3318_s8  ;;  %v1357_v23 = vld [vmem:[#allocation2 + $0x3c] sm:$0x1]  ;;  %v3575_v24 = vld [vmem:[#allocation2 + $0x54] sm:$0x1]  ;;  %v781_v25 = vsel %vm563_vm4, %v780_v5, %v779_v20  ;;  %v1179_v26 = vsel %vm560_vm3, %v1178_v7, %v1177_v21  ;;  %v590_v27 = vld [vmem:[#allocation2 + $0x2] sm:$0x1] }
  0xd9   : > { %585 = vrot.lane.b32.xlu0 %v584_v60, %s3319_s17  ;;  %v591_v28 = vld [vmem:[#allocation2 + $0x1a] sm:$0x1]  ;;  %v592_v29 = vld [vmem:[#allocation2 + $0x32] sm:$0x1]  ;;  %v1181_v30 = vsel %vm563_vm4, %v1180_v8, %v1179_v26  ;;  %v1060_v31 = vld [vmem:[#allocation2 + $0xb] sm:$0x1] }
  0xda   : > { %v1070_v32 = vrot.slane %v1062_v11, 6  ;;  %v1072_v33 = vrot.slane %v1063_v12, 5  ;;  %v291_v34 = vld [vmem:[#allocation2 + $0x2] sm:$0x1]  ;;  %v301_v35 = vrot.slane %v293_v13, 6  ;;  %v303_v36 = vrot.slane %v294_v17, 5 }
  0xdb   : > { %v1363_v37 = vrot.slane %v1355_v19, 4  ;;  %v1364_v38 = vrot.slane %v1356_v22, 3  ;;  %v1366_v39 = vrot.slane %v1357_v23, 2  ;;  %v593_v40 = vld [vmem:[#allocation2 + $0x4a] sm:$0x1]  ;;  %v1368_v41 = vrot.slane %v3575_v24, 1 }
  0xdc   : > { %471 = vrot.lane.b32.xlu1 %v470_v9, %s3323_s26  ;;  %v598_v42 = vrot.slane %v590_v27, 4  ;;  %v599_v44 = vrot.slane %v591_v28, 3  ;;  %v601_v45 = vrot.slane %v592_v29, 2  ;;  %v476_v46 = vld [vmem:[#allocation2 + $0x24] sm:$0x1]  ;;  %v1069_v47 = vsel %vm261_vm5, %v1068_v16, %v1060_v31 }
  0xdd   : > { %894 = vrot.lane.b32.xlu0 %v893_v14, %s4347_s20  ;;  %v300_v48 = vsel %vm261_vm5, %v299_v18, %v291_v34  ;;  %v477_v49 = vld [vmem:[#allocation2 + $0x3c] sm:$0x1]  ;;  %v478_v50 = vld [vmem:[#allocation2 + $0x54] sm:$0x1]  ;;  %v899_v51 = vld [vmem:[#allocation2 + $0x1a] sm:$0x1]  ;;  %v1071_v52 = vsel %vm264_vm6, %v1070_v32, %v1069_v47  ;;  %v1365_v55 = vsel %vm557_vm2, %v1364_v38, %v1363_v37 }
  0xde   : > { %v302_v53 = vsel %vm264_vm6, %v301_v35, %v300_v48  ;;  %v900_v54 = vld [vmem:[#allocation2 + $0x32] sm:$0x1]  ;;  %v901_v56 = vld [vmem:[#allocation2 + $0x4a] sm:$0x1]  ;;  %v3587_v57 = vld [vmem:[#allocation2 + $0xc] sm:$0x1]  ;;  %v1073_v58 = vsel %vm267_vm7, %v1072_v33, %v1071_v52  ;;  %v600_v63 = vsel %vm557_vm2, %v599_v44, %v598_v42  ;;  %v1367_v9 = vsel %vm560_vm3, %v1366_v39, %v1365_v55 }
  0xdf   : > { %v304_v59 = vsel %vm267_vm7, %v303_v36, %v302_v53  ;;  %v603_v60 = vrot.slane %v593_v40, 1  ;;  %v483_v61 = vrot.slane %v476_v46, 7  ;;  %v787_v62 = vld [vmem:[#allocation2 + $0x24] sm:$0x1]  ;;  %v3591_v43 = vld [vmem:[#allocation2 + $0x3c] sm:$0x1]  ;;  %v602_v10 = vsel %vm560_vm3, %v601_v45, %v600_v63 }
  0xe0   : > { %782 = vrot.lane.b32.xlu1 %v781_v25, %s3324_s27  ;;  %v475_v0 = vld [vmem:[#allocation2 + $0xc] sm:$0x1]  ;;  %v485_v1 = vrot.slane %v477_v49, 6  ;;  %v906_v2 = vrot.slane %v899_v51, 7  ;;  %v487_v3 = vrot.slane %v478_v50, 5  ;;  %v908_v5 = vrot.slane %v900_v54, 6 }
  0xe1   : > { %1182 = vrot.lane.b32.xlu0 %v1181_v30, %s3317_s7  ;;  %v898_v4 = vld [vmem:[#allocation2 + $0x2] sm:$0x1]  ;;  %v910_v6 = vrot.slane %v901_v56, 5  ;;  %v789_v7 = vld [vmem:[#allocation2 + $0x54] sm:$0x1]  ;;  %v794_v8 = vrot.slane %v3587_v57, 4  ;;  %v1369_v15 = vsel %vm563_vm4, %v1368_v41, %v1367_v9  ;;  %v604_v16 = vsel %vm563_vm4, %v603_v60, %v602_v10 }
  0xe2   : > { %v795_v11 = vrot.slane %v787_v62, 3  ;;  %v797_v12 = vrot.slane %v3591_v43, 2  ;;  %v1186_v13 = vld [vmem:[#allocation2 + $0x3] sm:$0x1]  ;;  %v1187_v14 = vld [vmem:[#allocation2 + $0x1b] sm:$0x1]  ;;  %v484_v17 = vsel %vm261_vm5, %v483_v61, %v475_v0  ;;  %v907_v22 = vsel %vm261_vm5, %v906_v2, %v898_v4 }
  0xe3   : > { %v1188_v18 = vld [vmem:[#allocation2 + $0x33] sm:$0x1]  ;;  %v1189_v19 = vld [vmem:[#allocation2 + $0x4b] sm:$0x1]  ;;  %v1079_v20 = vld [vmem:[#allocation2 + $0x24] sm:$0x1]  ;;  %v486_v21 = vsel %vm264_vm6, %v485_v1, %v484_v17  ;;  %v909_v27 = vsel %vm264_vm6, %v908_v5, %v907_v22 }
  0xe4   : > { %1074 = vrot.lane.b32.xlu1 %v1073_v58, %s3325_s28  ;;  %v1080_v23 = vld [vmem:[#allocation2 + $0x3c] sm:$0x1]  ;;  %v1081_v24 = vld [vmem:[#allocation2 + $0x54] sm:$0x1]  ;;  %v311_v25 = vld [vmem:[#allocation2 + $0x1b] sm:$0x1]  ;;  %v488_v26 = vsel %vm267_vm7, %v487_v3, %v486_v21  ;;  %v911_v32 = vsel %vm267_vm7, %v910_v6, %v909_v27  ;;  %v796_v45 = vsel %vm557_vm2, %v795_v11, %v794_v8 }
  0xe5   : > { %305 = vrot.lane.b32.xlu0 %v304_v59, %s3318_s8  ;;  %v799_v28 = vrot.slane %v789_v7, 1  ;;  %v1195_v29 = vrot.slane %v1187_v14, 3  ;;  %v312_v30 = vld [vmem:[#allocation2 + $0x33] sm:$0x1]  ;;  %v313_v31 = vld [vmem:[#allocation2 + $0x4b] sm:$0x1]  ;;  %v798_v52 = vsel %vm560_vm3, %v797_v12, %v796_v45 }
  0xe6   : > { %v1194_v33 = vrot.slane %v1186_v13, 4  ;;  %v1197_v34 = vrot.slane %v1188_v18, 2  ;;  %v1199_v35 = vrot.slane %v1189_v19, 1  ;;  %v1086_v36 = vrot.slane %v1079_v20, 7  ;;  %v1374_v42 = vld [vmem:[#allocation2 + $0xd] sm:$0x1] }
  0xe7   : > { %v1088_v37 = vrot.slane %v1080_v23, 6  ;;  %v1090_v38 = vrot.slane %v1081_v24, 5  ;;  %v318_v39 = vrot.slane %v311_v25, 7  ;;  %v320_v40 = vrot.slane %v312_v30, 6  ;;  %v1375_v44 = vld [vmem:[#allocation2 + $0x25] sm:$0x1] }
  0xe8   : > { %1370 = vrot.lane.b32.xlu1 %v1369_v15, %s3323_s26  ;;  %v322_v41 = vrot.slane %v313_v31, 5  ;;  %v1196_v46 = vsel %vm557_vm2, %v1195_v29, %v1194_v33  ;;  %v1078_v47 = vld [vmem:[#allocation2 + $0xc] sm:$0x1]  ;;  %v310_v48 = vld [vmem:[#allocation2 + $0x3] sm:$0x1]  ;;  %v800_v58 = vsel %vm563_vm4, %v799_v28, %v798_v52  ;;  %v1382_v60 = vrot.slane %v1374_v42, 4 }
  0xe9   : > { %605 = vrot.lane.b32.xlu0 %v604_v16, %s3320_s19  ;;  %v1376_v49 = vld [vmem:[#allocation2 + $0x3d] sm:$0x1]  ;;  %v1377_v50 = vld [vmem:[#allocation2 + $0x55] sm:$0x1]  ;;  %v611_v51 = vld [vmem:[#allocation2 + $0x1b] sm:$0x1]  ;;  %v1198_v53 = vsel %vm560_vm3, %v1197_v34, %v1196_v46  ;;  %v1087_v55 = vsel %vm261_vm5, %v1086_v36, %v1078_v47  ;;  %v319_v63 = vsel %vm261_vm5, %v318_v39, %v310_v48 }
  0xea   : > { %v610_v54 = vld [vmem:[#allocation2 + $0x3] sm:$0x1]  ;;  %v612_v56 = vld [vmem:[#allocation2 + $0x33] sm:$0x1]  ;;  %v613_v57 = vld [vmem:[#allocation2 + $0x4b] sm:$0x1]  ;;  %v1200_v59 = vsel %vm563_vm4, %v1199_v35, %v1198_v53  ;;  %v1089_v7 = vsel %vm264_vm6, %v1088_v37, %v1087_v55  ;;  %v321_v8 = vsel %vm264_vm6, %v320_v40, %v319_v63 }
  0xeb   : > { %v1383_v61 = vrot.slane %v1375_v44, 3  ;;  %v1890_v62 = vld [vmem:[#allocation2 + $0x9] sm:$0x1]  ;;  %v1891_v43 = vld [vmem:[#allocation2 + $0x21] sm:$0x1]  ;;  %v1385_v0 = vrot.slane %v1376_v49, 2  ;;  %v1091_v13 = vsel %vm267_vm7, %v1090_v38, %v1089_v7  ;;  %v323_v14 = vsel %vm267_vm7, %v322_v41, %v321_v8 }
  0xec   : > { %489 = vrot.lane.b32.xlu1 %v488_v26, %s4345_s29  ;;  %v619_v1 = vrot.slane %v611_v51, 3  ;;  %v1387_v2 = vrot.slane %v1377_v50, 1  ;;  %v618_v3 = vrot.slane %v610_v54, 4  ;;  %v621_v4 = vrot.slane %v612_v56, 2  ;;  %v1892_v6 = vld [vmem:[#allocation2 + $0x39] sm:$0x1] }
  0xed   : > { %912 = vrot.lane.b32.xlu0 %v911_v32, %s3322_s22  ;;  %v623_v5 = vrot.slane %v613_v57, 1  ;;  %v1893_v9 = vld [vmem:[#allocation2 + $0x51] sm:$0x1]  ;;  %v1898_v10 = vrot.slane %v1890_v62, 4  ;;  %v1899_v11 = vrot.slane %v1891_v43, 3  ;;  %v1384_v15 = vsel %vm557_vm2, %v1383_v61, %v1382_v60 }
  0xee   : > { %v917_v12 = vld [vmem:[#allocation2 + $0x1b] sm:$0x1]  ;;  %v918_v16 = vld [vmem:[#allocation2 + $0x33] sm:$0x1]  ;;  %v919_v17 = vld [vmem:[#allocation2 + $0x4b] sm:$0x1]  ;;  %v1386_v19 = vsel %vm560_vm3, %v1385_v0, %v1384_v15  ;;  %v620_v20 = vsel %vm557_vm2, %v619_v1, %v618_v3 }
  0xef   : > { %v330_v18 = vld [vmem:[#allocation2 + $0x1c] sm:$0x1]  ;;  %v331_v21 = vld [vmem:[#allocation2 + $0x34] sm:$0x1]  ;;  %v332_v22 = vld [vmem:[#allocation2 + $0x4c] sm:$0x1]  ;;  %v1388_v24 = vsel %vm563_vm4, %v1387_v2, %v1386_v19  ;;  %v622_v25 = vsel %vm560_vm3, %v621_v4, %v620_v20  ;;  %v1900_v40 = vsel %vm557_vm2, %v1899_v11, %v1898_v10 }
  0xf0   : > { %801 = vrot.lane.b32.xlu1 %v800_v58, %s3327_s30  ;;  %v1206_v23 = vld [vmem:[#allocation2 + $0x1c] sm:$0x1]  ;;  %v1901_v26 = vrot.slane %v1892_v6, 2  ;;  %v924_v27 = vrot.slane %v917_v12, 7  ;;  %v1205_v28 = vld [vmem:[#allocation2 + $0x4] sm:$0x1]  ;;  %v624_v30 = vsel %vm563_vm4, %v623_v5, %v622_v25 }
  0xf1   : > { %1201 = vrot.lane.b32.xlu0 %v1200_v59, %s3318_s8  ;;  %v1207_v29 = vld [vmem:[#allocation2 + $0x34] sm:$0x1]  ;;  %v1903_v31 = vrot.slane %v1893_v9, 1  ;;  %v916_v32 = vld [vmem:[#allocation2 + $0x3] sm:$0x1]  ;;  %v926_v33 = vrot.slane %v918_v16, 6 }
  0xf2   : > { %v928_v34 = vrot.slane %v919_v17, 5  ;;  %v337_v35 = vrot.slane %v330_v18, 7  ;;  %v339_v36 = vrot.slane %v331_v21, 6  ;;  %v341_v37 = vrot.slane %v332_v22, 5  ;;  %v1208_v38 = vld [vmem:[#allocation2 + $0x4c] sm:$0x1] }
  0xf3   : > { %v1214_v39 = vrot.slane %v1206_v23, 3  ;;  %v329_v41 = vld [vmem:[#allocation2 + $0x4] sm:$0x1]  ;;  %v1213_v42 = vrot.slane %v1205_v28, 4  ;;  %v1216_v44 = vrot.slane %v1207_v29, 2  ;;  %v1902_v47 = vsel %vm560_vm3, %v1901_v26, %v1900_v40 }
  0xf4   : > { %1092 = vrot.lane.b32.xlu1 %v1091_v13, %s3328_s9  ;;  %v630_v45 = vld [vmem:[#allocation2 + $0x4] sm:$0x1]  ;;  %v631_v46 = vld [vmem:[#allocation2 + $0x1c] sm:$0x1]  ;;  %v925_v48 = vsel %vm261_vm5, %v924_v27, %v916_v32  ;;  %v632_v49 = vld [vmem:[#allocation2 + $0x34] sm:$0x1]  ;;  %v1904_v52 = vsel %vm563_vm4, %v1903_v31, %v1902_v47  ;;  %v338_v59 = vsel %vm261_vm5, %v337_v35, %v329_v41 }
  0xf5   : > { %324 = vrot.lane.b32.xlu0 %v323_v14, %s3323_s26  ;;  %v633_v50 = vld [vmem:[#allocation2 + $0x4c] sm:$0x1]  ;;  %v1595_v51 = vld [vmem:[#allocation2 + $0x21] sm:$0x1]  ;;  %v927_v53 = vsel %vm264_vm6, %v926_v33, %v925_v48  ;;  %v1596_v54 = vld [vmem:[#allocation2 + $0x39] sm:$0x1]  ;;  %v1215_v60 = vsel %vm557_vm2, %v1214_v39, %v1213_v42  ;;  %v340_v7 = vsel %vm264_vm6, %v339_v36, %v338_v59 }
  0xf6   : > { %v1597_v56 = vld [vmem:[#allocation2 + $0x51] sm:$0x1]  ;;  %v935_v57 = vld [vmem:[#allocation2 + $0x1c] sm:$0x1]  ;;  %v929_v58 = vsel %vm267_vm7, %v928_v34, %v927_v53  ;;  %v1218_v61 = vrot.slane %v1208_v38, 1  ;;  %v638_v55 = vrot.slane %v630_v45, 4  ;;  %v1217_v8 = vsel %vm560_vm3, %v1216_v44, %v1215_v60 }
  0xf7   : > { %v3645_v62 = vld [vmem:[#allocation2 + $0x34] sm:$0x1]  ;;  %v3647_v43 = vld [vmem:[#allocation2 + $0x4c] sm:$0x1]  ;;  %v639_v63 = vrot.slane %v631_v46, 3  ;;  %v641_v0 = vrot.slane %v632_v49, 2  ;;  %v342_v13 = vsel %vm267_vm7, %v341_v37, %v340_v7 }
  0xf8   : > { %1389 = vrot.lane.b32.xlu1 %v1388_v24, %s4345_s29  ;;  %v1602_v1 = vrot.slane %v1595_v51, 7  ;;  %v643_v2 = vrot.slane %v633_v50, 1  ;;  %v1594_v3 = vld [vmem:[#allocation2 + $0x9] sm:$0x1]  ;;  %v1604_v4 = vrot.slane %v1596_v54, 6  ;;  %v1606_v5 = vrot.slane %v1597_v56, 5 }
  0xf9   : > { %625 = vrot.lane.b32.xlu0 %v624_v30, %s3324_s27  ;;  %v942_v6 = vrot.slane %v935_v57, 7  ;;  %v944_v9 = vrot.slane %v3645_v62, 6  ;;  %v946_v10 = vrot.slane %v3647_v43, 5  ;;  %v2478_v11 = vld [vmem:[#allocation2 + $0xa] sm:$0x1]  ;;  %v1219_v14 = vsel %vm563_vm4, %v1218_v61, %v1217_v8 }
  0xfa   : > { %v2479_v12 = vld [vmem:[#allocation2 + $0x22] sm:$0x1]  ;;  %v2480_v15 = vld [vmem:[#allocation2 + $0x3a] sm:$0x1]  ;;  %v2481_v16 = vld [vmem:[#allocation2 + $0x52] sm:$0x1]  ;;  %v640_v18 = vsel %vm557_vm2, %v639_v63, %v638_v55  ;;  %v1603_v19 = vsel %vm261_vm5, %v1602_v1, %v1594_v3 }
  0xfb   : > { %v1224_v17 = vld [vmem:[#allocation2 + $0x5] sm:$0x1]  ;;  %v1225_v20 = vld [vmem:[#allocation2 + $0x1d] sm:$0x1]  ;;  %v1226_v21 = vld [vmem:[#allocation2 + $0x35] sm:$0x1]  ;;  %v642_v23 = vsel %vm560_vm3, %v641_v0, %v640_v18  ;;  %v1605_v24 = vsel %vm264_vm6, %v1604_v4, %v1603_v19 }
  0xfc   : > { %1905 = vrot.lane.b32.xlu1 %v1904_v52, %s4343_s6  ;;  %v494_v22 = vld [vmem:[#allocation2 + $0x25] sm:$0x1]  ;;  %v2486_v25 = vrot.slane %v2478_v11, 4  ;;  %v2487_v26 = vrot.slane %v2479_v12, 3  ;;  %v1227_v27 = vld [vmem:[#allocation2 + $0x4d] sm:$0x1]  ;;  %v644_v29 = vsel %vm563_vm4, %v643_v2, %v642_v23  ;;  %v1607_v30 = vsel %vm267_vm7, %v1606_v5, %v1605_v24 }
  0xfd   : > { %930 = vrot.lane.b32.xlu0 %v929_v58, %s3325_s28  ;;  %v495_v28 = vld [vmem:[#allocation2 + $0x3d] sm:$0x1]  ;;  %v2489_v31 = vrot.slane %v2480_v15, 2  ;;  %v2491_v32 = vrot.slane %v2481_v16, 1  ;;  %v496_v33 = vld [vmem:[#allocation2 + $0x55] sm:$0x1] }
  0xfe   : > { %v1451_v34 = vld [vmem:[#allocation2 + $0x19] sm:$0x1]  ;;  %v934_v35 = vld [vmem:[#allocation2 + $0x4] sm:$0x1]  ;;  %v1232_v36 = vrot.slane %v1224_v17, 4  ;;  %v1233_v37 = vrot.slane %v1225_v20, 3  ;;  %v2488_v47 = vsel %vm557_vm2, %v2487_v26, %v2486_v25 }
  0xff   : > { %v1235_v38 = vrot.slane %v1226_v21, 2  ;;  %v501_v39 = vrot.slane %v494_v22, 7  ;;  %v1237_v40 = vrot.slane %v1227_v27, 1  ;;  %v493_v41 = vld [vmem:[#allocation2 + $0xd] sm:$0x1]  ;;  %v503_v42 = vrot.slane %v495_v28, 6 }
 0x100   : > { %343 = vrot.lane.b32.xlu1 %v342_v13, %s4345_s29  ;;  %v1452_v44 = vld [vmem:[#allocation2 + $0x31] sm:$0x1]  ;;  %v1453_v45 = vld [vmem:[#allocation2 + $0x49] sm:$0x1]  ;;  %v943_v46 = vsel %vm261_vm5, %v942_v6, %v934_v35  ;;  %v505_v48 = vrot.slane %v496_v33, 5  ;;  %v1458_v49 = vrot.slane %v1451_v34, 7  ;;  %v2490_v53 = vsel %vm560_vm3, %v2489_v31, %v2488_v47 }
 0x101   : > { %1220 = vrot.lane.b32.xlu0 %v1219_v14, %s3323_s26  ;;  %v805_v50 = vld [vmem:[#allocation2 + $0xd] sm:$0x1]  ;;  %v806_v51 = vld [vmem:[#allocation2 + $0x25] sm:$0x1]  ;;  %v945_v52 = vsel %vm264_vm6, %v944_v9, %v943_v46  ;;  %v807_v54 = vld [vmem:[#allocation2 + $0x3d] sm:$0x1]  ;;  %v2492_v59 = vsel %vm563_vm4, %v2491_v32, %v2490_v53  ;;  %v1234_v60 = vsel %vm557_vm2, %v1233_v37, %v1232_v36  ;;  %v502_v61 = vsel %vm261_vm5, %v501_v39, %v493_v41 }
 0x102   : > { %v808_v56 = vld [vmem:[#allocation2 + $0x55] sm:$0x1]  ;;  %v1738_v57 = vld [vmem:[#allocation2 + $0x1] sm:$0x1]  ;;  %v947_v58 = vsel %vm267_vm7, %v946_v10, %v945_v52  ;;  %v1739_v62 = vld [vmem:[#allocation2 + $0x19] sm:$0x1]  ;;  %v1236_v63 = vsel %vm560_vm3, %v1235_v38, %v1234_v60  ;;  %v504_v0 = vsel %vm264_vm6, %v503_v42, %v502_v61 }
 0x103   : > { %v3675_v43 = vld [vmem:[#allocation2 + $0x31] sm:$0x1]  ;;  %v3677_v55 = vld [vmem:[#allocation2 + $0x49] sm:$0x1]  ;;  %v813_v1 = vrot.slane %v805_v50, 4  ;;  %v814_v2 = vrot.slane %v806_v51, 3  ;;  %v1238_v14 = vsel %vm563_vm4, %v1237_v40, %v1236_v63  ;;  %v506_v15 = vsel %vm267_vm7, %v505_v48, %v504_v0 }
 0x104   : > { %645 = vrot.lane.b32.xlu1 %v644_v29, %s3327_s30  ;;  %v1097_v3 = vld [vmem:[#allocation2 + $0x25] sm:$0x1]  ;;  %v1098_v4 = vld [vmem:[#allocation2 + $0x3d] sm:$0x1]  ;;  %v1460_v5 = vrot.slane %v1452_v44, 6  ;;  %v1462_v6 = vrot.slane %v1453_v45, 5 }
 0x105   : > { %1608 = vrot.lane.b32.xlu0 %v1607_v30, %s3315_s4  ;;  %v816_v7 = vrot.slane %v807_v54, 2  ;;  %v818_v8 = vrot.slane %v808_v56, 1  ;;  %v1450_v9 = vld [vmem:[#allocation2 + $0x1] sm:$0x1]  ;;  %v1746_v10 = vrot.slane %v1738_v57, 4  ;;  %v1747_v11 = vrot.slane %v1739_v62, 3 }
 0x106   : > { %v1749_v12 = vrot.slane %v3675_v43, 2  ;;  %v1751_v13 = vrot.slane %v3677_v55, 1  ;;  %v1099_v16 = vld [vmem:[#allocation2 + $0x55] sm:$0x1]  ;;  %v1104_v17 = vrot.slane %v1097_v3, 7  ;;  %v1106_v18 = vrot.slane %v1098_v4, 6 }
 0x107   : > { %v2201_v19 = vld [vmem:[#allocation2 + $0x23] sm:$0x1]  ;;  %v1459_v20 = vsel %vm261_vm5, %v1458_v49, %v1450_v9  ;;  %v815_v21 = vsel %vm557_vm2, %v814_v2, %v813_v1  ;;  %v2202_v22 = vld [vmem:[#allocation2 + $0x3b] sm:$0x1]  ;;  %v1393_v23 = vld [vmem:[#allocation2 + $0xe] sm:$0x1]  ;;  %v1748_v32 = vsel %vm557_vm2, %v1747_v11, %v1746_v10 }
 0x108   : > { %948 = vrot.lane.b32.xlu1 %v947_v58, %s3328_s9  ;;  %v1394_v24 = vld [vmem:[#allocation2 + $0x26] sm:$0x1]  ;;  %v1461_v25 = vsel %vm264_vm6, %v1460_v5, %v1459_v20  ;;  %v817_v26 = vsel %vm560_vm3, %v816_v7, %v815_v21  ;;  %v2203_v27 = vld [vmem:[#allocation2 + $0x53] sm:$0x1]  ;;  %v1395_v28 = vld [vmem:[#allocation2 + $0x3e] sm:$0x1]  ;;  %v1750_v52 = vsel %vm560_vm3, %v1749_v12, %v1748_v32 }
 0x109   : > { %2493 = vrot.lane.b32.xlu0 %v2492_v59, %s3315_s4  ;;  %v1396_v29 = vld [vmem:[#allocation2 + $0x56] sm:$0x1]  ;;  %v1463_v30 = vsel %vm267_vm7, %v1462_v6, %v1461_v25  ;;  %v819_v31 = vsel %vm563_vm4, %v818_v8, %v817_v26  ;;  %v2497_v33 = vld [vmem:[#allocation2 + $0xb] sm:$0x1]  ;;  %v2498_v34 = vld [vmem:[#allocation2 + $0x23] sm:$0x1]  ;;  %v1752_v58 = vsel %vm563_vm4, %v1751_v13, %v1750_v52 }
 0x10a   : > { %v3696_v35 = vld [vmem:[#allocation2 + $0x3b] sm:$0x1]  ;;  %v1096_v36 = vld [vmem:[#allocation2 + $0xd] sm:$0x1]  ;;  %v1108_v37 = vrot.slane %v1099_v16, 5  ;;  %v2208_v38 = vrot.slane %v2201_v19, 7 }
 0x10b   : > { %v1401_v39 = vrot.slane %v1393_v23, 4  ;;  %v1402_v40 = vrot.slane %v1394_v24, 3  ;;  %v1105_v41 = vsel %vm261_vm5, %v1104_v17, %v1096_v36  ;;  %v2200_v42 = vld [vmem:[#allocation2 + $0xb] sm:$0x1]  ;;  %v2210_v44 = vrot.slane %v2202_v22, 6 }
 0x10c   : > { %1239 = vrot.lane.b32.xlu1 %v1238_v14, %s4345_s29  ;;  %v2212_v45 = vrot.slane %v2203_v27, 5  ;;  %v1404_v46 = vrot.slane %v1395_v28, 2  ;;  %v1406_v47 = vrot.slane %v1396_v29, 1  ;;  %v2500_v48 = vld [vmem:[#allocation2 + $0x53] sm:$0x1]  ;;  %v2505_v49 = vrot.slane %v2497_v33, 4 }
 0x10d   : > { %507 = vrot.lane.b32.xlu0 %v506_v15, %s3329_s10  ;;  %v2506_v50 = vrot.slane %v2498_v34, 3  ;;  %v2508_v51 = vrot.slane %v3696_v35, 2  ;;  %v1107_v53 = vsel %vm264_vm6, %v1106_v18, %v1105_v41  ;;  %v1613_v54 = vld [vmem:[#allocation2 + $0x22] sm:$0x1]  ;;  %v1614_v56 = vld [vmem:[#allocation2 + $0x3a] sm:$0x1]  ;;  %v2209_v60 = vsel %vm261_vm5, %v2208_v38, %v2200_v42 }
 0x10e   : > { %v1615_v57 = vld [vmem:[#allocation2 + $0x52] sm:$0x1]  ;;  %v1109_v59 = vsel %vm267_vm7, %v1108_v37, %v1107_v53  ;;  %v1403_v61 = vsel %vm557_vm2, %v1402_v40, %v1401_v39  ;;  %v512_v62 = vld [vmem:[#allocation2 + $0x26] sm:$0x1]  ;;  %v513_v43 = vld [vmem:[#allocation2 + $0x3e] sm:$0x1]  ;;  %v2211_v63 = vsel %vm264_vm6, %v2210_v44, %v2209_v60 }
 0x10f   : > { %v3708_v55 = vld [vmem:[#allocation2 + $0x56] sm:$0x1]  ;;  %v1405_v0 = vsel %vm560_vm3, %v1404_v46, %v1403_v61  ;;  %v1909_v1 = vld [vmem:[#allocation2 + $0xa] sm:$0x1]  ;;  %v1910_v2 = vld [vmem:[#allocation2 + $0x22] sm:$0x1]  ;;  %v2213_v8 = vsel %vm267_vm7, %v2212_v45, %v2211_v63  ;;  %v2507_v19 = vsel %vm557_vm2, %v2506_v50, %v2505_v49 }
 0x110   : > { %1464 = vrot.lane.b32.xlu1 %v1463_v30, %s3315_s4  ;;  %v1911_v3 = vld [vmem:[#allocation2 + $0x3a] sm:$0x1]  ;;  %v2510_v4 = vrot.slane %v2500_v48, 1  ;;  %v1620_v5 = vrot.slane %v1613_v54, 7  ;;  %v1622_v6 = vrot.slane %v1614_v56, 6  ;;  %v1624_v7 = vrot.slane %v1615_v57, 5 }
 0x111   : > { %820 = vrot.lane.b32.xlu0 %v819_v31, %s3330_s11  ;;  %v1407_v9 = vsel %vm563_vm4, %v1406_v47, %v1405_v0  ;;  %v519_v10 = vrot.slane %v512_v62, 7  ;;  %v521_v11 = vrot.slane %v513_v43, 6  ;;  %v1912_v12 = vld [vmem:[#allocation2 + $0x52] sm:$0x1]  ;;  %v824_v13 = vld [vmem:[#allocation2 + $0xe] sm:$0x1]  ;;  %v2509_v24 = vsel %vm560_vm3, %v2508_v51, %v2507_v19 }
 0x112   : > { %v1612_v14 = vld [vmem:[#allocation2 + $0xa] sm:$0x1]  ;;  %v523_v15 = vrot.slane %v3708_v55, 5  ;;  %v1917_v16 = vrot.slane %v1909_v1, 4  ;;  %v1918_v17 = vrot.slane %v1910_v2, 3  ;;  %v1920_v18 = vrot.slane %v1911_v3, 2 }
 0x113   : > { %v511_v20 = vld [vmem:[#allocation2 + $0xe] sm:$0x1]  ;;  %v825_v21 = vld [vmem:[#allocation2 + $0x26] sm:$0x1]  ;;  %v826_v22 = vld [vmem:[#allocation2 + $0x3e] sm:$0x1]  ;;  %v1621_v25 = vsel %vm261_vm5, %v1620_v5, %v1612_v14  ;;  %v2511_v30 = vsel %vm563_vm4, %v2510_v4, %v2509_v24 }
 0x114   : > { %1753 = vrot.lane.b32.xlu1 %v1752_v58, %s4343_s6  ;;  %v827_v23 = vld [vmem:[#allocation2 + $0x56] sm:$0x1]  ;;  %v1922_v26 = vrot.slane %v1912_v12, 1  ;;  %v832_v27 = vrot.slane %v824_v13, 4  ;;  %v2326_v28 = vld [vmem:[#allocation2 + $0x2] sm:$0x1]  ;;  %v1623_v31 = vsel %vm264_vm6, %v1622_v6, %v1621_v25  ;;  %v520_v36 = vsel %vm261_vm5, %v519_v10, %v511_v20 }
 0x115   : > { %1110 = vrot.lane.b32.xlu0 %v1109_v59, %s3331_s23  ;;  %v2327_v29 = vld [vmem:[#allocation2 + $0x1a] sm:$0x1]  ;;  %v2328_v32 = vld [vmem:[#allocation2 + $0x32] sm:$0x1]  ;;  %v2329_v33 = vld [vmem:[#allocation2 + $0x4a] sm:$0x1]  ;;  %v1625_v35 = vsel %vm267_vm7, %v1624_v7, %v1623_v31  ;;  %v522_v41 = vsel %vm264_vm6, %v521_v11, %v520_v36  ;;  %v1919_v42 = vsel %vm557_vm2, %v1918_v17, %v1917_v16 }
 0x116   : > { %v3724_v34 = vld [vmem:[#allocation2 + $0x26] sm:$0x1]  ;;  %v833_v37 = vrot.slane %v825_v21, 3  ;;  %v835_v38 = vrot.slane %v826_v22, 2  ;;  %v3728_v39 = vld [vmem:[#allocation2 + $0x3e] sm:$0x1]  ;;  %v524_v53 = vsel %vm267_vm7, %v523_v15, %v522_v41  ;;  %v1921_v54 = vsel %vm560_vm3, %v1920_v18, %v1919_v42 }
 0x117   : > { %v349_v40 = vld [vmem:[#allocation2 + $0x1d] sm:$0x1]  ;;  %v837_v44 = vrot.slane %v827_v23, 1  ;;  %v2335_v45 = vrot.slane %v2327_v29, 3  ;;  %v1412_v46 = vld [vmem:[#allocation2 + $0xf] sm:$0x1]  ;;  %v1923_v60 = vsel %vm563_vm4, %v1922_v26, %v1921_v54 }
 0x118   : > { %2214 = vrot.lane.b32.xlu1 %v2213_v8, %s3317_s7  ;;  %v1413_v47 = vld [vmem:[#allocation2 + $0x27] sm:$0x1]  ;;  %v2334_v48 = vrot.slane %v2326_v28, 4  ;;  %v2337_v49 = vrot.slane %v2328_v32, 2  ;;  %v2339_v50 = vrot.slane %v2329_v33, 1  ;;  %v1122_v52 = vrot.slane %v3724_v34, 7 }
 0x119   : > { %1408 = vrot.lane.b32.xlu0 %v1407_v9, %s3329_s10  ;;  %v1117_v51 = vld [vmem:[#allocation2 + $0x56] sm:$0x1]  ;;  %v1124_v56 = vrot.slane %v3728_v39, 6  ;;  %v350_v57 = vld [vmem:[#allocation2 + $0x35] sm:$0x1]  ;;  %v356_v59 = vrot.slane %v349_v40, 7  ;;  %v834_v61 = vsel %vm557_vm2, %v833_v37, %v832_v27 }
 0x11a   : > { %v351_v58 = vld [vmem:[#allocation2 + $0x4d] sm:$0x1]  ;;  %v1414_v62 = vld [vmem:[#allocation2 + $0x3f] sm:$0x1]  ;;  %v1415_v43 = vld [vmem:[#allocation2 + $0x57] sm:$0x1]  ;;  %v836_v0 = vsel %vm560_vm3, %v835_v38, %v834_v61  ;;  %v2336_v1 = vsel %vm557_vm2, %v2335_v45, %v2334_v48 }
 0x11b   : > { %v1420_v55 = vrot.slane %v1412_v46, 4  ;;  %v1421_v63 = vrot.slane %v1413_v47, 3  ;;  %s3332_s6 = smov 96   ;;  %v650_v2 = vld [vmem:[#allocation2 + $0x5] sm:$0x1]  ;;  %v838_v5 = vsel %vm563_vm4, %v837_v44, %v836_v0  ;;  %v2338_v6 = vsel %vm560_vm3, %v2337_v49, %v2336_v1  ;;  %s3333_s29 = smov 95  }
 0x11c   : > { %2512 = vrot.lane.b32.xlu1 %v2511_v30, %s3319_s17  ;;  %v651_v3 = vld [vmem:[#allocation2 + $0x1d] sm:$0x1]  ;;  %v652_v4 = vld [vmem:[#allocation2 + $0x35] sm:$0x1]  ;;  %v653_v7 = vld [vmem:[#allocation2 + $0x4d] sm:$0x1]  ;;  %v2340_v10 = vsel %vm563_vm4, %v2339_v50, %v2338_v6 }
 0x11d   : > { %1626 = vrot.lane.b32.xlu0 %v1625_v35, %s3319_s17  ;;  %v1631_v8 = vld [vmem:[#allocation2 + $0x23] sm:$0x1]  ;;  %v1632_v9 = vld [vmem:[#allocation2 + $0x3b] sm:$0x1]  ;;  %v1114_v11 = vld [vmem:[#allocation2 + $0xe] sm:$0x1]  ;;  %v1422_v27 = vsel %vm557_vm2, %v1421_v63, %v1420_v55 }
 0x11e   : > { %v1126_v12 = vrot.slane %v1117_v51, 5  ;;  %v358_v13 = vrot.slane %v350_v57, 6  ;;  %v1423_v14 = vrot.slane %v1414_v62, 2  ;;  %v348_v15 = vld [vmem:[#allocation2 + $0x5] sm:$0x1]  ;;  %v360_v16 = vrot.slane %v351_v58, 5 }
 0x11f   : > { %v1425_v17 = vrot.slane %v1415_v43, 1  ;;  %v658_v18 = vrot.slane %v650_v2, 4  ;;  %v659_v19 = vrot.slane %v651_v3, 3  ;;  %v661_v20 = vrot.slane %v652_v4, 2  ;;  %v1633_v22 = vld [vmem:[#allocation2 + $0x53] sm:$0x1] }
 0x120   : > { %525 = vrot.lane.b32.xlu1 %v524_v53, %s3332_s6  ;;  %v663_v21 = vrot.slane %v653_v7, 1  ;;  %v1638_v23 = vrot.slane %v1631_v8, 7  ;;  %v1640_v24 = vrot.slane %v1632_v9, 6  ;;  %v1123_v25 = vsel %vm261_vm5, %v1122_v52, %v1114_v11  ;;  %v1630_v28 = vld [vmem:[#allocation2 + $0xb] sm:$0x1] }
 0x121   : > { %1924 = vrot.lane.b32.xlu0 %v1923_v60, %s4347_s20  ;;  %v357_v26 = vsel %vm261_vm5, %v356_v59, %v348_v15  ;;  %v953_v29 = vld [vmem:[#allocation2 + $0x1d] sm:$0x1]  ;;  %v954_v30 = vld [vmem:[#allocation2 + $0x35] sm:$0x1]  ;;  %v955_v31 = vld [vmem:[#allocation2 + $0x4d] sm:$0x1]  ;;  %v1125_v32 = vsel %vm264_vm6, %v1124_v56, %v1123_v25  ;;  %v1424_v34 = vsel %vm560_vm3, %v1423_v14, %v1422_v27  ;;  %v660_v41 = vsel %vm557_vm2, %v659_v19, %v658_v18 }
 0x122   : > { %v359_v33 = vsel %vm264_vm6, %v358_v13, %v357_v26  ;;  %v1928_v35 = vld [vmem:[#allocation2 + $0xb] sm:$0x1]  ;;  %v1929_v36 = vld [vmem:[#allocation2 + $0x23] sm:$0x1]  ;;  %v1930_v37 = vld [vmem:[#allocation2 + $0x3b] sm:$0x1]  ;;  %v1127_v38 = vsel %vm267_vm7, %v1126_v12, %v1125_v32  ;;  %v1426_v40 = vsel %vm563_vm4, %v1425_v17, %v1424_v34  ;;  %v662_v46 = vsel %vm560_vm3, %v661_v20, %v660_v41 }
 0x123   : > { %v361_v39 = vsel %vm267_vm7, %v360_v16, %v359_v33  ;;  %v3759_v42 = vld [vmem:[#allocation2 + $0x53] sm:$0x1]  ;;  %v1243_v44 = vld [vmem:[#allocation2 + $0x6] sm:$0x1]  ;;  %v1244_v45 = vld [vmem:[#allocation2 + $0x1e] sm:$0x1]  ;;  %v1639_v47 = vsel %vm261_vm5, %v1638_v23, %v1630_v28  ;;  %v664_v62 = vsel %vm563_vm4, %v663_v21, %v662_v46 }
 0x124   : > { %839 = vrot.lane.b32.xlu1 %v838_v5, %s3333_s29  ;;  %v1642_v48 = vrot.slane %v1633_v22, 5  ;;  %v960_v49 = vrot.slane %v953_v29, 7  ;;  %v3765_v50 = vld [vmem:[#allocation2 + $0x36] sm:$0x1]  ;;  %v3767_v51 = vld [vmem:[#allocation2 + $0x4e] sm:$0x1]  ;;  %v1641_v43 = vsel %vm264_vm6, %v1640_v24, %v1639_v47 }
 0x125   : > { %2341 = vrot.lane.b32.xlu0 %v2340_v10, %s3315_s4  ;;  %s3334_s4 = smov 94   ;;  %v962_v52 = vrot.slane %v954_v30, 6  ;;  %v964_v53 = vrot.slane %v955_v31, 5  ;;  %v1936_v54 = vrot.slane %v1928_v35, 4  ;;  %v1937_v56 = vrot.slane %v1929_v36, 3 }
 0x126   : > { %v952_v57 = vld [vmem:[#allocation2 + $0x5] sm:$0x1]  ;;  %v1939_v58 = vrot.slane %v1930_v37, 2  ;;  %v1941_v59 = vrot.slane %v3759_v42, 1  ;;  %v1251_v60 = vrot.slane %v1243_v44, 4  ;;  %v1252_v61 = vrot.slane %v1244_v45, 3 }
 0x127   : > { %v1254_v55 = vrot.slane %v3765_v50, 2  ;;  %v1256_v63 = vrot.slane %v3767_v51, 1  ;;  %v3774_v0 = vld [vmem:[#allocation2 + $0x24] sm:$0x1]  ;;  %v3776_v1 = vld [vmem:[#allocation2 + $0x3c] sm:$0x1]  ;;  %v1643_v2 = vsel %vm267_vm7, %v1642_v48, %v1641_v43  ;;  %v961_v3 = vsel %vm261_vm5, %v960_v49, %v952_v57 }
 0x128   : > { %1128 = vrot.lane.b32.xlu1 %v1127_v38, %s3334_s4  ;;  %v3782_v4 = vld [vmem:[#allocation2 + $0x1a] sm:$0x1]  ;;  %v3784_v5 = vld [vmem:[#allocation2 + $0x32] sm:$0x1]  ;;  %v1300_v6 = vld [vmem:[#allocation2 + $0x9] sm:$0x1]  ;;  %v963_v8 = vsel %vm264_vm6, %v962_v52, %v961_v3  ;;  %v1938_v9 = vsel %vm557_vm2, %v1937_v56, %v1936_v54  ;;  %v1253_v26 = vsel %vm557_vm2, %v1252_v61, %v1251_v60 }
 0x129   : > { %362 = vrot.lane.b32.xlu0 %v361_v39, %s3329_s10  ;;  %v1301_v7 = vld [vmem:[#allocation2 + $0x21] sm:$0x1]  ;;  %v1302_v10 = vld [vmem:[#allocation2 + $0x39] sm:$0x1]  ;;  %v1303_v11 = vld [vmem:[#allocation2 + $0x51] sm:$0x1]  ;;  %v965_v14 = vsel %vm267_vm7, %v964_v53, %v963_v8  ;;  %v1940_v15 = vsel %vm560_vm3, %v1939_v58, %v1938_v9 }
 0x12a   : > { %v1308_v12 = vrot.slane %v1300_v6, 4  ;;  %v1309_v13 = vrot.slane %v1301_v7, 3  ;;  %v3790_v16 = vld [vmem:[#allocation2 + $0x54] sm:$0x1]  ;;  %v1311_v17 = vrot.slane %v1302_v10, 2  ;;  %v1313_v18 = vrot.slane %v1303_v11, 1 }
 0x12b   : > { %v406_v19 = vld [vmem:[#allocation2 + $0x20] sm:$0x1]  ;;  %v407_v20 = vld [vmem:[#allocation2 + $0x38] sm:$0x1]  ;;  %v2226_v21 = vrot.slane %v3774_v0, 7  ;;  %v2228_v27 = vrot.slane %v3776_v1, 6  ;;  %v1942_v39 = vsel %vm563_vm4, %v1941_v59, %v1940_v15 }
 0x12c   : > { %1427 = vrot.lane.b32.xlu1 %v1426_v40, %s3332_s6  ;;  %v1310_v22 = vsel %vm557_vm2, %v1309_v13, %v1308_v12  ;;  %v408_v23 = vld [vmem:[#allocation2 + $0x50] sm:$0x1]  ;;  %v413_v24 = vrot.slane %v406_v19, 7  ;;  %v415_v25 = vrot.slane %v407_v20, 6  ;;  %v1471_v28 = vld [vmem:[#allocation2 + $0x4a] sm:$0x1]  ;;  %v1255_v40 = vsel %vm560_vm3, %v1254_v55, %v1253_v26 }
 0x12d   : > { %665 = vrot.lane.b32.xlu0 %v664_v62, %s3330_s11  ;;  %v1312_v29 = vsel %vm560_vm3, %v1311_v17, %v1310_v22  ;;  %v417_v30 = vrot.slane %v408_v23, 5  ;;  %v405_v31 = vld [vmem:[#allocation2 + $0x8] sm:$0x1]  ;;  %v2218_v32 = vld [vmem:[#allocation2 + $0xc] sm:$0x1]  ;;  %v1476_v33 = vrot.slane %v3782_v4, 7  ;;  %v1257_v47 = vsel %vm563_vm4, %v1256_v63, %v1255_v40 }
 0x12e   : > { %v1478_v34 = vrot.slane %v3784_v5, 6  ;;  %v1314_v35 = vsel %vm563_vm4, %v1313_v18, %v1312_v29  ;;  %v414_v36 = vsel %vm261_vm5, %v413_v24, %v405_v31  ;;  %v2516_v37 = vld [vmem:[#allocation2 + $0xc] sm:$0x1]  ;;  %v2517_v38 = vld [vmem:[#allocation2 + $0x24] sm:$0x1]  ;;  %v2230_v48 = vrot.slane %v3790_v16, 5 }
 0x12f   : > { %v1468_v41 = vld [vmem:[#allocation2 + $0x2] sm:$0x1]  ;;  %1316 = vst.msk [vmem:[#allocation3 + $0x18] sm:$0xf0] %vm568_vm9, %v1314_v35  ;;  %v416_v42 = vsel %vm264_vm6, %v415_v25, %v414_v36  ;;  %v2518_v44 = vld [vmem:[#allocation2 + $0x3c] sm:$0x1]  ;;  %v2227_v53 = vsel %vm261_vm5, %v2226_v21, %v2218_v32 }
 0x130   : > { %1644 = vrot.lane.b32.xlu1 %v1643_v2, %s3320_s19  ;;  %v2519_v45 = vld [vmem:[#allocation2 + $0x54] sm:$0x1]  ;;  %v1758_v46 = vld [vmem:[#allocation2 + $0x1a] sm:$0x1]  ;;  %v1480_v49 = vrot.slane %v1471_v28, 5  ;;  %v418_v50 = vsel %vm267_vm7, %v417_v30, %v416_v42  ;;  %v2524_v54 = vrot.slane %v2516_v37, 4  ;;  %v1477_v59 = vsel %vm261_vm5, %v1476_v33, %v1468_v41 }
 0x131   : > { %966 = vrot.lane.b32.xlu0 %v965_v14, %s3331_s23  ;;  %v1757_v51 = vld [vmem:[#allocation2 + $0x2] sm:$0x1]  ;;  %v1759_v52 = vld [vmem:[#allocation2 + $0x32] sm:$0x1]  ;;  %420 = vst.msk [vmem:[#allocation3 + $0x8] sm:$0xf] %vm270_vm10, %v418_v50  ;;  %v2229_v0 = vsel %vm264_vm6, %v2228_v27, %v2227_v53  ;;  %v1479_v1 = vsel %vm264_vm6, %v1478_v34, %v1477_v59 }
 0x132   : > { %v2525_v56 = vrot.slane %v2517_v38, 3  ;;  %v1760_v57 = vld [vmem:[#allocation2 + $0x4a] sm:$0x1]  ;;  %v530_v58 = vld [vmem:[#allocation2 + $0x27] sm:$0x1]  ;;  %v2527_v60 = vrot.slane %v2518_v44, 2  ;;  %v2231_v6 = vsel %vm267_vm7, %v2230_v48, %v2229_v0  ;;  %v1481_v7 = vsel %vm267_vm7, %v1480_v49, %v1479_v1 }
 0x133   : > { %v2529_v61 = vrot.slane %v2519_v45, 1  ;;  %v1766_v62 = vrot.slane %v1758_v46, 3  ;;  %v531_v43 = vld [vmem:[#allocation2 + $0x3f] sm:$0x1]  ;;  %v1765_v2 = vrot.slane %v1757_v51, 4  ;;  %v1768_v3 = vrot.slane %v1759_v52, 2 }
 0x134   : > { %1943 = vrot.lane.b32.xlu1 %v1942_v39, %s3322_s22  ;;  %v532_v4 = vld [vmem:[#allocation2 + $0x57] sm:$0x1]  ;;  %v2059_v5 = vld [vmem:[#allocation2 + $0x1b] sm:$0x1]  ;;  %v1770_v8 = vrot.slane %v1760_v57, 1  ;;  %v537_v9 = vrot.slane %v530_v58, 7  ;;  %v2526_v12 = vsel %vm557_vm2, %v2525_v56, %v2524_v54 }
 0x135   : > { %1258 = vrot.lane.b32.xlu0 %v1257_v47, %s3329_s10  ;;  %v2060_v10 = vld [vmem:[#allocation2 + $0x33] sm:$0x1]  ;;  %v2061_v11 = vld [vmem:[#allocation2 + $0x4b] sm:$0x1]  ;;  %v529_v13 = vld [vmem:[#allocation2 + $0xf] sm:$0x1]  ;;  %v2528_v18 = vsel %vm560_vm3, %v2527_v60, %v2526_v12  ;;  %v1767_v19 = vsel %vm557_vm2, %v1766_v62, %v1765_v2 }
 0x136   : > { %v1021_v55 = vpop.permute.xlu1 %1020  ;;  %v539_v14 = vrot.slane %v531_v43, 6  ;;  %v2066_v15 = vrot.slane %v2059_v5, 7  ;;  %v843_v16 = vld [vmem:[#allocation2 + $0xf] sm:$0x1]  ;;  %v844_v17 = vld [vmem:[#allocation2 + $0x27] sm:$0x1]  ;;  %v2530_v26 = vsel %vm563_vm4, %v2529_v61, %v2528_v18  ;;  %v1769_v27 = vsel %vm560_vm3, %v1768_v3, %v1767_v19 }
 0x137   : > { %v726_v63 = vpop.permute.xlu0 %725  ;;  %1023 = vst.msk [vmem:[#allocation3 + $0x18] sm:$0xf] %vm270_vm10, %v1021_v55  ;;  %v541_v20 = vrot.slane %v532_v4, 5  ;;  %v2058_v21 = vld [vmem:[#allocation2 + $0x3] sm:$0x1]  ;;  %v2068_v22 = vrot.slane %v2060_v10, 6  ;;  %v1771_v32 = vsel %vm563_vm4, %v1770_v8, %v1769_v27  ;;  %v538_v33 = vsel %vm261_vm5, %v537_v9, %v529_v13 }
 0x138   : > { %728 = vst.msk [vmem:[#allocation3 + $0x8] sm:$0xf0] %vm568_vm9, %v726_v63  ;;  %2232 = vrot.lane.b32.xlu1 %v2231_v6, %s3318_s8  ;;  %v3826_v23 = vld [vmem:[#allocation2 + $0x3f] sm:$0x1]  ;;  %v2070_v28 = vrot.slane %v2061_v11, 5  ;;  %v851_v30 = vrot.slane %v843_v16, 4  ;;  %v540_v38 = vsel %vm264_vm6, %v539_v14, %v538_v33  ;;  %v2067_v39 = vsel %vm261_vm5, %v2066_v15, %v2058_v21 }
 0x139   : > { %1482 = vrot.lane.b32.xlu0 %v1481_v7, %s3319_s17  ;;  %v3830_v29 = vld [vmem:[#allocation2 + $0x57] sm:$0x1]  ;;  %v2346_v31 = vld [vmem:[#allocation2 + $0x1b] sm:$0x1]  ;;  %v852_v34 = vrot.slane %v844_v17, 3  ;;  %v854_v35 = vrot.slane %v3826_v23, 2  ;;  %v542_v44 = vsel %vm267_vm7, %v541_v20, %v540_v38  ;;  %v2069_v45 = vsel %vm264_vm6, %v2068_v22, %v2067_v39 }
 0x13a   : > { %v1333_v24 = vpop.permute.xlu1 %1332  ;;  %v2345_v36 = vld [vmem:[#allocation2 + $0x3] sm:$0x1]  ;;  %v2347_v37 = vld [vmem:[#allocation2 + $0x33] sm:$0x1]  ;;  %v2348_v40 = vld [vmem:[#allocation2 + $0x4b] sm:$0x1]  ;;  %v2071_v58 = vsel %vm267_vm7, %v2070_v28, %v2069_v45 }
 0x13b   : > { %v436_v25 = vpop.permute.xlu0 %435  ;;  %1335 = vst.msk [vmem:[#allocation3 + $0x18] sm:$0xf0] %vm588_vm11, %v1333_v24  ;;  %v252_v41 = vld [vmem:[#allocation2] sm:$0x1]  ;;  %v253_v42 = vld [vmem:[#allocation2 + $0x18] sm:$0x1]  ;;  %v853_v55 = vsel %vm557_vm2, %v852_v34, %v851_v30 }
 0x13c   : > { %438 = vst.msk [vmem:[#allocation3 + $0x8] sm:$0xf] %vm289_vm12, %v436_v25  ;;  %2531 = vrot.lane.b32.xlu1 %v2530_v26, %s3320_s19  ;;  %v2354_v46 = vrot.slane %v2346_v31, 3  ;;  %v254_v47 = vld [vmem:[#allocation2 + $0x30] sm:$0x1]  ;;  %v260_v49 = vrot.slane %v253_v42, 7  ;;  %v855_v12 = vsel %vm560_vm3, %v854_v35, %v853_v55 }
 0x13d   : > { %1772 = vrot.lane.b32.xlu0 %v1771_v32, %s4347_s20  ;;  %v255_v48 = vld [vmem:[#allocation2 + $0x48] sm:$0x1]  ;;  %v856_v52 = vrot.slane %v3830_v29, 1  ;;  %v2356_v53 = vrot.slane %v2347_v37, 2  ;;  %v263_v54 = vrot.slane %v254_v47, 6  ;;  %v2353_v59 = vrot.slane %v2345_v36, 4 }
 0x13e   : > { %v454_v50 = vpop.permute.xlu1 %453  ;;  %v266_v56 = vrot.slane %v255_v48, 5  ;;  %v1133_v57 = vld [vmem:[#allocation2 + $0x27] sm:$0x1]  ;;  %v2358_v60 = vrot.slane %v2348_v40, 1  ;;  %v262_v61 = vsel %vm261_vm5, %v260_v49, %v252_v41  ;;  %v1134_v62 = vld [vmem:[#allocation2 + $0x3f] sm:$0x1] }
 0x13f   : > { %v745_v51 = vpop.permute.xlu0 %744  ;;  %456 = vst.msk [vmem:[#allocation3 + $0x8] sm:$0xf] %vm308_vm13, %v454_v50  ;;  %v1135_v43 = vld [vmem:[#allocation2 + $0x57] sm:$0x1]  ;;  %s3335_s20 = smov 112   ;;  %v265_v63 = vsel %vm264_vm6, %v263_v54, %v262_v61  ;;  %v1140_v0 = vrot.slane %v1133_v57, 7  ;;  %v2355_v3 = vsel %vm557_vm2, %v2354_v46, %v2353_v59  ;;  %v857_v19 = vsel %vm563_vm4, %v856_v52, %v855_v12 }
 0x140   : > { %747 = vst.msk [vmem:[#allocation3 + $0x8] sm:$0xf0] %vm588_vm11, %v745_v51  ;;  %543 = vrot.lane.b32.xlu1 %v542_v44, %s3335_s20  ;;  %v1142_v1 = vrot.slane %v1134_v62, 6  ;;  %v368_v2 = vld [vmem:[#allocation2 + $0x1e] sm:$0x1]  ;;  %v268_v4 = vsel %vm267_vm7, %v266_v56, %v265_v63  ;;  %v1144_v6 = vrot.slane %v1135_v43, 5  ;;  %v2357_v13 = vsel %vm560_vm3, %v2356_v53, %v2355_v3 }
 0x141   : > { %2072 = vrot.lane.b32.xlu0 %v2071_v58, %s3317_s7  ;;  %v1132_v5 = vld [vmem:[#allocation2 + $0xf] sm:$0x1]  ;;  %v369_v7 = vld [vmem:[#allocation2 + $0x36] sm:$0x1]  ;;  %v370_v8 = vld [vmem:[#allocation2 + $0x4e] sm:$0x1]  ;;  %v2359_v20 = vsel %vm563_vm4, %v2358_v60, %v2357_v13 }
 0x142   : > { %v375_v9 = vrot.slane %v368_v2, 7  ;;  %v764_v10 = vpop.permute.xlu1 %763  ;;  %271 = vst.msk [vmem:[#allocation3] sm:$0xf] %vm270_vm10, %v268_v4  ;;  %v367_v14 = vld [vmem:[#allocation2 + $0x6] sm:$0x1]  ;;  %v377_v15 = vrot.slane %v369_v7, 6  ;;  %v1141_v25 = vsel %vm261_vm5, %v1140_v0, %v1132_v5 }
 0x143   : > { %v1039_v11 = vpop.permute.xlu0 %1038  ;;  %v379_v16 = vrot.slane %v370_v8, 5  ;;  %v1431_v17 = vld [vmem:[#allocation2 + $0x10] sm:$0x1]  ;;  %v1432_v18 = vld [vmem:[#allocation2 + $0x28] sm:$0x1]  ;;  %s3336_s7 = smov 111   ;;  %v1143_v29 = vsel %vm264_vm6, %v1142_v1, %v1141_v25 }
 0x144   : > { %766 = vst.msk [vmem:[#allocation3 + $0x8] sm:$0xf0] %vm608_vm14, %v764_v10  ;;  %v1433_v21 = vld [vmem:[#allocation2 + $0x40] sm:$0x1]  ;;  %v1434_v22 = vld [vmem:[#allocation2 + $0x58] sm:$0x1]  ;;  %858 = vrot.lane.b32.xlu1 %v857_v19, %s3336_s7  ;;  %v376_v30 = vsel %vm261_vm5, %v375_v9, %v367_v14  ;;  %v1145_v37 = vsel %vm267_vm7, %v1144_v6, %v1143_v29 }
 0x145   : > { %1041 = vst.msk [vmem:[#allocation3 + $0x18] sm:$0xf] %vm289_vm12, %v1039_v11  ;;  %v1439_v23 = vrot.slane %v1431_v17, 4  ;;  %v1440_v24 = vrot.slane %v1432_v18, 3  ;;  %2360 = vrot.lane.b32.xlu0 %v2359_v20, %s3319_s17  ;;  %v1442_v26 = vrot.slane %v1433_v21, 2  ;;  %v1444_v31 = vrot.slane %v1434_v22, 1 }
 0x146   : > { %v670_v27 = vld [vmem:[#allocation2 + $0x6] sm:$0x1]  ;;  %v671_v28 = vld [vmem:[#allocation2 + $0x1e] sm:$0x1]  ;;  %v672_v32 = vld [vmem:[#allocation2 + $0x36] sm:$0x1]  ;;  %v1057_v35 = vpop.permute.xlu1 %1056  ;;  %v378_v38 = vsel %vm264_vm6, %v377_v15, %v376_v30 }
 0x147   : > { %v673_v33 = vld [vmem:[#allocation2 + $0x4e] sm:$0x1]  ;;  %v679_v34 = vrot.slane %v671_v28, 3  ;;  %v287_v36 = vpop.permute.xlu0 %286  ;;  %v678_v39 = vrot.slane %v670_v27, 4  ;;  %v681_v40 = vrot.slane %v672_v32, 2  ;;  %v380_v42 = vsel %vm267_vm7, %v379_v16, %v378_v38  ;;  %s3337_s17 = smov 110  }
 0x148   : > { %v1649_v41 = vld [vmem:[#allocation2 + $0x24] sm:$0x1]  ;;  %1059 = vst.msk [vmem:[#allocation3 + $0x18] sm:$0xf] %vm308_vm13, %v1057_v35  ;;  %v1441_v44 = vsel %vm557_vm2, %v1440_v24, %v1439_v23  ;;  %v683_v45 = vrot.slane %v673_v33, 1  ;;  %1146 = vrot.lane.b32.xlu1 %v1145_v37, %s3337_s17  ;;  %vm4351_vm8 = vcmask 654852  }
 0x149   : > { %290 = vst.msk [vmem:[#allocation3] sm:$0xf] %vm289_vm12, %v287_v36  ;;  %v1650_v46 = vld [vmem:[#allocation2 + $0x3c] sm:$0x1]  ;;  %v1651_v47 = vld [vmem:[#allocation2 + $0x54] sm:$0x1]  ;;  %381 = vrot.lane.b32.xlu0 %v380_v42, %s3332_s6  ;;  %v1443_v49 = vsel %vm560_vm3, %v1442_v26, %v1441_v44  ;;  %v680_v56 = vsel %vm557_vm2, %v679_v34, %v678_v39 }
 0x14a   : > { %v1656_v48 = vrot.slane %v1649_v41, 7  ;;  %v1648_v50 = vld [vmem:[#allocation2 + $0xc] sm:$0x1]  ;;  %v1658_v51 = vrot.slane %v1650_v46, 6  ;;  %v1660_v52 = vrot.slane %v1651_v47, 5  ;;  %v1445_v54 = vsel %vm563_vm4, %v1444_v31, %v1443_v49  ;;  %v1352_v60 = vpop.permute.xlu1 %1351 }
 0x14b   : > { %v971_v53 = vld [vmem:[#allocation2 + $0x1e] sm:$0x1]  ;;  %v972_v57 = vld [vmem:[#allocation2 + $0x36] sm:$0x1]  ;;  %v973_v58 = vld [vmem:[#allocation2 + $0x4e] sm:$0x1]  ;;  %v586_v61 = vpop.permute.xlu0 %585  ;;  %v682_v62 = vsel %vm560_vm3, %v681_v40, %v680_v56 }
 0x14c   : > { %v978_v59 = vrot.slane %v971_v53, 7  ;;  %v1657_v43 = vsel %vm261_vm5, %v1656_v48, %v1648_v50  ;;  %v970_v55 = vld [vmem:[#allocation2 + $0x6] sm:$0x1]  ;;  %v980_v63 = vrot.slane %v972_v57, 6  ;;  %v982_v0 = vrot.slane %v973_v58, 5  ;;  %1446 = vrot.lane.b32.xlu1 %v1445_v54, %s3335_s20 }
 0x14d   : > { %v1150_v1 = vld [vmem:[#allocation2 + $0x1] sm:$0x1]  ;;  %v1151_v2 = vld [vmem:[#allocation2 + $0x19] sm:$0x1]  ;;  %1354 = vst.msk [vmem:[#allocation3 + $0x18] sm:$0xf0] %vm608_vm14, %v1352_v60  ;;  %v684_v3 = vsel %vm563_vm4, %v683_v45, %v682_v62  ;;  %v1659_v4 = vsel %vm264_vm6, %v1658_v51, %v1657_v43 }
 0x14e   : > { %589 = vst.msk [vmem:[#allocation3] sm:$0xf0] %vm588_vm11, %v586_v61  ;;  %v1152_v5 = vld [vmem:[#allocation2 + $0x31] sm:$0x1]  ;;  %v1153_v6 = vld [vmem:[#allocation2 + $0x49] sm:$0x1]  ;;  %685 = vrot.lane.b32.xlu0 %v684_v3, %s3333_s29  ;;  %v1661_v9 = vsel %vm267_vm7, %v1660_v52, %v1659_v4  ;;  %v979_v14 = vsel %vm261_vm5, %v978_v59, %v970_v55  ;;  %v472_v20 = vpop.permute.xlu1 %471 }
 0x14f   : > { %v1158_v7 = vrot.slane %v1150_v1, 4  ;;  %v1159_v8 = vrot.slane %v1151_v2, 3  ;;  %v1161_v10 = vrot.slane %v1152_v5, 2  ;;  %v1163_v11 = vrot.slane %v1153_v6, 1  ;;  %v1947_v12 = vld [vmem:[#allocation2 + $0xc] sm:$0x1]  ;;  %v895_v21 = vpop.permute.xlu0 %894 }
 0x150   : > { %v1948_v13 = vld [vmem:[#allocation2 + $0x24] sm:$0x1]  ;;  %v1949_v16 = vld [vmem:[#allocation2 + $0x3c] sm:$0x1]  ;;  %v1950_v17 = vld [vmem:[#allocation2 + $0x54] sm:$0x1]  ;;  %v981_v22 = vsel %vm264_vm6, %v980_v63, %v979_v14  ;;  %1662 = vrot.lane.b32.xlu1 %v1661_v9, %s3324_s27 }
 0x151   : > { %v1160_v15 = vsel %vm557_vm2, %v1159_v8, %v1158_v7  ;;  %v1955_v18 = vrot.slane %v1947_v12, 4  ;;  %v1956_v19 = vrot.slane %v1948_v13, 3  ;;  %v1958_v24 = vrot.slane %v1949_v16, 2  ;;  %v1262_v26 = vld [vmem:[#allocation2 + $0x7] sm:$0x1] }
 0x152   : > { %v1162_v23 = vsel %vm560_vm3, %v1161_v10, %v1160_v15  ;;  %v1960_v25 = vrot.slane %v1950_v17, 1  ;;  %v1263_v27 = vld [vmem:[#allocation2 + $0x1f] sm:$0x1]  ;;  %474 = vst.msk [vmem:[#allocation3 + $0x8] sm:$0xf] %vm4352_vm15, %v472_v20  ;;  %v983_v28 = vsel %vm267_vm7, %v982_v0, %v981_v22  ;;  %v1270_v32 = vrot.slane %v1262_v26, 4  ;;  %v783_v42 = vpop.permute.xlu1 %782 }
 0x153   : > { %897 = vst.msk [vmem:[#allocation3 + $0x10] sm:$0xf] %vm289_vm12, %v895_v21  ;;  %v1164_v29 = vsel %vm563_vm4, %v1163_v11, %v1162_v23  ;;  %v1264_v30 = vld [vmem:[#allocation2 + $0x37] sm:$0x1]  ;;  %v1265_v31 = vld [vmem:[#allocation2 + $0x4f] sm:$0x1]  ;;  %984 = vrot.lane.b32.xlu0 %v983_v28, %s3334_s4  ;;  %v1957_v37 = vsel %vm557_vm2, %v1956_v19, %v1955_v18  ;;  %v1183_v44 = vpop.permute.xlu0 %1182 }
 0x154   : > { %v1271_v33 = vrot.slane %v1263_v27, 3  ;;  %1166 = vst.msk [vmem:[#allocation3 + $0x10] sm:$0xf0] %vm568_vm9, %v1164_v29  ;;  %v1273_v34 = vrot.slane %v1264_v30, 2  ;;  %v1275_v35 = vrot.slane %v1265_v31, 1  ;;  %v1959_v45 = vsel %vm560_vm3, %v1958_v24, %v1957_v37 }
 0x155   : > { %v2237_v36 = vld [vmem:[#allocation2 + $0x25] sm:$0x1]  ;;  %v2238_v39 = vld [vmem:[#allocation2 + $0x3d] sm:$0x1]  ;;  %v2239_v40 = vld [vmem:[#allocation2 + $0x55] sm:$0x1]  ;;  %v1961_v51 = vsel %vm563_vm4, %v1960_v25, %v1959_v45 }
 0x156   : > { %v1272_v38 = vsel %vm557_vm2, %v1271_v33, %v1270_v32  ;;  %v2244_v41 = vrot.slane %v2237_v36, 7  ;;  %v2236_v47 = vld [vmem:[#allocation2 + $0xd] sm:$0x1]  ;;  %v2246_v48 = vrot.slane %v2238_v39, 6  ;;  %v1486_v49 = vld [vmem:[#allocation2 + $0x3] sm:$0x1]  ;;  %1962 = vrot.lane.b32.xlu1 %v1961_v51, %s3325_s28  ;;  %v1075_v2 = vpop.permute.xlu1 %1074 }
 0x157   : > { %v1274_v46 = vsel %vm560_vm3, %v1273_v34, %v1272_v38  ;;  %v1487_v50 = vld [vmem:[#allocation2 + $0x1b] sm:$0x1]  ;;  %785 = vst.msk [vmem:[#allocation3 + $0x8] sm:$0xf0] %vm4349_vm0, %v783_v42  ;;  %v2248_v53 = vrot.slane %v2239_v40, 5  ;;  %v306_v3 = vpop.permute.xlu0 %305 }
 0x158   : > { %1185 = vst.msk [vmem:[#allocation3 + $0x10] sm:$0xf0] %vm588_vm11, %v1183_v44  ;;  %v1276_v52 = vsel %vm563_vm4, %v1275_v35, %v1274_v46  ;;  %v1488_v54 = vld [vmem:[#allocation2 + $0x33] sm:$0x1]  ;;  %v1489_v56 = vld [vmem:[#allocation2 + $0x4b] sm:$0x1]  ;;  %v2245_v62 = vsel %vm261_vm5, %v2244_v41, %v2236_v47 }
 0x159   : > { %v1494_v57 = vrot.slane %v1487_v50, 7  ;;  %1277 = vrot.lane.b32.xlu0 %v1276_v52, %s3332_s6  ;;  %v1496_v58 = vrot.slane %v1488_v54, 6  ;;  %v1498_v59 = vrot.slane %v1489_v56, 5  ;;  %v2535_v60 = vld [vmem:[#allocation2 + $0xd] sm:$0x1]  ;;  %v2247_v4 = vsel %vm264_vm6, %v2246_v48, %v2245_v62 }
 0x15a   : > { %v2536_v61 = vld [vmem:[#allocation2 + $0x25] sm:$0x1]  ;;  %v2537_v55 = vld [vmem:[#allocation2 + $0x3d] sm:$0x1]  ;;  %v2538_v63 = vld [vmem:[#allocation2 + $0x55] sm:$0x1]  ;;  %v2249_v10 = vsel %vm267_vm7, %v2248_v53, %v2247_v4  ;;  %v1371_v25 = vpop.permute.xlu1 %1370 }
 0x15b   : > { %v1495_v43 = vsel %vm261_vm5, %v1494_v57, %v1486_v49  ;;  %v2543_v0 = vrot.slane %v2535_v60, 4  ;;  %v2544_v1 = vrot.slane %v2536_v61, 3  ;;  %v2546_v6 = vrot.slane %v2537_v55, 2  ;;  %v1776_v8 = vld [vmem:[#allocation2 + $0x3] sm:$0x1]  ;;  %2250 = vrot.lane.b32.xlu1 %v2249_v10, %s3323_s26  ;;  %v606_v26 = vpop.permute.xlu0 %605 }
 0x15c   : > { %v1497_v5 = vsel %vm264_vm6, %v1496_v58, %v1495_v43  ;;  %v2548_v7 = vrot.slane %v2538_v63, 1  ;;  %v1777_v9 = vld [vmem:[#allocation2 + $0x1b] sm:$0x1]  ;;  %1077 = vst.msk [vmem:[#allocation3 + $0x18] sm:$0xf] %vm4352_vm15, %v1075_v2  ;;  %v1784_v14 = vrot.slane %v1776_v8, 4 }
 0x15d   : > { %309 = vst.msk [vmem:[#allocation3] sm:$0xf] %vm308_vm13, %v306_v3  ;;  %v1499_v11 = vsel %vm267_vm7, %v1498_v59, %v1497_v5  ;;  %v1778_v12 = vld [vmem:[#allocation2 + $0x33] sm:$0x1]  ;;  %v1779_v13 = vld [vmem:[#allocation2 + $0x4b] sm:$0x1]  ;;  %v2545_v20 = vsel %vm557_vm2, %v2544_v1, %v2543_v0 }
 0x15e   : > { %v1785_v15 = vrot.slane %v1777_v9, 3  ;;  %1500 = vrot.lane.b32.xlu0 %v1499_v11, %s3320_s19  ;;  %v1787_v16 = vrot.slane %v1778_v12, 2  ;;  %v1789_v17 = vrot.slane %v1779_v13, 1  ;;  %v690_v18 = vld [vmem:[#allocation2 + $0x7] sm:$0x1]  ;;  %v2547_v27 = vsel %vm560_vm3, %v2546_v6, %v2545_v20  ;;  %v490_v50 = vpop.permute.xlu1 %489 }
 0x15f   : > { %v691_v19 = vld [vmem:[#allocation2 + $0x1f] sm:$0x1]  ;;  %v692_v22 = vld [vmem:[#allocation2 + $0x37] sm:$0x1]  ;;  %v693_v23 = vld [vmem:[#allocation2 + $0x4f] sm:$0x1]  ;;  %v2549_v33 = vsel %vm563_vm4, %v2548_v7, %v2547_v27  ;;  %v913_v51 = vpop.permute.xlu0 %912 }
 0x160   : > { %v1786_v21 = vsel %vm557_vm2, %v1785_v15, %v1784_v14  ;;  %v699_v24 = vrot.slane %v691_v19, 3  ;;  %v698_v29 = vrot.slane %v690_v18, 4  ;;  %v701_v30 = vrot.slane %v692_v22, 2  ;;  %v2076_v31 = vld [vmem:[#allocation2 + $0x4] sm:$0x1]  ;;  %2550 = vrot.lane.b32.xlu1 %v2549_v33, %s3324_s27 }
 0x161   : > { %v1788_v28 = vsel %vm560_vm3, %v1787_v16, %v1786_v21  ;;  %v2077_v32 = vld [vmem:[#allocation2 + $0x1c] sm:$0x1]  ;;  %1373 = vst.msk [vmem:[#allocation3 + $0x18] sm:$0xf0] %vm4349_vm0, %v1371_v25  ;;  %v703_v35 = vrot.slane %v693_v23, 1 }
 0x162   : > { %609 = vst.msk [vmem:[#allocation3] sm:$0xf0] %vm608_vm14, %v606_v26  ;;  %v1790_v34 = vsel %vm563_vm4, %v1789_v17, %v1788_v28  ;;  %v2078_v36 = vld [vmem:[#allocation2 + $0x34] sm:$0x1]  ;;  %v2079_v37 = vld [vmem:[#allocation2 + $0x4c] sm:$0x1]  ;;  %v700_v44 = vsel %vm557_vm2, %v699_v24, %v698_v29  ;;  %v802_v7 = vpop.permute.xlu1 %801 }
 0x163   : > { %v2084_v38 = vrot.slane %v2077_v32, 7  ;;  %1791 = vrot.lane.b32.xlu0 %v1790_v34, %s3322_s22  ;;  %v2086_v39 = vrot.slane %v2078_v36, 6  ;;  %v2088_v40 = vrot.slane %v2079_v37, 5  ;;  %v1281_v41 = vld [vmem:[#allocation2 + $0x8] sm:$0x1]  ;;  %v702_v52 = vsel %vm560_vm3, %v701_v30, %v700_v44  ;;  %v1202_v8 = vpop.permute.xlu0 %1201 }
 0x164   : > { %v1282_v42 = vld [vmem:[#allocation2 + $0x20] sm:$0x1]  ;;  %v1283_v46 = vld [vmem:[#allocation2 + $0x38] sm:$0x1]  ;;  %v1284_v47 = vld [vmem:[#allocation2 + $0x50] sm:$0x1]  ;;  %v704_v59 = vsel %vm563_vm4, %v703_v35, %v702_v52 }
 0x165   : > { %v2085_v45 = vsel %vm261_vm5, %v2084_v38, %v2076_v31  ;;  %v1289_v48 = vrot.slane %v1281_v41, 4  ;;  %v1290_v49 = vrot.slane %v1282_v42, 3  ;;  %v1292_v54 = vrot.slane %v1283_v46, 2  ;;  %v2364_v57 = vld [vmem:[#allocation2 + $0x4] sm:$0x1]  ;;  %705 = vrot.lane.b32.xlu1 %v704_v59, %s3336_s7 }
 0x166   : > { %v2087_v53 = vsel %vm264_vm6, %v2086_v39, %v2085_v45  ;;  %v1294_v56 = vrot.slane %v1284_v47, 1  ;;  %v2365_v58 = vld [vmem:[#allocation2 + $0x1c] sm:$0x1]  ;;  %492 = vst.msk [vmem:[#allocation3 + $0x8] sm:$0xf] %vm4350_vm1, %v490_v50  ;;  %v2372_v43 = vrot.slane %v2364_v57, 4  ;;  %v1093_v31 = vpop.permute.xlu1 %1092 }
 0x167   : > { %915 = vst.msk [vmem:[#allocation3 + $0x10] sm:$0xf] %vm308_vm13, %v913_v51  ;;  %v2089_v60 = vsel %vm267_vm7, %v2088_v40, %v2087_v53  ;;  %v2366_v61 = vld [vmem:[#allocation2 + $0x34] sm:$0x1]  ;;  %v2367_v62 = vld [vmem:[#allocation2 + $0x4c] sm:$0x1]  ;;  %v1291_v2 = vsel %vm557_vm2, %v1290_v49, %v1289_v48  ;;  %v325_v32 = vpop.permute.xlu0 %324 }
 0x168   : > { %v2373_v55 = vrot.slane %v2365_v58, 3  ;;  %2090 = vrot.lane.b32.xlu0 %v2089_v60, %s3318_s8  ;;  %v2375_v63 = vrot.slane %v2366_v61, 2  ;;  %v2377_v0 = vrot.slane %v2367_v62, 1  ;;  %v1667_v1 = vld [vmem:[#allocation2 + $0x25] sm:$0x1]  ;;  %v1293_v9 = vsel %vm560_vm3, %v1292_v54, %v1291_v2  ;;  %s4359_s8 = smov 64  }
 0x169   : > { %v1668_v4 = vld [vmem:[#allocation2 + $0x3d] sm:$0x1]  ;;  %v1669_v5 = vld [vmem:[#allocation2 + $0x55] sm:$0x1]  ;;  %v1674_v6 = vrot.slane %v1667_v1, 7  ;;  %v1295_v15 = vsel %vm563_vm4, %v1294_v56, %v1293_v9 }
 0x16a   : > { %v2374_v3 = vsel %vm557_vm2, %v2373_v55, %v2372_v43  ;;  %v1666_v11 = vld [vmem:[#allocation2 + $0xd] sm:$0x1]  ;;  %v1676_v12 = vrot.slane %v1668_v4, 6  ;;  %v386_v13 = vld [vmem:[#allocation2 + $0x7] sm:$0x1]  ;;  %v1678_v17 = vrot.slane %v1669_v5, 5  ;;  %1296 = vrot.lane.b32.xlu1 %v1295_v15, %s3335_s20  ;;  %v1390_v53 = vpop.permute.xlu1 %1389 }
 0x16b   : > { %v2376_v10 = vsel %vm560_vm3, %v2375_v63, %v2374_v3  ;;  %v387_v14 = vld [vmem:[#allocation2 + $0x1f] sm:$0x1]  ;;  %804 = vst.msk [vmem:[#allocation3 + $0x8] sm:$0xf0] %vm4351_vm8, %v802_v7  ;;  %v388_v18 = vld [vmem:[#allocation2 + $0x37] sm:$0x1]  ;;  %v1675_v25 = vsel %vm261_vm5, %v1674_v6, %v1666_v11  ;;  %v626_v54 = vpop.permute.xlu0 %625 }
 0x16c   : > { %1204 = vst.msk [vmem:[#allocation3 + $0x10] sm:$0xf0] %vm608_vm14, %v1202_v8  ;;  %v2378_v16 = vsel %vm563_vm4, %v2377_v0, %v2376_v10  ;;  %v389_v19 = vld [vmem:[#allocation2 + $0x4f] sm:$0x1]  ;;  %v394_v20 = vrot.slane %v387_v14, 7  ;;  %v396_v21 = vrot.slane %v388_v18, 6  ;;  %v1677_v33 = vsel %vm264_vm6, %v1676_v12, %v1675_v25 }
 0x16d   : > { %2379 = vrot.lane.b32.xlu0 %v2378_v16, %s3320_s19  ;;  %v398_v22 = vrot.slane %v389_v19, 5  ;;  %v1966_v23 = vld [vmem:[#allocation2 + $0xd] sm:$0x1]  ;;  %v1967_v24 = vld [vmem:[#allocation2 + $0x25] sm:$0x1]  ;;  %v1679_v37 = vsel %vm267_vm7, %v1678_v17, %v1677_v33  ;;  %s4360_s19 = smov 126  }
 0x16e   : > { %v395_v26 = vsel %vm261_vm5, %v394_v20, %v386_v13  ;;  %v1968_v27 = vld [vmem:[#allocation2 + $0x3d] sm:$0x1]  ;;  %v1969_v28 = vld [vmem:[#allocation2 + $0x55] sm:$0x1]  ;;  %v1974_v29 = vrot.slane %v1966_v23, 4  ;;  %v1975_v30 = vrot.slane %v1967_v24, 3  ;;  %1680 = vrot.lane.b32.xlu1 %v1679_v37, %s3327_s30  ;;  %v1906_v12 = vpop.permute.xlu1 %1905 }
 0x16f   : > { %v397_v34 = vsel %vm264_vm6, %v396_v21, %v395_v26  ;;  %v1977_v35 = vrot.slane %v1968_v27, 2  ;;  %v989_v36 = vld [vmem:[#allocation2 + $0x1f] sm:$0x1]  ;;  %1095 = vst.msk [vmem:[#allocation3 + $0x18] sm:$0xf] %vm4350_vm1, %v1093_v31  ;;  %v1979_v39 = vrot.slane %v1969_v28, 1  ;;  %v931_v13 = vpop.permute.xlu0 %930 }
 0x170   : > { %328 = vst.msk [vmem:[#allocation3] sm:$0xf] %vm4352_vm15, %v325_v32  ;;  %v399_v38 = vsel %vm267_vm7, %v398_v22, %v397_v34  ;;  %v990_v40 = vld [vmem:[#allocation2 + $0x37] sm:$0x1]  ;;  %v991_v41 = vld [vmem:[#allocation2 + $0x4f] sm:$0x1]  ;;  %v1976_v48 = vsel %vm557_vm2, %v1975_v30, %v1974_v29 }
 0x171   : > { %v996_v42 = vrot.slane %v989_v36, 7  ;;  %400 = vrot.lane.b32.xlu0 %v399_v38, %s3335_s20  ;;  %v988_v44 = vld [vmem:[#allocation2 + $0x7] sm:$0x1]  ;;  %v998_v45 = vrot.slane %v990_v40, 6  ;;  %v1000_v46 = vrot.slane %v991_v41, 5  ;;  %v1978_v56 = vsel %vm560_vm3, %v1977_v35, %v1976_v48 }
 0x172   : > { %v2255_v47 = vld [vmem:[#allocation2 + $0x26] sm:$0x1]  ;;  %v2256_v50 = vld [vmem:[#allocation2 + $0x3e] sm:$0x1]  ;;  %v2257_v51 = vld [vmem:[#allocation2 + $0x56] sm:$0x1]  ;;  %v1980_v62 = vsel %vm563_vm4, %v1979_v39, %v1978_v56  ;;  %v344_v34 = vpop.permute.xlu1 %343 }
 0x173   : > { %v997_v49 = vsel %vm261_vm5, %v996_v42, %v988_v44  ;;  %v2262_v52 = vrot.slane %v2255_v47, 7  ;;  %v2254_v58 = vld [vmem:[#allocation2 + $0xe] sm:$0x1]  ;;  %v2264_v59 = vrot.slane %v2256_v50, 6  ;;  %v1504_v60 = vld [vmem:[#allocation2 + $0x4] sm:$0x1]  ;;  %1981 = vrot.lane.b32.xlu1 %v1980_v62, %s3328_s9  ;;  %v1221_v35 = vpop.permute.xlu0 %1220 }
 0x174   : > { %v999_v57 = vsel %vm264_vm6, %v998_v45, %v997_v49  ;;  %v1505_v61 = vld [vmem:[#allocation2 + $0x1c] sm:$0x1]  ;;  %1392 = vst.msk [vmem:[#allocation3 + $0x18] sm:$0xf0] %vm4351_vm8, %v1390_v53  ;;  %v2266_v55 = vrot.slane %v2257_v51, 5 }
 0x175   : > { %629 = vst.msk [vmem:[#allocation3] sm:$0xf0] %vm4349_vm0, %v626_v54  ;;  %v1001_v43 = vsel %vm267_vm7, %v1000_v46, %v999_v57  ;;  %v1506_v63 = vld [vmem:[#allocation2 + $0x34] sm:$0x1]  ;;  %v1507_v0 = vld [vmem:[#allocation2 + $0x4c] sm:$0x1]  ;;  %v2263_v6 = vsel %vm261_vm5, %v2262_v52, %v2254_v58 }
 0x176   : > { %v1512_v1 = vrot.slane %v1505_v61, 7  ;;  %1002 = vrot.lane.b32.xlu0 %v1001_v43, %s3337_s17  ;;  %v1514_v2 = vrot.slane %v1506_v63, 6  ;;  %v1516_v3 = vrot.slane %v1507_v0, 5  ;;  %v2554_v4 = vld [vmem:[#allocation2 + $0xe] sm:$0x1]  ;;  %v2265_v14 = vsel %vm264_vm6, %v2264_v59, %v2263_v6 }
 0x177   : > { %v2555_v5 = vld [vmem:[#allocation2 + $0x26] sm:$0x1]  ;;  %v2556_v8 = vld [vmem:[#allocation2 + $0x3e] sm:$0x1]  ;;  %v2557_v9 = vld [vmem:[#allocation2 + $0x56] sm:$0x1]  ;;  %v2267_v20 = vsel %vm267_vm7, %v2266_v55, %v2265_v14  ;;  %v1609_v61 = vpop.permute.xlu0 %1608 }
 0x178   : > { %v1513_v7 = vsel %vm261_vm5, %v1512_v1, %v1504_v60  ;;  %v2562_v10 = vrot.slane %v2554_v4, 4  ;;  %v2563_v11 = vrot.slane %v2555_v5, 3  ;;  %v2565_v16 = vrot.slane %v2556_v8, 2  ;;  %v1795_v18 = vld [vmem:[#allocation2 + $0x4] sm:$0x1]  ;;  %2268 = vrot.lane.b32.xlu1 %v2267_v20, %s4359_s8  ;;  %v646_v60 = vpop.permute.xlu1 %645 }
 0x179   : > { %v1515_v15 = vsel %vm264_vm6, %v1514_v2, %v1513_v7  ;;  %v2567_v17 = vrot.slane %v2557_v9, 1  ;;  %v1796_v19 = vld [vmem:[#allocation2 + $0x1c] sm:$0x1]  ;;  %1908 = vst.msk [vmem:[#allocation3 + $0x28] sm:$0xf0] %vm568_vm9, %v1906_v12  ;;  %v1803_v24 = vrot.slane %v1795_v18, 4 }
 0x17a   : > { %933 = vst.msk [vmem:[#allocation3 + $0x10] sm:$0xf] %vm4352_vm15, %v931_v13  ;;  %v1517_v21 = vsel %vm267_vm7, %v1516_v3, %v1515_v15  ;;  %v1797_v22 = vld [vmem:[#allocation2 + $0x34] sm:$0x1]  ;;  %v1798_v23 = vld [vmem:[#allocation2 + $0x4c] sm:$0x1]  ;;  %v2564_v29 = vsel %vm557_vm2, %v2563_v11, %v2562_v10 }
 0x17b   : > { %v1804_v25 = vrot.slane %v1796_v19, 3  ;;  %1518 = vrot.lane.b32.xlu0 %v1517_v21, %s3324_s27  ;;  %v1806_v26 = vrot.slane %v1797_v22, 2  ;;  %v1808_v27 = vrot.slane %v1798_v23, 1  ;;  %v1685_v28 = vld [vmem:[#allocation2 + $0x26] sm:$0x1]  ;;  %v2566_v36 = vsel %vm560_vm3, %v2565_v16, %v2564_v29 }
 0x17c   : > { %v1686_v31 = vld [vmem:[#allocation2 + $0x3e] sm:$0x1]  ;;  %v1687_v32 = vld [vmem:[#allocation2 + $0x56] sm:$0x1]  ;;  %v1692_v33 = vrot.slane %v1685_v28, 7  ;;  %v2568_v42 = vsel %vm563_vm4, %v2567_v17, %v2566_v36  ;;  %v949_v16 = vpop.permute.xlu1 %948  ;;  %v2494_v17 = vpop.permute.xlu0 %2493  ;;  %vm688_vm15 = vcmask 917252  }
 0x17d   : > { %v1805_v30 = vsel %vm557_vm2, %v1804_v25, %v1803_v24  ;;  %v1684_v38 = vld [vmem:[#allocation2 + $0xe] sm:$0x1]  ;;  %v1694_v39 = vrot.slane %v1686_v31, 6  ;;  %v2094_v40 = vld [vmem:[#allocation2 + $0x5] sm:$0x1]  ;;  %v1696_v45 = vrot.slane %v1687_v32, 5  ;;  %2569 = vrot.lane.b32.xlu1 %v2568_v42, %s3327_s30 }
 0x17e   : > { %v1807_v37 = vsel %vm560_vm3, %v1806_v26, %v1805_v30  ;;  %v2095_v41 = vld [vmem:[#allocation2 + $0x1d] sm:$0x1]  ;;  %347 = vst.msk [vmem:[#allocation3] sm:$0xf] %vm4350_vm1, %v344_v34  ;;  %v2096_v46 = vld [vmem:[#allocation2 + $0x35] sm:$0x1]  ;;  %v1693_v53 = vsel %vm261_vm5, %v1692_v33, %v1684_v38 }
 0x17f   : > { %1223 = vst.msk [vmem:[#allocation3 + $0x10] sm:$0xf0] %vm4349_vm0, %v1221_v35  ;;  %v1809_v44 = vsel %vm563_vm4, %v1808_v27, %v1807_v37  ;;  %v2097_v47 = vld [vmem:[#allocation2 + $0x4d] sm:$0x1]  ;;  %v2102_v48 = vrot.slane %v2095_v41, 7  ;;  %v2104_v49 = vrot.slane %v2096_v46, 6  ;;  %v1695_v62 = vsel %vm264_vm6, %v1694_v39, %v1693_v53 }
 0x180   : > { %1810 = vrot.lane.b32.xlu0 %v1809_v44, %s3325_s28  ;;  %v2106_v50 = vrot.slane %v2097_v47, 5  ;;  %v1985_v51 = vld [vmem:[#allocation2 + $0xe] sm:$0x1]  ;;  %v1986_v52 = vld [vmem:[#allocation2 + $0x26] sm:$0x1]  ;;  %v1697_v2 = vsel %vm267_vm7, %v1696_v45, %v1695_v62  ;;  %vm365_vm0 = vcmask 781952   ;;  %v508_v41 = vpop.permute.xlu0 %507 }
 0x181   : > { %v2103_v54 = vsel %vm261_vm5, %v2102_v48, %v2094_v40  ;;  %v1987_v56 = vld [vmem:[#allocation2 + $0x3e] sm:$0x1]  ;;  %v1988_v57 = vld [vmem:[#allocation2 + $0x56] sm:$0x1]  ;;  %v1993_v58 = vrot.slane %v1985_v51, 4  ;;  %v1994_v59 = vrot.slane %v1986_v52, 3  ;;  %1698 = vrot.lane.b32.xlu1 %v1697_v2, %s3330_s11  ;;  %v1240_v40 = vpop.permute.xlu1 %1239 }
 0x182   : > { %v2105_v43 = vsel %vm264_vm6, %v2104_v49, %v2103_v54  ;;  %v1996_v55 = vrot.slane %v1987_v56, 2  ;;  %v1998_v63 = vrot.slane %v1988_v57, 1  ;;  %v2383_v0 = vld [vmem:[#allocation2 + $0x5] sm:$0x1]  ;;  %v2384_v1 = vld [vmem:[#allocation2 + $0x1d] sm:$0x1] }
 0x183   : > { %649 = vst.msk [vmem:[#allocation3] sm:$0xf0] %vm4351_vm8, %v646_v60  ;;  %v2107_v3 = vsel %vm267_vm7, %v2106_v50, %v2105_v43  ;;  %v2385_v4 = vld [vmem:[#allocation2 + $0x35] sm:$0x1]  ;;  %v2386_v5 = vld [vmem:[#allocation2 + $0x4d] sm:$0x1]  ;;  %v1995_v11 = vsel %vm557_vm2, %v1994_v59, %v1993_v58 }
 0x184   : > { %1611 = vst.msk [vmem:[#allocation3 + $0x28] sm:$0xf] %vm270_vm10, %v1609_v61  ;;  %v2391_v6 = vrot.slane %v2383_v0, 4  ;;  %v2392_v7 = vrot.slane %v2384_v1, 3  ;;  %2108 = vrot.lane.b32.xlu0 %v2107_v3, %s3323_s26  ;;  %v2394_v8 = vrot.slane %v2385_v4, 2  ;;  %v2396_v9 = vrot.slane %v2386_v5, 1  ;;  %v821_v0 = vpop.permute.xlu0 %820 }
 0x185   : > { %v2273_v10 = vld [vmem:[#allocation2 + $0x27] sm:$0x1]  ;;  %v2274_v13 = vld [vmem:[#allocation2 + $0x3f] sm:$0x1]  ;;  %v2275_v14 = vld [vmem:[#allocation2 + $0x57] sm:$0x1]  ;;  %v1997_v18 = vsel %vm560_vm3, %v1996_v55, %v1995_v11 }
 0x186   : > { %v2393_v12 = vsel %vm557_vm2, %v2392_v7, %v2391_v6  ;;  %v2280_v15 = vrot.slane %v2273_v10, 7  ;;  %v2272_v20 = vld [vmem:[#allocation2 + $0xf] sm:$0x1]  ;;  %v2282_v21 = vrot.slane %v2274_v13, 6  ;;  %v1522_v22 = vld [vmem:[#allocation2 + $0x5] sm:$0x1]  ;;  %v1999_v24 = vsel %vm563_vm4, %v1998_v63, %v1997_v18  ;;  %v1465_v63 = vpop.permute.xlu1 %1464 }
 0x187   : > { %v2395_v19 = vsel %vm560_vm3, %v2394_v8, %v2393_v12  ;;  %v1523_v23 = vld [vmem:[#allocation2 + $0x1d] sm:$0x1]  ;;  %951 = vst.msk [vmem:[#allocation3 + $0x10] sm:$0xf] %vm4350_vm1, %v949_v16  ;;  %v2284_v26 = vrot.slane %v2275_v14, 5  ;;  %2000 = vrot.lane.b32.xlu1 %v1999_v24, %s3331_s23  ;;  %vm4353_vm1 = vcmask 786052  }
 0x188   : > { %2496 = vst.msk [vmem:[#allocation3 + $0x38] sm:$0xf0] %vm568_vm9, %v2494_v17  ;;  %v2397_v25 = vsel %vm563_vm4, %v2396_v9, %v2395_v19  ;;  %v1524_v27 = vld [vmem:[#allocation2 + $0x35] sm:$0x1]  ;;  %v1525_v28 = vld [vmem:[#allocation2 + $0x4d] sm:$0x1]  ;;  %v2281_v34 = vsel %vm261_vm5, %v2280_v15, %v2272_v20 }
 0x189   : > { %v1530_v29 = vrot.slane %v1523_v23, 7  ;;  %2398 = vrot.lane.b32.xlu0 %v2397_v25, %s3324_s27  ;;  %v1532_v30 = vrot.slane %v1524_v27, 6  ;;  %v1534_v31 = vrot.slane %v1525_v28, 5  ;;  %v2573_v32 = vld [vmem:[#allocation2 + $0xf] sm:$0x1]  ;;  %v2283_v42 = vsel %vm264_vm6, %v2282_v21, %v2281_v34  ;;  %v1111_v23 = vpop.permute.xlu0 %1110 }
 0x18a   : > { %v2574_v33 = vld [vmem:[#allocation2 + $0x27] sm:$0x1]  ;;  %v2575_v36 = vld [vmem:[#allocation2 + $0x3f] sm:$0x1]  ;;  %v2576_v37 = vld [vmem:[#allocation2 + $0x57] sm:$0x1]  ;;  %v2285_v49 = vsel %vm267_vm7, %v2284_v26, %v2283_v42 }
 0x18b   : > { %v1531_v35 = vsel %vm261_vm5, %v1530_v29, %v1522_v22  ;;  %v2581_v38 = vrot.slane %v2573_v32, 4  ;;  %v2582_v39 = vrot.slane %v2574_v33, 3  ;;  %v2584_v45 = vrot.slane %v2575_v36, 2  ;;  %v1814_v47 = vld [vmem:[#allocation2 + $0x5] sm:$0x1]  ;;  %2286 = vrot.lane.b32.xlu1 %v2285_v49, %s3329_s10  ;;  %v1754_v22 = vpop.permute.xlu1 %1753 }
 0x18c   : > { %v1533_v44 = vsel %vm264_vm6, %v1532_v30, %v1531_v35  ;;  %v2586_v46 = vrot.slane %v2576_v37, 1  ;;  %v1815_v48 = vld [vmem:[#allocation2 + $0x1d] sm:$0x1]  ;;  %1242 = vst.msk [vmem:[#allocation3 + $0x10] sm:$0xf0] %vm4351_vm8, %v1240_v40  ;;  %v1822_v53 = vrot.slane %v1814_v47, 4 }
 0x18d   : > { %510 = vst.msk [vmem:[#allocation3 + $0x8] sm:$0xf] %vm365_vm0, %v508_v41  ;;  %v1535_v50 = vsel %vm267_vm7, %v1534_v31, %v1533_v44  ;;  %v1816_v51 = vld [vmem:[#allocation2 + $0x35] sm:$0x1]  ;;  %v1817_v52 = vld [vmem:[#allocation2 + $0x4d] sm:$0x1]  ;;  %v2583_v59 = vsel %vm557_vm2, %v2582_v39, %v2581_v38  ;;  %v1409_v49 = vpop.permute.xlu0 %1408 }
 0x18e   : > { %v1823_v54 = vrot.slane %v1815_v48, 3  ;;  %1536 = vrot.lane.b32.xlu0 %v1535_v50, %s3327_s30  ;;  %v1825_v56 = vrot.slane %v1816_v51, 2  ;;  %v1827_v57 = vrot.slane %v1817_v52, 1  ;;  %v1703_v58 = vld [vmem:[#allocation2 + $0x27] sm:$0x1]  ;;  %v2585_v1 = vsel %vm560_vm3, %v2584_v45, %v2583_v59 }
 0x18f   : > { %v1702_v61 = vld [vmem:[#allocation2 + $0xf] sm:$0x1]  ;;  %v1704_v62 = vld [vmem:[#allocation2 + $0x3f] sm:$0x1]  ;;  %v1705_v43 = vld [vmem:[#allocation2 + $0x57] sm:$0x1]  ;;  %v2587_v7 = vsel %vm563_vm4, %v2586_v46, %v2585_v1  ;;  %v2215_v48 = vpop.permute.xlu1 %2214 }
 0x190   : > { %v1824_v60 = vsel %vm557_vm2, %v1823_v54, %v1822_v53  ;;  %v1710_v55 = vrot.slane %v1703_v58, 7  ;;  %v1712_v3 = vrot.slane %v1704_v62, 6  ;;  %v1714_v4 = vrot.slane %v1705_v43, 5  ;;  %v2112_v5 = vld [vmem:[#allocation2 + $0x6] sm:$0x1]  ;;  %2588 = vrot.lane.b32.xlu1 %v2587_v7, %s3330_s11 }
 0x191   : > { %v1826_v2 = vsel %vm560_vm3, %v1825_v56, %v1824_v60  ;;  %v2113_v6 = vld [vmem:[#allocation2 + $0x1e] sm:$0x1]  ;;  %1467 = vst.msk [vmem:[#allocation3 + $0x20] sm:$0xf] %vm270_vm10, %v1465_v63  ;;  %v2114_v9 = vld [vmem:[#allocation2 + $0x36] sm:$0x1] }
 0x192   : > { %823 = vst.msk [vmem:[#allocation3 + $0x8] sm:$0xf0] %vm4353_vm1, %v821_v0  ;;  %v1828_v8 = vsel %vm563_vm4, %v1827_v57, %v1826_v2  ;;  %v2115_v10 = vld [vmem:[#allocation2 + $0x4e] sm:$0x1]  ;;  %v2120_v11 = vrot.slane %v2113_v6, 7  ;;  %v1711_v12 = vsel %vm261_vm5, %v1710_v55, %v1702_v61  ;;  %v2122_v13 = vrot.slane %v2114_v9, 6  ;;  %v1627_v6 = vpop.permute.xlu0 %1626 }
 0x193   : > { %1829 = vrot.lane.b32.xlu0 %v1828_v8, %s3328_s9  ;;  %v2124_v14 = vrot.slane %v2115_v10, 5  ;;  %v2184_v15 = vld [vmem:[#allocation2 + $0xa] sm:$0x1]  ;;  %v2185_v16 = vld [vmem:[#allocation2 + $0x22] sm:$0x1]  ;;  %v1713_v17 = vsel %vm264_vm6, %v1712_v3, %v1711_v12  ;;  %vm384_vm8 = vcmask 913152  }
 0x194   : > { %v2121_v18 = vsel %vm261_vm5, %v2120_v11, %v2112_v5  ;;  %v2186_v19 = vld [vmem:[#allocation2 + $0x3a] sm:$0x1]  ;;  %v2187_v20 = vld [vmem:[#allocation2 + $0x52] sm:$0x1]  ;;  %v2192_v21 = vrot.slane %v2185_v16, 7  ;;  %v1715_v24 = vsel %vm267_vm7, %v1714_v4, %v1713_v17  ;;  %v2513_v5 = vpop.permute.xlu1 %2512 }
 0x195   : > { %v2123_v25 = vsel %vm264_vm6, %v2122_v13, %v2121_v18  ;;  %v2194_v26 = vrot.slane %v2186_v19, 6  ;;  %v2196_v27 = vrot.slane %v2187_v20, 5  ;;  %v2004_v28 = vld [vmem:[#allocation2 + $0xf] sm:$0x1]  ;;  %v2005_v29 = vld [vmem:[#allocation2 + $0x27] sm:$0x1]  ;;  %1716 = vrot.lane.b32.xlu1 %v1715_v24, %s3333_s29 }
 0x196   : > { %1756 = vst.msk [vmem:[#allocation3 + $0x20] sm:$0xf0] %vm568_vm9, %v1754_v22  ;;  %v2125_v30 = vsel %vm267_vm7, %v2124_v14, %v2123_v25  ;;  %v2193_v31 = vsel %vm261_vm5, %v2192_v21, %v2184_v15  ;;  %v2006_v32 = vld [vmem:[#allocation2 + $0x3f] sm:$0x1]  ;;  %v2007_v33 = vld [vmem:[#allocation2 + $0x57] sm:$0x1] }
 0x197   : > { %1113 = vst.msk [vmem:[#allocation3 + $0x18] sm:$0xf] %vm365_vm0, %v1111_v23  ;;  %v2012_v34 = vrot.slane %v2004_v28, 4  ;;  %v2013_v35 = vrot.slane %v2005_v29, 3  ;;  %2126 = vrot.lane.b32.xlu0 %v2125_v30, %s4359_s8  ;;  %v2195_v36 = vsel %vm264_vm6, %v2194_v26, %v2193_v31  ;;  %v2015_v37 = vrot.slane %v2006_v32, 2  ;;  %v1925_v30 = vpop.permute.xlu0 %1924 }
 0x198   : > { %v2017_v38 = vrot.slane %v2007_v33, 1  ;;  %v2402_v39 = vld [vmem:[#allocation2 + $0x6] sm:$0x1]  ;;  %v2403_v40 = vld [vmem:[#allocation2 + $0x1e] sm:$0x1]  ;;  %v2197_v41 = vsel %vm267_vm7, %v2196_v27, %v2195_v36  ;;  %v526_v29 = vpop.permute.xlu1 %525 }
 0x199   : > { %v2014_v42 = vsel %vm557_vm2, %v2013_v35, %v2012_v34  ;;  %v2404_v44 = vld [vmem:[#allocation2 + $0x36] sm:$0x1]  ;;  %v2405_v45 = vld [vmem:[#allocation2 + $0x4e] sm:$0x1]  ;;  %v2410_v46 = vrot.slane %v2402_v39, 4  ;;  %v2411_v47 = vrot.slane %v2403_v40, 3 }
 0x19a   : > { %2199 = vst.msk [vmem:[#allocation3 + $0x38] sm:$0xf] %vm270_vm10, %v2197_v41  ;;  %v2016_v50 = vsel %vm560_vm3, %v2015_v37, %v2014_v42  ;;  %v2413_v51 = vrot.slane %v2404_v44, 2  ;;  %v2415_v52 = vrot.slane %v2405_v45, 1  ;;  %v2290_v53 = vld [vmem:[#allocation2 + $0x10] sm:$0x1] }
 0x19b   : > { %v2291_v54 = vld [vmem:[#allocation2 + $0x28] sm:$0x1]  ;;  %2217 = vst.msk [vmem:[#allocation3 + $0x38] sm:$0xf] %vm289_vm12, %v2215_v48  ;;  %v2018_v56 = vsel %vm563_vm4, %v2017_v38, %v2016_v50  ;;  %v2412_v57 = vsel %vm557_vm2, %v2411_v47, %v2410_v46  ;;  %v2292_v58 = vld [vmem:[#allocation2 + $0x40] sm:$0x1] }
 0x19c   : > { %1411 = vst.msk [vmem:[#allocation3 + $0x18] sm:$0xf0] %vm4353_vm1, %v1409_v49  ;;  %v2293_v59 = vld [vmem:[#allocation2 + $0x58] sm:$0x1]  ;;  %v2298_v60 = vrot.slane %v2291_v54, 7  ;;  %2019 = vrot.lane.b32.xlu1 %v2018_v56, %s3334_s4  ;;  %v2414_v61 = vsel %vm560_vm3, %v2413_v51, %v2412_v57  ;;  %v2300_v62 = vrot.slane %v2292_v58, 6 }
 0x19d   : > { %v2302_v43 = vrot.slane %v2293_v59, 5  ;;  %v1540_v55 = vld [vmem:[#allocation2 + $0x6] sm:$0x1]  ;;  %v1541_v63 = vld [vmem:[#allocation2 + $0x1e] sm:$0x1]  ;;  %v2416_v0 = vsel %vm563_vm4, %v2415_v52, %v2414_v61  ;;  %v840_v52 = vpop.permute.xlu1 %839 }
 0x19e   : > { %v2299_v1 = vsel %vm261_vm5, %v2298_v60, %v2290_v53  ;;  %v1542_v2 = vld [vmem:[#allocation2 + $0x36] sm:$0x1]  ;;  %v1543_v3 = vld [vmem:[#allocation2 + $0x4e] sm:$0x1]  ;;  %v1548_v4 = vrot.slane %v1541_v63, 7  ;;  %2417 = vrot.lane.b32.xlu0 %v2416_v0, %s3327_s30  ;;  %v2342_v53 = vpop.permute.xlu0 %2341 }
 0x19f   : > { %v2301_v7 = vsel %vm264_vm6, %v2300_v62, %v2299_v1  ;;  %v1550_v8 = vrot.slane %v1542_v2, 6  ;;  %v1552_v9 = vrot.slane %v1543_v3, 5  ;;  %v2592_v10 = vld [vmem:[#allocation2 + $0x10] sm:$0x1]  ;;  %v2593_v11 = vld [vmem:[#allocation2 + $0x28] sm:$0x1] }
 0x1a0   : > { %2515 = vst.msk [vmem:[#allocation3 + $0x38] sm:$0xf0] %vm588_vm11, %v2513_v5  ;;  %v2303_v12 = vsel %vm267_vm7, %v2302_v43, %v2301_v7  ;;  %v1549_v13 = vsel %vm261_vm5, %v1548_v4, %v1540_v55  ;;  %v2594_v14 = vld [vmem:[#allocation2 + $0x40] sm:$0x1]  ;;  %v2595_v15 = vld [vmem:[#allocation2 + $0x58] sm:$0x1] }
 0x1a1   : > { %1629 = vst.msk [vmem:[#allocation3 + $0x28] sm:$0xf] %vm289_vm12, %v1627_v6  ;;  %v2600_v16 = vrot.slane %v2592_v10, 4  ;;  %v2601_v17 = vrot.slane %v2593_v11, 3  ;;  %2304 = vrot.lane.b32.xlu1 %v2303_v12, %s3332_s6  ;;  %v1551_v18 = vsel %vm264_vm6, %v1550_v8, %v1549_v13  ;;  %v2603_v19 = vrot.slane %v2594_v14, 2  ;;  %v1129_v11 = vpop.permute.xlu1 %1128 }
 0x1a2   : > { %v2605_v20 = vrot.slane %v2595_v15, 1  ;;  %v1833_v21 = vld [vmem:[#allocation2 + $0x6] sm:$0x1]  ;;  %v1834_v22 = vld [vmem:[#allocation2 + $0x1e] sm:$0x1]  ;;  %v1553_v23 = vsel %vm267_vm7, %v1552_v9, %v1551_v18  ;;  %v363_v12 = vpop.permute.xlu0 %362 }
 0x1a3   : > { %v2602_v24 = vsel %vm557_vm2, %v2601_v17, %v2600_v16  ;;  %v1835_v25 = vld [vmem:[#allocation2 + $0x36] sm:$0x1]  ;;  %v1836_v26 = vld [vmem:[#allocation2 + $0x4e] sm:$0x1]  ;;  %v1841_v27 = vrot.slane %v1833_v21, 4  ;;  %v1842_v28 = vrot.slane %v1834_v22, 3  ;;  %1554 = vrot.lane.b32.xlu0 %v1553_v23, %s3330_s11 }
 0x1a4   : > { %v2604_v31 = vsel %vm560_vm3, %v2603_v19, %v2602_v24  ;;  %v1844_v32 = vrot.slane %v1835_v25, 2  ;;  %v1846_v33 = vrot.slane %v1836_v26, 1  ;;  %v1558_v34 = vld [vmem:[#allocation2 + $0x7] sm:$0x1]  ;;  %v1559_v35 = vld [vmem:[#allocation2 + $0x1f] sm:$0x1] }
 0x1a5   : > { %528 = vst.msk [vmem:[#allocation3 + $0x8] sm:$0xf] %vm384_vm8, %v526_v29  ;;  %v2606_v36 = vsel %vm563_vm4, %v2605_v20, %v2604_v31  ;;  %v1843_v37 = vsel %vm557_vm2, %v1842_v28, %v1841_v27  ;;  %v1560_v38 = vld [vmem:[#allocation2 + $0x37] sm:$0x1]  ;;  %v1561_v39 = vld [vmem:[#allocation2 + $0x4f] sm:$0x1] }
 0x1a6   : > { %1927 = vst.msk [vmem:[#allocation3 + $0x28] sm:$0xf0] %vm588_vm11, %v1925_v30  ;;  %v1566_v40 = vrot.slane %v1559_v35, 7  ;;  %2607 = vrot.lane.b32.xlu1 %v2606_v36, %s3333_s29  ;;  %v1845_v41 = vsel %vm560_vm3, %v1844_v32, %v1843_v37  ;;  %v1568_v42 = vrot.slane %v1560_v38, 6  ;;  %v1570_v44 = vrot.slane %v1561_v39, 5 }
 0x1a7   : > { %v2130_v45 = vld [vmem:[#allocation2 + $0x7] sm:$0x1]  ;;  %v2131_v46 = vld [vmem:[#allocation2 + $0x1f] sm:$0x1]  ;;  %v1847_v47 = vsel %vm563_vm4, %v1846_v33, %v1845_v41  ;;  %v2132_v49 = vld [vmem:[#allocation2 + $0x37] sm:$0x1]  ;;  %v1428_v33 = vpop.permute.xlu1 %1427 }
 0x1a8   : > { %v1567_v48 = vsel %vm261_vm5, %v1566_v40, %v1558_v34  ;;  %v2133_v50 = vld [vmem:[#allocation2 + $0x4f] sm:$0x1]  ;;  %v2138_v51 = vrot.slane %v2131_v46, 7  ;;  %1848 = vrot.lane.b32.xlu0 %v1847_v47, %s3331_s23  ;;  %v2140_v56 = vrot.slane %v2132_v49, 6  ;;  %v1852_v58 = vld [vmem:[#allocation2 + $0x7] sm:$0x1]  ;;  %v666_v34 = vpop.permute.xlu0 %665 }
 0x1a9   : > { %v1569_v54 = vsel %vm264_vm6, %v1568_v42, %v1567_v48  ;;  %v2142_v57 = vrot.slane %v2133_v50, 5  ;;  %v1853_v59 = vld [vmem:[#allocation2 + $0x1f] sm:$0x1]  ;;  %842 = vst.msk [vmem:[#allocation3 + $0x8] sm:$0xf0] %vm688_vm15, %v840_v52  ;;  %v1860_v55 = vrot.slane %v1852_v58, 4 }
 0x1aa   : > { %2344 = vst.msk [vmem:[#allocation3 + $0x30] sm:$0xf0] %vm568_vm9, %v2342_v53  ;;  %v1571_v60 = vsel %vm267_vm7, %v1570_v44, %v1569_v54  ;;  %v2139_v61 = vsel %vm261_vm5, %v2138_v51, %v2130_v45  ;;  %v1854_v62 = vld [vmem:[#allocation2 + $0x37] sm:$0x1]  ;;  %v1855_v43 = vld [vmem:[#allocation2 + $0x4f] sm:$0x1] }
 0x1ab   : > { %v1861_v63 = vrot.slane %v1853_v59, 3  ;;  %1572 = vrot.lane.b32.xlu1 %v1571_v60, %s3333_s29  ;;  %v2141_v0 = vsel %vm264_vm6, %v2140_v56, %v2139_v61  ;;  %v1863_v1 = vrot.slane %v1854_v62, 2  ;;  %v1865_v2 = vrot.slane %v1855_v43, 1  ;;  %v2421_v3 = vld [vmem:[#allocation2 + $0x7] sm:$0x1]  ;;  %v1645_v58 = vpop.permute.xlu1 %1644 }
 0x1ac   : > { %v2422_v4 = vld [vmem:[#allocation2 + $0x1f] sm:$0x1]  ;;  %v2143_v5 = vsel %vm267_vm7, %v2142_v57, %v2141_v0  ;;  %v2423_v7 = vld [vmem:[#allocation2 + $0x37] sm:$0x1]  ;;  %v2424_v8 = vld [vmem:[#allocation2 + $0x4f] sm:$0x1]  ;;  %v967_v59 = vpop.permute.xlu0 %966 }
 0x1ad   : > { %v1862_v6 = vsel %vm557_vm2, %v1861_v63, %v1860_v55  ;;  %v2429_v9 = vrot.slane %v2421_v3, 4  ;;  %v2430_v10 = vrot.slane %v2422_v4, 3  ;;  %2144 = vrot.lane.b32.xlu0 %v2143_v5, %s3329_s10  ;;  %v2432_v14 = vrot.slane %v2423_v7, 2  ;;  %v2148_v16 = vld [vmem:[#allocation2 + $0x8] sm:$0x1] }
 0x1ae   : > { %v1864_v13 = vsel %vm560_vm3, %v1863_v1, %v1862_v6  ;;  %v2434_v15 = vrot.slane %v2424_v8, 1  ;;  %v2149_v17 = vld [vmem:[#allocation2 + $0x20] sm:$0x1]  ;;  %1131 = vst.msk [vmem:[#allocation3 + $0x18] sm:$0xf] %vm384_vm8, %v1129_v11  ;;  %vm403_vm9 = vcmask 1044352  }
 0x1af   : > { %366 = vst.msk [vmem:[#allocation3] sm:$0xf] %vm365_vm0, %v363_v12  ;;  %v1866_v18 = vsel %vm563_vm4, %v1865_v2, %v1864_v13  ;;  %v2431_v19 = vsel %vm557_vm2, %v2430_v10, %v2429_v9  ;;  %v2150_v20 = vld [vmem:[#allocation2 + $0x38] sm:$0x1]  ;;  %v2151_v21 = vld [vmem:[#allocation2 + $0x50] sm:$0x1] }
 0x1b0   : > { %v2156_v22 = vrot.slane %v2149_v17, 7  ;;  %1867 = vrot.lane.b32.xlu1 %v1866_v18, %s3334_s4  ;;  %v2433_v23 = vsel %vm560_vm3, %v2432_v14, %v2431_v19  ;;  %v2158_v24 = vrot.slane %v2150_v20, 6  ;;  %v2160_v25 = vrot.slane %v2151_v21, 5  ;;  %v2774_v26 = vld [vmem:[#allocation2 + $0xa] sm:$0x1] }
 0x1b1   : > { %v2775_v27 = vld [vmem:[#allocation2 + $0x22] sm:$0x1]  ;;  %v2435_v28 = vsel %vm563_vm4, %v2434_v15, %v2433_v23  ;;  %v2776_v30 = vld [vmem:[#allocation2 + $0x3a] sm:$0x1]  ;;  %v2777_v31 = vld [vmem:[#allocation2 + $0x52] sm:$0x1]  ;;  %v1944_v15 = vpop.permute.xlu1 %1943 }
 0x1b2   : > { %v2157_v29 = vsel %vm261_vm5, %v2156_v22, %v2148_v16  ;;  %v2782_v32 = vrot.slane %v2775_v27, 7  ;;  %2436 = vrot.lane.b32.xlu0 %v2435_v28, %s3330_s11  ;;  %v2784_v36 = vrot.slane %v2776_v30, 6  ;;  %v2786_v37 = vrot.slane %v2777_v31, 5  ;;  %v2440_v38 = vld [vmem:[#allocation2 + $0x8] sm:$0x1]  ;;  %v1259_v16 = vpop.permute.xlu0 %1258 }
 0x1b3   : > { %v2159_v35 = vsel %vm264_vm6, %v2158_v24, %v2157_v29  ;;  %v2441_v39 = vld [vmem:[#allocation2 + $0x20] sm:$0x1]  ;;  %1430 = vst.msk [vmem:[#allocation3 + $0x18] sm:$0xf0] %vm688_vm15, %v1428_v33  ;;  %v2442_v42 = vld [vmem:[#allocation2 + $0x38] sm:$0x1] }
 0x1b4   : > { %669 = vst.msk [vmem:[#allocation3] sm:$0xf0] %vm4353_vm1, %v666_v34  ;;  %v2161_v40 = vsel %vm267_vm7, %v2160_v25, %v2159_v35  ;;  %v2783_v41 = vsel %vm261_vm5, %v2782_v32, %v2774_v26  ;;  %v2443_v44 = vld [vmem:[#allocation2 + $0x50] sm:$0x1]  ;;  %v2448_v45 = vrot.slane %v2440_v38, 4  ;;  %v2449_v46 = vrot.slane %v2441_v39, 3 }
 0x1b5   : > { %2162 = vrot.lane.b32.xlu1 %v2161_v40, %s3332_s6  ;;  %v2785_v47 = vsel %vm264_vm6, %v2784_v36, %v2783_v41  ;;  %v2451_v48 = vrot.slane %v2442_v42, 2  ;;  %v2453_v49 = vrot.slane %v2443_v44, 1  ;;  %v1720_v50 = vld [vmem:[#allocation2 + $0x10] sm:$0x1]  ;;  %v1721_v51 = vld [vmem:[#allocation2 + $0x28] sm:$0x1] }
 0x1b6   : > { %v2787_v52 = vsel %vm267_vm7, %v2786_v37, %v2785_v47  ;;  %v2450_v53 = vsel %vm557_vm2, %v2449_v46, %v2448_v45  ;;  %v1722_v54 = vld [vmem:[#allocation2 + $0x40] sm:$0x1]  ;;  %v1723_v56 = vld [vmem:[#allocation2 + $0x58] sm:$0x1]  ;;  %v1728_v57 = vrot.slane %v1721_v51, 7  ;;  %v2233_v37 = vpop.permute.xlu1 %2232  ;;  %v1483_v38 = vpop.permute.xlu0 %1482  ;;  %s4361_s6 = smov 14  }
 0x1b7   : > { %2788 = vrot.lane.b32.xlu0 %v2787_v52, %s4360_s19  ;;  %v2452_v60 = vsel %vm560_vm3, %v2451_v48, %v2450_v53  ;;  %v1730_v61 = vrot.slane %v1722_v54, 6  ;;  %v1732_v62 = vrot.slane %v1723_v56, 5  ;;  %v2630_v43 = vld [vmem:[#allocation2 + $0x2] sm:$0x1]  ;;  %v2631_v55 = vld [vmem:[#allocation2 + $0x1a] sm:$0x1] }
 0x1b8   : > { %1647 = vst.msk [vmem:[#allocation3 + $0x28] sm:$0xf] %vm308_vm13, %v1645_v58  ;;  %v2454_v63 = vsel %vm563_vm4, %v2453_v49, %v2452_v60  ;;  %v1729_v0 = vsel %vm261_vm5, %v1728_v57, %v1720_v50  ;;  %v2632_v1 = vld [vmem:[#allocation2 + $0x32] sm:$0x1]  ;;  %v2633_v2 = vld [vmem:[#allocation2 + $0x4a] sm:$0x1] }
 0x1b9   : > { %969 = vst.msk [vmem:[#allocation3 + $0x10] sm:$0xf] %vm365_vm0, %v967_v59  ;;  %v2638_v3 = vrot.slane %v2631_v55, 7  ;;  %2455 = vrot.lane.b32.xlu1 %v2454_v63, %s3333_s29  ;;  %v1731_v4 = vsel %vm264_vm6, %v1730_v61, %v1729_v0  ;;  %v2640_v5 = vrot.slane %v2632_v1, 6  ;;  %v2642_v6 = vrot.slane %v2633_v2, 5  ;;  %s3128_s29 = sshll.u32 %s3381_s16, 8 }
 0x1ba   : > { %v2023_v7 = vld [vmem:[#allocation2 + $0x10] sm:$0x1]  ;;  %v2024_v8 = vld [vmem:[#allocation2 + $0x28] sm:$0x1]  ;;  %v1733_v9 = vsel %vm267_vm7, %v1732_v62, %v1731_v4  ;;  %v2025_v11 = vld [vmem:[#allocation2 + $0x40] sm:$0x1]  ;;  %v2532_v62 = vpop.permute.xlu1 %2531 }
 0x1bb   : > { %v2639_v10 = vsel %vm261_vm5, %v2638_v3, %v2630_v43  ;;  %v2026_v12 = vld [vmem:[#allocation2 + $0x58] sm:$0x1]  ;;  %v2031_v13 = vrot.slane %v2023_v7, 4  ;;  %v2032_v14 = vrot.slane %v2024_v8, 3  ;;  %1734 = vrot.lane.b32.xlu0 %v1733_v9, %s3336_s7  ;;  %v2034_v18 = vrot.slane %v2025_v11, 2  ;;  %v1773_v43 = vpop.permute.xlu0 %1772  ;;  %s3026_s16 = scalar_lea.sflag [#allocation6], %s3464_s5 }
 0x1bc   : > { %v2641_v17 = vsel %vm264_vm6, %v2640_v5, %v2639_v10  ;;  %v2036_v19 = vrot.slane %v2026_v12, 1  ;;  %v1576_v20 = vld [vmem:[#allocation2 + $0x8] sm:$0x1]  ;;  %v1577_v21 = vld [vmem:[#allocation2 + $0x20] sm:$0x1] }
 0x1bd   : > { %1946 = vst.msk [vmem:[#allocation3 + $0x28] sm:$0xf0] %vm608_vm14, %v1944_v15  ;;  %v2643_v22 = vsel %vm267_vm7, %v2642_v6, %v2641_v17  ;;  %v2033_v23 = vsel %vm557_vm2, %v2032_v14, %v2031_v13  ;;  %v1578_v24 = vld [vmem:[#allocation2 + $0x38] sm:$0x1]  ;;  %v1579_v25 = vld [vmem:[#allocation2 + $0x50] sm:$0x1] }
 0x1be   : > { %1261 = vst.msk [vmem:[#allocation3 + $0x10] sm:$0xf0] %vm4353_vm1, %v1259_v16  ;;  %v1584_v26 = vrot.slane %v1577_v21, 7  ;;  %2644 = vrot.lane.b32.xlu1 %v2643_v22, %s4360_s19  ;;  %v2035_v27 = vsel %vm560_vm3, %v2034_v18, %v2033_v23  ;;  %v1586_v28 = vrot.slane %v1578_v24, 6  ;;  %v1588_v29 = vrot.slane %v1579_v25, 5  ;;  %v544_v18 = vpop.permute.xlu1 %543 }
 0x1bf   : > { %v2308_v30 = vld [vmem:[#allocation2 + $0x11] sm:$0x1]  ;;  %v2309_v31 = vld [vmem:[#allocation2 + $0x29] sm:$0x1]  ;;  %v2037_v32 = vsel %vm563_vm4, %v2036_v19, %v2035_v27  ;;  %v2310_v34 = vld [vmem:[#allocation2 + $0x41] sm:$0x1] }
 0x1c0   : > { %v1585_v33 = vsel %vm261_vm5, %v1584_v26, %v1576_v20  ;;  %v2311_v35 = vld [vmem:[#allocation2 + $0x59] sm:$0x1]  ;;  %v2316_v36 = vrot.slane %v2309_v31, 7  ;;  %2038 = vrot.lane.b32.xlu0 %v2037_v32, %s3337_s17  ;;  %v2318_v40 = vrot.slane %v2310_v34, 6  ;;  %v2166_v42 = vld [vmem:[#allocation2 + $0x9] sm:$0x1]  ;;  %v2073_v20 = vpop.permute.xlu0 %2072 }
 0x1c1   : > { %v1587_v39 = vsel %vm264_vm6, %v1586_v28, %v1585_v33  ;;  %v2320_v41 = vrot.slane %v2311_v35, 5  ;;  %v2167_v44 = vld [vmem:[#allocation2 + $0x21] sm:$0x1]  ;;  %2235 = vst.msk [vmem:[#allocation3 + $0x38] sm:$0xf] %vm308_vm13, %v2233_v37  ;;  %vm708_vm1 = vcmask 1048452  }
 0x1c2   : > { %1485 = vst.msk [vmem:[#allocation3 + $0x20] sm:$0xf] %vm289_vm12, %v1483_v38  ;;  %v1589_v45 = vsel %vm267_vm7, %v1588_v29, %v1587_v39  ;;  %v2317_v46 = vsel %vm261_vm5, %v2316_v36, %v2308_v30  ;;  %v2168_v47 = vld [vmem:[#allocation2 + $0x39] sm:$0x1]  ;;  %v2169_v48 = vld [vmem:[#allocation2 + $0x51] sm:$0x1] }
 0x1c3   : > { %v2174_v49 = vrot.slane %v2167_v44, 7  ;;  %1590 = vrot.lane.b32.xlu1 %v1589_v45, %s3336_s7  ;;  %v2319_v50 = vsel %vm264_vm6, %v2318_v40, %v2317_v46  ;;  %v2176_v51 = vrot.slane %v2168_v47, 6  ;;  %v2178_v52 = vrot.slane %v2169_v48, 5  ;;  %v2611_v53 = vld [vmem:[#allocation2 + $0x11] sm:$0x1] }
 0x1c4   : > { %v2612_v54 = vld [vmem:[#allocation2 + $0x29] sm:$0x1]  ;;  %v2321_v56 = vsel %vm267_vm7, %v2320_v41, %v2319_v50  ;;  %v2613_v58 = vld [vmem:[#allocation2 + $0x41] sm:$0x1]  ;;  %v2614_v59 = vld [vmem:[#allocation2 + $0x59] sm:$0x1]  ;;  %v859_v41 = vpop.permute.xlu1 %858 }
 0x1c5   : > { %v2175_v57 = vsel %vm261_vm5, %v2174_v49, %v2166_v42  ;;  %v2619_v60 = vrot.slane %v2611_v53, 4  ;;  %v2620_v61 = vrot.slane %v2612_v54, 3  ;;  %2322 = vrot.lane.b32.xlu0 %v2321_v56, %s3335_s20  ;;  %v2622_v63 = vrot.slane %v2613_v58, 2  ;;  %v2042_v1 = vld [vmem:[#allocation2 + $0x2] sm:$0x1]  ;;  %v2361_v42 = vpop.permute.xlu0 %2360 }
 0x1c6   : > { %v2177_v55 = vsel %vm264_vm6, %v2176_v51, %v2175_v57  ;;  %v2624_v0 = vrot.slane %v2614_v59, 1  ;;  %v2043_v2 = vld [vmem:[#allocation2 + $0x1a] sm:$0x1]  ;;  %2534 = vst.msk [vmem:[#allocation3 + $0x38] sm:$0xf0] %vm608_vm14, %v2532_v62 }
 0x1c7   : > { %1775 = vst.msk [vmem:[#allocation3 + $0x20] sm:$0xf0] %vm588_vm11, %v1773_v43  ;;  %v2179_v3 = vsel %vm267_vm7, %v2178_v52, %v2177_v55  ;;  %v2621_v4 = vsel %vm557_vm2, %v2620_v61, %v2619_v60  ;;  %v2044_v5 = vld [vmem:[#allocation2 + $0x32] sm:$0x1]  ;;  %v2045_v6 = vld [vmem:[#allocation2 + $0x4a] sm:$0x1] }
 0x1c8   : > { %v2050_v7 = vrot.slane %v2043_v2, 7  ;;  %2180 = vrot.lane.b32.xlu1 %v2179_v3, %s3335_s20  ;;  %v2623_v8 = vsel %vm560_vm3, %v2622_v63, %v2621_v4  ;;  %v2052_v9 = vrot.slane %v2044_v5, 6  ;;  %v2054_v10 = vrot.slane %v2045_v6, 5  ;;  %v2648_v11 = vld [vmem:[#allocation2 + $0x3] sm:$0x1] }
 0x1c9   : > { %v2649_v12 = vld [vmem:[#allocation2 + $0x1b] sm:$0x1]  ;;  %v2625_v13 = vsel %vm563_vm4, %v2624_v0, %v2623_v8  ;;  %v2650_v15 = vld [vmem:[#allocation2 + $0x33] sm:$0x1]  ;;  %v2651_v16 = vld [vmem:[#allocation2 + $0x4b] sm:$0x1]  ;;  %v1147_v0 = vpop.permute.xlu1 %1146 }
 0x1ca   : > { %v2051_v14 = vsel %vm261_vm5, %v2050_v7, %v2042_v1  ;;  %v2656_v17 = vrot.slane %v2649_v12, 7  ;;  %2626 = vrot.lane.b32.xlu0 %v2625_v13, %s3336_s7  ;;  %v2658_v21 = vrot.slane %v2650_v15, 6  ;;  %v2660_v22 = vrot.slane %v2651_v16, 5  ;;  %v2792_v23 = vld [vmem:[#allocation2 + $0xb] sm:$0x1]  ;;  %v382_v1 = vpop.permute.xlu0 %381 }
 0x1cb   : > { %v2053_v19 = vsel %vm264_vm6, %v2052_v9, %v2051_v14  ;;  %v2793_v24 = vld [vmem:[#allocation2 + $0x23] sm:$0x1]  ;;  %546 = vst.msk [vmem:[#allocation3 + $0x8] sm:$0xf] %vm403_vm9, %v544_v18  ;;  %v2794_v27 = vld [vmem:[#allocation2 + $0x3b] sm:$0x1] }
 0x1cc   : > { %v2055_v25 = vsel %vm267_vm7, %v2054_v10, %v2053_v19  ;;  %v2657_v26 = vsel %vm261_vm5, %v2656_v17, %v2648_v11  ;;  %v2795_v28 = vld [vmem:[#allocation2 + $0x53] sm:$0x1]  ;;  %v2800_v29 = vrot.slane %v2793_v24, 7  ;;  %v2802_v31 = vrot.slane %v2794_v27, 6  ;;  %v2666_v33 = vld [vmem:[#allocation2 + $0x4] sm:$0x1] }
 0x1cd   : > { %2057 = vst.msk [vmem:[#allocation3 + $0x30] sm:$0xf] %vm270_vm10, %v2055_v25  ;;  %v2659_v30 = vsel %vm264_vm6, %v2658_v21, %v2657_v26  ;;  %v2804_v32 = vrot.slane %v2795_v28, 5  ;;  %v2667_v34 = vld [vmem:[#allocation2 + $0x1c] sm:$0x1] }
 0x1ce   : > { %2075 = vst.msk [vmem:[#allocation3 + $0x30] sm:$0xf] %vm289_vm12, %v2073_v20  ;;  %v2661_v35 = vsel %vm267_vm7, %v2660_v22, %v2659_v30  ;;  %v2801_v36 = vsel %vm261_vm5, %v2800_v29, %v2792_v23  ;;  %v2668_v37 = vld [vmem:[#allocation2 + $0x34] sm:$0x1]  ;;  %v2669_v38 = vld [vmem:[#allocation2 + $0x4c] sm:$0x1]  ;;  %v1447_v22 = vpop.permute.xlu1 %1446  ;;  %v686_v23 = vpop.permute.xlu0 %685 }
 0x1cf   : > { %v2674_v39 = vrot.slane %v2667_v34, 7  ;;  %2662 = vrot.lane.b32.xlu1 %v2661_v35, %s4361_s6  ;;  %v2803_v40 = vsel %vm264_vm6, %v2802_v31, %v2801_v36  ;;  %v2676_v44 = vrot.slane %v2668_v37, 6  ;;  %v2678_v45 = vrot.slane %v2669_v38, 5  ;;  %v1871_v46 = vld [vmem:[#allocation2 + $0x8] sm:$0x1] }
 0x1d0   : > { %v1872_v47 = vld [vmem:[#allocation2 + $0x20] sm:$0x1]  ;;  %v2805_v48 = vsel %vm267_vm7, %v2804_v32, %v2803_v40  ;;  %861 = vst.msk [vmem:[#allocation3 + $0x8] sm:$0xf0] %vm708_vm1, %v859_v41  ;;  %v1873_v50 = vld [vmem:[#allocation2 + $0x38] sm:$0x1] }
 0x1d1   : > { %2363 = vst.msk [vmem:[#allocation3 + $0x30] sm:$0xf0] %vm588_vm11, %v2361_v42  ;;  %v2675_v49 = vsel %vm261_vm5, %v2674_v39, %v2666_v33  ;;  %v1874_v51 = vld [vmem:[#allocation2 + $0x50] sm:$0x1]  ;;  %v1879_v52 = vrot.slane %v1871_v46, 4  ;;  %v1880_v53 = vrot.slane %v1872_v47, 3  ;;  %2806 = vrot.lane.b32.xlu0 %v2805_v48, %s4361_s6 }
 0x1d2   : > { %v2677_v54 = vsel %vm264_vm6, %v2676_v44, %v2675_v49  ;;  %v1882_v56 = vrot.slane %v1873_v50, 2  ;;  %v1884_v57 = vrot.slane %v1874_v51, 1  ;;  %v2684_v58 = vld [vmem:[#allocation2 + $0x5] sm:$0x1]  ;;  %v2685_v59 = vld [vmem:[#allocation2 + $0x1d] sm:$0x1]  ;;  %v985_v46 = vpop.permute.xlu0 %984 }
 0x1d3   : > { %v2679_v60 = vsel %vm267_vm7, %v2678_v45, %v2677_v54  ;;  %v1881_v61 = vsel %vm557_vm2, %v1880_v53, %v1879_v52  ;;  %v2686_v62 = vld [vmem:[#allocation2 + $0x35] sm:$0x1]  ;;  %v2687_v43 = vld [vmem:[#allocation2 + $0x4d] sm:$0x1]  ;;  %v2692_v55 = vrot.slane %v2685_v59, 7  ;;  %v1663_v45 = vpop.permute.xlu1 %1662 }
 0x1d4   : > { %2680 = vrot.lane.b32.xlu1 %v2679_v60, %s3322_s22  ;;  %v1883_v63 = vsel %vm560_vm3, %v1882_v56, %v1881_v61  ;;  %v2694_v2 = vrot.slane %v2686_v62, 6  ;;  %v2696_v3 = vrot.slane %v2687_v43, 5  ;;  %v2459_v4 = vld [vmem:[#allocation2 + $0x9] sm:$0x1]  ;;  %v2460_v5 = vld [vmem:[#allocation2 + $0x21] sm:$0x1] }
 0x1d5   : > { %v1885_v6 = vsel %vm563_vm4, %v1884_v57, %v1883_v63  ;;  %1149 = vst.msk [vmem:[#allocation3 + $0x18] sm:$0xf] %vm403_vm9, %v1147_v0  ;;  %v2693_v7 = vsel %vm261_vm5, %v2692_v55, %v2684_v58  ;;  %v2461_v8 = vld [vmem:[#allocation2 + $0x39] sm:$0x1]  ;;  %v2462_v9 = vld [vmem:[#allocation2 + $0x51] sm:$0x1] }
 0x1d6   : > { %385 = vst.msk [vmem:[#allocation3] sm:$0xf] %vm384_vm8, %v382_v1  ;;  %v2467_v10 = vrot.slane %v2459_v4, 4  ;;  %v2468_v11 = vrot.slane %v2460_v5, 3  ;;  %1886 = vrot.lane.b32.xlu0 %v1885_v6, %s3337_s17  ;;  %v2695_v12 = vsel %vm264_vm6, %v2694_v2, %v2693_v7  ;;  %v2470_v13 = vrot.slane %v2461_v8, 2  ;;  %v1278_v4 = vpop.permute.xlu0 %1277 }
 0x1d7   : > { %v2472_v14 = vrot.slane %v2462_v9, 1  ;;  %v2703_v15 = vld [vmem:[#allocation2 + $0x1e] sm:$0x1]  ;;  %v2697_v16 = vsel %vm267_vm7, %v2696_v3, %v2695_v12  ;;  %v2704_v18 = vld [vmem:[#allocation2 + $0x36] sm:$0x1]  ;;  %v2920_v1 = vld [vmem:[#allocation3 + $0x8] sm:$0xff]  ;;  %v1963_v3 = vpop.permute.xlu1 %1962 }
 0x1d8   : > { %v2469_v17 = vsel %vm557_vm2, %v2468_v11, %v2467_v10  ;;  %v2705_v19 = vld [vmem:[#allocation2 + $0x4e] sm:$0x1]  ;;  %v2710_v20 = vrot.slane %v2703_v15, 7  ;;  %2698 = vrot.lane.b32.xlu1 %v2697_v16, %s3325_s28  ;;  %v2702_v24 = vld [vmem:[#allocation2 + $0x6] sm:$0x1]  ;;  %v2712_v25 = vrot.slane %v2704_v18, 6 }
 0x1d9   : > { %v2471_v21 = vsel %vm560_vm3, %v2470_v13, %v2469_v17  ;;  %v2714_v26 = vrot.slane %v2705_v19, 5  ;;  %v2811_v27 = vld [vmem:[#allocation2 + $0x24] sm:$0x1]  ;;  %1449 = vst.msk [vmem:[#allocation3 + $0x18] sm:$0xf0] %vm708_vm1, %v1447_v22  ;;  %vm4362_vm2 = vcmask 519552  }
 0x1da   : > { %v2473_v28 = vsel %vm563_vm4, %v2472_v14, %v2471_v21  ;;  %689 = vst.msk [vmem:[#allocation3] sm:$0xf0] %vm688_vm15, %v686_v23  ;;  %v2711_v29 = vsel %vm261_vm5, %v2710_v20, %v2702_v24  ;;  %v2812_v30 = vld [vmem:[#allocation2 + $0x3c] sm:$0x1]  ;;  %v2813_v31 = vld [vmem:[#allocation2 + $0x54] sm:$0x1]  ;;  %vm4364_vm4 = vmmov %vm4362_vm2 }
 0x1db   : > { %v2818_v32 = vrot.slane %v2811_v27, 7  ;;  %2474 = vrot.lane.b32.xlu0 %v2473_v28, %s3336_s7  ;;  %v2713_v33 = vsel %vm264_vm6, %v2712_v25, %v2711_v29  ;;  %v2810_v34 = vld [vmem:[#allocation2 + $0xc] sm:$0x1]  ;;  %v2820_v35 = vrot.slane %v2812_v30, 6  ;;  %v2822_v36 = vrot.slane %v2813_v31, 5  ;;  %v2251_v27 = vpop.permute.xlu1 %2250  ;;  %v1501_v28 = vpop.permute.xlu0 %1500  ;;  %s3339_s7 = smov [#allocation7]  }
 0x1dc   : > { %v2721_v37 = vld [vmem:[#allocation2 + $0x1f] sm:$0x1]  ;;  %v2715_v38 = vsel %vm267_vm7, %v2714_v26, %v2713_v33  ;;  %v2722_v40 = vld [vmem:[#allocation2 + $0x37] sm:$0x1]  ;;  %v2723_v41 = vld [vmem:[#allocation2 + $0x4f] sm:$0x1] }
 0x1dd   : > { %v2819_v39 = vsel %vm261_vm5, %v2818_v32, %v2810_v34  ;;  %v2728_v42 = vrot.slane %v2721_v37, 7  ;;  %2716 = vrot.lane.b32.xlu1 %v2715_v38, %s3328_s9  ;;  %v2720_v47 = vld [vmem:[#allocation2 + $0x7] sm:$0x1]  ;;  %v2730_v48 = vrot.slane %v2722_v40, 6  ;;  %v2732_v49 = vrot.slane %v2723_v41, 5 }
 0x1de   : > { %v2821_v44 = vsel %vm264_vm6, %v2820_v35, %v2819_v39  ;;  %v2829_v50 = vld [vmem:[#allocation2 + $0x25] sm:$0x1]  ;;  %1665 = vst.msk [vmem:[#allocation3 + $0x28] sm:$0xf] %vm4362_vm2, %v1663_v45  ;;  %v2830_v53 = vld [vmem:[#allocation2 + $0x3d] sm:$0x1] }
 0x1df   : > { %v2823_v51 = vsel %vm267_vm7, %v2822_v36, %v2821_v44  ;;  %987 = vst.msk [vmem:[#allocation3 + $0x10] sm:$0xf] %vm384_vm8, %v985_v46  ;;  %v2729_v52 = vsel %vm261_vm5, %v2728_v42, %v2720_v47  ;;  %v2831_v54 = vld [vmem:[#allocation2 + $0x55] sm:$0x1]  ;;  %v2836_v56 = vrot.slane %v2829_v50, 7  ;;  %v2838_v59 = vrot.slane %v2830_v53, 6  ;;  %v2551_v50 = vpop.permute.xlu1 %2550 }
 0x1e0   : > { %2824 = vrot.lane.b32.xlu0 %v2823_v51, %s3322_s22  ;;  %v2731_v57 = vsel %vm264_vm6, %v2730_v48, %v2729_v52  ;;  %v2828_v58 = vld [vmem:[#allocation2 + $0xd] sm:$0x1]  ;;  %v2840_v60 = vrot.slane %v2831_v54, 5  ;;  %v2739_v61 = vld [vmem:[#allocation2 + $0x20] sm:$0x1]  ;;  %vm4363_vm3 = vcmask 523652   ;;  %v1792_v51 = vpop.permute.xlu0 %1791 }
 0x1e1   : > { %v2733_v62 = vsel %vm267_vm7, %v2732_v49, %v2731_v57  ;;  %v2837_v43 = vsel %vm261_vm5, %v2836_v56, %v2828_v58  ;;  %v2740_v55 = vld [vmem:[#allocation2 + $0x38] sm:$0x1]  ;;  %v2741_v63 = vld [vmem:[#allocation2 + $0x50] sm:$0x1]  ;;  %v2746_v0 = vrot.slane %v2739_v61, 7  ;;  %vm4365_vm11 = vmmov %vm4363_vm3 }
 0x1e2   : > { %2734 = vrot.lane.b32.xlu1 %v2733_v62, %s3331_s23  ;;  %v2839_v2 = vsel %vm264_vm6, %v2838_v59, %v2837_v43  ;;  %v2738_v5 = vld [vmem:[#allocation2 + $0x8] sm:$0x1]  ;;  %v2748_v6 = vrot.slane %v2740_v55, 6  ;;  %v2750_v7 = vrot.slane %v2741_v63, 5  ;;  %v2847_v8 = vld [vmem:[#allocation2 + $0x26] sm:$0x1] }
 0x1e3   : > { %v2841_v9 = vsel %vm267_vm7, %v2840_v60, %v2839_v2  ;;  %1965 = vst.msk [vmem:[#allocation3 + $0x28] sm:$0xf0] %vm4363_vm3, %v1963_v3  ;;  %v2747_v10 = vsel %vm261_vm5, %v2746_v0, %v2738_v5  ;;  %v2848_v11 = vld [vmem:[#allocation2 + $0x3e] sm:$0x1]  ;;  %v2849_v12 = vld [vmem:[#allocation2 + $0x56] sm:$0x1] }
 0x1e4   : > { %1280 = vst.msk [vmem:[#allocation3 + $0x10] sm:$0xf0] %vm688_vm15, %v1278_v4  ;;  %v2854_v13 = vrot.slane %v2847_v8, 7  ;;  %v2922_v14 = vld [vmem:[#allocation3 + $0x18] sm:$0xff]  ;;  %2842 = vrot.lane.b32.xlu0 %v2841_v9, %s3325_s28  ;;  %v2749_v15 = vsel %vm264_vm6, %v2748_v6, %v2747_v10  ;;  %v2846_v16 = vld [vmem:[#allocation2 + $0xe] sm:$0x1]  ;;  %v2091_v2 = vpop.permute.xlu0 %2090 }
 0x1e5   : > { %v2856_v17 = vrot.slane %v2848_v11, 6  ;;  %v2858_v18 = vrot.slane %v2849_v12, 5  ;;  %v3129_v19 = vpack.c.bf16 %v2922_v14, %v2920_v1  ;;  %v2757_v20 = vld [vmem:[#allocation2 + $0x21] sm:$0x1]  ;;  %v2751_v21 = vsel %vm267_vm7, %v2750_v7, %v2749_v15  ;;  %v2758_v23 = vld [vmem:[#allocation2 + $0x39] sm:$0x1]  ;;  %v706_v1 = vpop.permute.xlu1 %705 }
 0x1e6   : > { %v2855_v22 = vsel %vm261_vm5, %v2854_v13, %v2846_v16  ;;  %v2759_v24 = vld [vmem:[#allocation2 + $0x51] sm:$0x1]  ;;  %v2764_v25 = vrot.slane %v2757_v20, 7  ;;  %2752 = vrot.lane.b32.xlu1 %v2751_v21, %s3334_s4  ;;  %v2756_v29 = vld [vmem:[#allocation2 + $0x9] sm:$0x1]  ;;  %v2766_v30 = vrot.slane %v2758_v23, 6 }
 0x1e7   : > { %v2857_v26 = vsel %vm264_vm6, %v2856_v17, %v2855_v22  ;;  %3130 = vmatprep.subr.bf16.mxu0 %v3129_v19  ;;  %v2768_v31 = vrot.slane %v2759_v24, 5  ;;  %v2865_v32 = vld [vmem:[#allocation2 + $0x27] sm:$0x1]  ;;  %2253 = vst.msk [vmem:[#allocation3 + $0x38] sm:$0xf] %vm4364_vm4, %v2251_v27  ;;  %v3338_v8 = vmov 0  }
 0x1e8   : > { %v2859_v33 = vsel %vm267_vm7, %v2858_v18, %v2857_v26  ;;  %1503 = vst.msk [vmem:[#allocation3 + $0x20] sm:$0xf] %vm308_vm13, %v1501_v28  ;;  %v2765_v34 = vsel %vm261_vm5, %v2764_v25, %v2756_v29  ;;  %v2866_v35 = vld [vmem:[#allocation2 + $0x3f] sm:$0x1]  ;;  %v2867_v36 = vld [vmem:[#allocation2 + $0x57] sm:$0x1]  ;;  %v2380_v7 = vpop.permute.xlu0 %2379  ;;  %3211 = vset.pattern.permute.xlu0 %v3338_v8 }
 0x1e9   : > { %v2872_v37 = vrot.slane %v2865_v32, 7  ;;  %2860 = vrot.lane.b32.xlu0 %v2859_v33, %s3328_s9  ;;  %v2767_v38 = vsel %vm264_vm6, %v2766_v30, %v2765_v34  ;;  %v2864_v39 = vld [vmem:[#allocation2 + $0xf] sm:$0x1]  ;;  %v2874_v40 = vrot.slane %v2866_v35, 6  ;;  %v2876_v41 = vrot.slane %v2867_v36, 5  ;;  %v1297_v6 = vpop.permute.xlu1 %1296  ;;  %v2929_v9 = vld [vmem:[%s4340_s2] sm:$0xff] }
 0x1ea   : > { %v2883_v42 = vld [vmem:[#allocation2 + $0x28] sm:$0x1]  ;;  %v2769_v44 = vsel %vm267_vm7, %v2768_v31, %v2767_v38  ;;  %v2884_v46 = vld [vmem:[#allocation2 + $0x40] sm:$0x1]  ;;  %v2885_v47 = vld [vmem:[#allocation2 + $0x58] sm:$0x1] }
 0x1eb   : > { %v2873_v45 = vsel %vm261_vm5, %v2872_v37, %v2864_v39  ;;  %v2890_v48 = vrot.slane %v2883_v42, 7  ;;  %2770 = vrot.lane.b32.xlu1 %v2769_v44, %s3337_s17  ;;  %v2892_v52 = vrot.slane %v2884_v46, 6  ;;  %v2900_v53 = vld [vmem:[#allocation2 + $0x11] sm:$0x1]  ;;  %v2901_v54 = vld [vmem:[#allocation2 + $0x29] sm:$0x1] }
 0x1ec   : > { %v2875_v49 = vsel %vm264_vm6, %v2874_v40, %v2873_v45  ;;  %2553 = vst.msk [vmem:[#allocation3 + $0x38] sm:$0xf0] %vm4365_vm11, %v2551_v50  ;;  %v2894_v57 = vrot.slane %v2885_v47, 5  ;;  %v2902_v58 = vld [vmem:[#allocation2 + $0x41] sm:$0x1]  ;;  %v2908_v60 = vrot.slane %v2901_v54, 7  ;;  %v401_v11 = vpop.permute.xlu0 %400 }
 0x1ed   : > { %v2877_v56 = vsel %vm267_vm7, %v2876_v41, %v2875_v49  ;;  %1794 = vst.msk [vmem:[#allocation3 + $0x20] sm:$0xf0] %vm608_vm14, %v1792_v51  ;;  %v2903_v59 = vld [vmem:[#allocation2 + $0x59] sm:$0x1]  ;;  %v2882_v61 = vld [vmem:[#allocation2 + $0x10] sm:$0x1]  ;;  %v1681_v10 = vpop.permute.xlu1 %1680 }
 0x1ee   : > { %2878 = vrot.lane.b32.xlu0 %v2877_v56, %s3331_s23  ;;  %v2910_v62 = vrot.slane %v2902_v58, 6  ;;  %v2891_v43 = vsel %vm261_vm5, %v2890_v48, %v2882_v61  ;;  %v2909_v55 = vsel %vm261_vm5, %v2908_v60, %v2900_v53  ;;  %v2912_v63 = vrot.slane %v2903_v59, 5  ;;  %709 = vst.msk [vmem:[#allocation3] sm:$0xf0] %vm708_vm1, %v706_v1  ;;  %1299 = vst.msk [vmem:[#allocation3 + $0x10] sm:$0xf0] %vm708_vm1, %v1297_v6  ;;  %s4294_s23 = scalar_lea.hbm %s4341_s3, %s3128_s29 }
 0x1ef   : > { %v2893_v0 = vsel %vm264_vm6, %v2892_v52, %v2891_v43  ;;  %2093 = vst.msk [vmem:[#allocation3 + $0x30] sm:$0xf] %vm308_vm13, %v2091_v2  ;;  %vm4366_vm5 = vcmask 650752   ;;  %vm4371_vm11 = vcmask 786052   ;;  %s3118_s28 = sshll.u32 %s3464_s5, 4 }
 0x1f0   : > { %v2911_v3 = vsel %vm264_vm6, %v2910_v62, %v2909_v55  ;;  %v2895_v4 = vsel %vm267_vm7, %v2894_v57, %v2893_v0  ;;  %2382 = vst.msk [vmem:[#allocation3 + $0x30] sm:$0xf0] %vm608_vm14, %v2380_v7  ;;  %v1003_v13 = vpop.permute.xlu0 %1002  ;;  %vm4367_vm6 = vcmask 654852   ;;  %vm4369_vm14 = vmmov %vm4362_vm2  ;;  %s188_s30 = scalar_lea.vmem [#allocation7], %s3118_s28 }
 0x1f1   : > { %v2913_v5 = vsel %vm267_vm7, %v2912_v63, %v2911_v3  ;;  %1683 = vst.msk [vmem:[#allocation3 + $0x28] sm:$0xf] %vm4366_vm5, %v1681_v10  ;;  %v1982_v12 = vpop.permute.xlu1 %1981  ;;  %vm4368_vm7 = vmmov %vm4366_vm5  ;;  %v2918_v10 = vld [vmem:[%s4339_s1] sm:$0xff]  ;;  %s3040_s9 = sshll.u32 %s188_s30, 4  ;;  %s4296_s9 = int_to_ptr.vmem [resolvable:$true] %s3040_s9 }
 0x1f2   : > { %2896 = vrot.lane.b32.xlu0 %v2895_v4, %s3334_s4  ;;  %404 = vst.msk [vmem:[#allocation3] sm:$0xf] %vm403_vm9, %v401_v11  ;;  %1005 = vst.msk [vmem:[#allocation3 + $0x10] sm:$0xf] %vm403_vm9, %v1003_v13  ;;  %s3242_s4 = scalar_lea.vmem %s4296_s9, 256 }
 0x1f3   : > { %1984 = vst.msk [vmem:[#allocation3 + $0x28] sm:$0xf0] %vm4367_vm6, %v1982_v12  ;;  %vm4370_vm2 = vmmov %vm4367_vm6  ;;  %p3243_p6 = scmp.ne.s32.totalorder %s4296_s9, %s3242_s4 }
 0x1f4   : > { %v1519_v15 = vpop.permute.xlu0 %1518  ;;  %vm4372_vm5 = vmmov %vm4363_vm3 }
 0x1f5   : > { %v2269_v14 = vpop.permute.xlu1 %2268  ;;  %1521 = vst.msk [vmem:[#allocation3 + $0x20] sm:$0xf] %vm4369_vm14, %v1519_v15  ;;  %vm4373_vm6 = vmmov %vm4368_vm7  ;;  %p3244_p12 = pnand %p3243_p6, %p4384_p11 }
 0x1f6   : > { %2914 = vrot.lane.b32.xlu0 %v2913_v5, %s3337_s17  ;;  %2271 = vst.msk [vmem:[#allocation3 + $0x38] sm:$0xf] %vm4368_vm7, %v2269_v14  ;;  %vm4374_vm7 = vmmov %vm4371_vm11  ;;  %s3246_s17 = sshll.u32 %s3339_s7, 4  ;;  %s3247_s17 = int_to_ptr.vmem [resolvable:$false] %s3246_s17 }
 0x1f7   : > { %vm4375_vm14 = vmmov %vm4370_vm2  ;;  %p3245_p13 = pneg %p3244_p12  ;;  %s3248_s8 = scalar_lea.vmem %s3247_s17, 512 }
 0x1f8   : > { %v1811_v17 = vpop.permute.xlu0 %1810  ;;  %p3249_p8 = scmp.lt.s32.totalorder %s4296_s9, %s3247_s17  ;;  %p3250_p10 = scmp.lt.s32.totalorder %s3248_s8, %s3242_s4 }
 0x1f9   : > { %v2570_v16 = vpop.permute.xlu1 %2569  ;;  %v2919_v18 = vld [vmem:[#allocation3] sm:$0xff]  ;;  %v2921_v19 = vld [vmem:[#allocation3 + $0x10] sm:$0xff]  ;;  %1813 = vst.msk [vmem:[#allocation3 + $0x20] sm:$0xf0] %vm4363_vm3, %v1811_v17  ;;  %vm4377_vm3 = vmmov %vm4375_vm14 }
 0x1fa   : > { %2932 = vperm.xlu0 %3211, %v2929_v9   ;;  %2572 = vst.msk [vmem:[#allocation3 + $0x38] sm:$0xf0] %vm4370_vm2, %v2570_v16  ;;  %v3131_v20 = vpack.c.bf16 %v2921_v19, %v2919_v18  ;;  %vm4376_vm2 = vmmov %vm4373_vm6  ;;  %p3251_p0 = por %p3250_p10, %p3249_p8 }
 0x1fc   : > { %3132 = vmatpush1.bf16.msra.mxu0 %v3131_v20  ;;  %v2109_v22 = vpop.permute.xlu0 %2108  ;;  %p3252_p2 = pnand %p3251_p0, %p3245_p13 }
 0x1fd   : > { %v1699_v21 = vpop.permute.xlu1 %1698  ;;  %2111 = vst.msk [vmem:[#allocation3 + $0x30] sm:$0xf] %vm4364_vm4, %v2109_v22  ;;  %vm4378_vm4 = vmmov %vm4374_vm7 }
 0x1fe   : > { %1701 = vst.msk [vmem:[#allocation3 + $0x28] sm:$0xf] %vm365_vm0, %v1699_v21 }
 0x200   : > { %v2399_v24 = vpop.permute.xlu0 %2398 }
 0x201   : > { %v2001_v23 = vpop.permute.xlu1 %2000  ;;  %2401 = vst.msk [vmem:[#allocation3 + $0x30] sm:$0xf0] %vm4372_vm5, %v2399_v24  ;;  %vm2935_vm5 = vcmask 293888  }
 0x202   : > { %2003 = vst.msk [vmem:[#allocation3 + $0x28] sm:$0xf0] %vm4371_vm11, %v2001_v23  ;;  %vm4379_vm11 = vmmov %vm4378_vm4 }
 0x204   : > { %v1537_v26 = vpop.permute.xlu0 %1536 }
 0x205   : > { %v2287_v25 = vpop.permute.xlu1 %2286  ;;  %1539 = vst.msk [vmem:[#allocation3 + $0x20] sm:$0xf] %vm4373_vm6, %v1537_v26 }
 0x206   : > { %2289 = vst.msk [vmem:[#allocation3 + $0x38] sm:$0xf] %vm365_vm0, %v2287_v25 }
 0x208   : > { %v1830_v28 = vpop.permute.xlu0 %1829 }
 0x209   : > { %v2589_v27 = vpop.permute.xlu1 %2588  ;;  %1832 = vst.msk [vmem:[#allocation3 + $0x20] sm:$0xf0] %vm4375_vm14, %v1830_v28 }
 0x20a   : > { %2591 = vst.msk [vmem:[#allocation3 + $0x38] sm:$0xf0] %vm4374_vm7, %v2589_v27 }
 0x20c   : > { %v2127_v30 = vpop.permute.xlu0 %2126 }
 0x20d   : > { %v1717_v29 = vpop.permute.xlu1 %1716  ;;  %2129 = vst.msk [vmem:[#allocation3 + $0x30] sm:$0xf] %vm4376_vm2, %v2127_v30 }
 0x20e   : > { %1719 = vst.msk [vmem:[#allocation3 + $0x28] sm:$0xf] %vm384_vm8, %v1717_v29 }
 0x210   : > { %v2418_v32 = vpop.permute.xlu0 %2417 }
 0x211   : > { %v2020_v31 = vpop.permute.xlu1 %2019  ;;  %2420 = vst.msk [vmem:[#allocation3 + $0x30] sm:$0xf0] %vm4377_vm3, %v2418_v32 }
 0x212   : > { %2022 = vst.msk [vmem:[#allocation3 + $0x28] sm:$0xf0] %vm688_vm15, %v2020_v31 }
 0x215   : > { %v2305_v33 = vpop.permute.xlu1 %2304  ;;  %v1555_v34 = vpop.permute.xlu0 %1554 }
 0x216   : > { %2307 = vst.msk [vmem:[#allocation3 + $0x38] sm:$0xf] %vm384_vm8, %v2305_v33 }
 0x217   : > { %1557 = vst.msk [vmem:[#allocation3 + $0x20] sm:$0xf] %vm365_vm0, %v1555_v34 }
 0x219   : > { %v2608_v35 = vpop.permute.xlu1 %2607 }
 0x21a   : > { %2610 = vst.msk [vmem:[#allocation3 + $0x38] sm:$0xf0] %vm688_vm15, %v2608_v35  ;;  %v1849_v36 = vpop.permute.xlu0 %1848 }
 0x21b   : > { %1851 = vst.msk [vmem:[#allocation3 + $0x20] sm:$0xf0] %vm4378_vm4, %v1849_v36 }
 0x21d   : > { %v1573_v37 = vpop.permute.xlu1 %1572 }
 0x21e   : > { %1575 = vst.msk [vmem:[#allocation3 + $0x20] sm:$0xf] %vm384_vm8, %v1573_v37 }
 0x21f   : > { %v2145_v38 = vpop.permute.xlu0 %2144 }
 0x220   : > { %2147 = vst.msk [vmem:[#allocation3 + $0x30] sm:$0xf] %vm365_vm0, %v2145_v38 }
 0x222   : > { %v1868_v39 = vpop.permute.xlu1 %1867 }
 0x223   : > { %1870 = vst.msk [vmem:[#allocation3 + $0x20] sm:$0xf0] %vm688_vm15, %v1868_v39 }
 0x224   : > { %v2437_v40 = vpop.permute.xlu0 %2436 }
 0x225   : > { %2439 = vst.msk [vmem:[#allocation3 + $0x30] sm:$0xf0] %vm4379_vm11, %v2437_v40 }
 0x227   : > { %v2163_v41 = vpop.permute.xlu1 %2162 }
 0x228   : > { %2165 = vst.msk [vmem:[#allocation3 + $0x30] sm:$0xf] %vm384_vm8, %v2163_v41 }
 0x229   : > { %v2789_v42 = vpop.permute.xlu0 %2788 }
 0x22a   : > { %2791 = vst.msk [vmem:[#allocation3 + $0x48] sm:$0xf] %vm270_vm10, %v2789_v42 }
 0x22b   : > { %v2456_v44 = vpop.permute.xlu1 %2455 }
 0x22c   : > { %2458 = vst.msk [vmem:[#allocation3 + $0x30] sm:$0xf0] %vm688_vm15, %v2456_v44  ;;  %vm4381_vm15 = vmmov %vm4376_vm2 }
 0x22d   : > { %v1735_v45 = vpop.permute.xlu0 %1734 }
 0x22e   : > { %1737 = vst.msk [vmem:[#allocation3 + $0x28] sm:$0xf] %vm403_vm9, %v1735_v45 }
 0x230   : > { %v2645_v46 = vpop.permute.xlu1 %2644 }
 0x231   : > { %2647 = vst.msk [vmem:[#allocation3 + $0x40] sm:$0xf] %vm270_vm10, %v2645_v46  ;;  %vm4380_vm10 = vcmask 519552  }
 0x232   : > { %v2039_v47 = vpop.permute.xlu0 %2038 }
 0x233   : > { %2041 = vst.msk [vmem:[#allocation3 + $0x28] sm:$0xf0] %vm708_vm1, %v2039_v47 }
 0x235   : > { %v1591_v48 = vpop.permute.xlu1 %1590 }
 0x236   : > { %1593 = vst.msk [vmem:[#allocation3 + $0x20] sm:$0xf] %vm403_vm9, %v1591_v48 }
 0x237   : > { %v2323_v49 = vpop.permute.xlu0 %2322 }
 0x238   : > { %2325 = vst.msk [vmem:[#allocation3 + $0x38] sm:$0xf] %vm403_vm9, %v2323_v49 }
 0x23a   : > { %v2181_v50 = vpop.permute.xlu1 %2180  ;;  %v2924_v56 = vld [vmem:[#allocation3 + $0x28] sm:$0xff] }
 0x23b   : > { %2183 = vst.msk [vmem:[#allocation3 + $0x30] sm:$0xf] %vm403_vm9, %v2181_v50 }
 0x23c   : > { %v2627_v51 = vpop.permute.xlu0 %2626 }
 0x23d   : > { %2629 = vst.msk [vmem:[#allocation3 + $0x38] sm:$0xf0] %vm708_vm1, %v2627_v51 }
 0x241   : > { %v2663_v52 = vpop.permute.xlu1 %2662 }
 0x242   : > { %2665 = vst.msk [vmem:[#allocation3 + $0x40] sm:$0xf] %vm289_vm12, %v2663_v52 }
 0x243   : > { %v2807_v53 = vpop.permute.xlu0 %2806 }
 0x244   : > { %2809 = vst.msk [vmem:[#allocation3 + $0x48] sm:$0xf] %vm289_vm12, %v2807_v53  ;;  %v2926_v57 = vld [vmem:[#allocation3 + $0x38] sm:$0xff]  ;;  %vm4382_vm12 = vmmov %vm4380_vm10 }
 0x245   : > { %v3133_v58 = vpack.c.bf16 %v2926_v57, %v2924_v56 }
 0x246   : > { %v2681_v54 = vpop.permute.xlu1 %2680 }
 0x247   : > { %2683 = vst.msk [vmem:[#allocation3 + $0x40] sm:$0xf] %vm308_vm13, %v2681_v54  ;;  %3134 = vmatprep.subr.bf16.mxu0 %v3133_v58 }
 0x248   : > { %v1887_v59 = vpop.permute.xlu0 %1886 }
 0x249   : > { %1889 = vst.msk [vmem:[#allocation3 + $0x20] sm:$0xf0] %vm708_vm1, %v1887_v59 }
 0x24a   : > { %v2699_v60 = vpop.permute.xlu1 %2698 }
 0x24b   : > { %2701 = vst.msk [vmem:[#allocation3 + $0x40] sm:$0xf] %vm4380_vm10, %v2699_v60 }
 0x24d   : > { %v2475_v61 = vpop.permute.xlu0 %2474 }
 0x24e   : > { %2477 = vst.msk [vmem:[#allocation3 + $0x30] sm:$0xf0] %vm708_vm1, %v2475_v61  ;;  %vm4383_vm1 = vmmov %vm4376_vm2 }
 0x24f   : > { %v2717_v62 = vpop.permute.xlu1 %2716 }
 0x250   : > { %2719 = vst.msk [vmem:[#allocation3 + $0x40] sm:$0xf] %vm4381_vm15, %v2717_v62  ;;  %v2923_v0 = vld [vmem:[#allocation3 + $0x20] sm:$0xff] }
 0x252   : > { %v2825_v43 = vpop.permute.xlu0 %2824 }
 0x253   : > { %2827 = vst.msk [vmem:[#allocation3 + $0x48] sm:$0xf] %vm308_vm13, %v2825_v43  ;;  %vm2939_vm13 = vcmask 1043456  }
 0x254   : > { %v2735_v55 = vpop.permute.xlu1 %2734 }
 0x255   : > { %2737 = vst.msk [vmem:[#allocation3 + $0x40] sm:$0xf] %vm365_vm0, %v2735_v55  ;;  %v2925_v1 = vld [vmem:[#allocation3 + $0x30] sm:$0xff] }
 0x256   : > { %v2843_v63 = vpop.permute.xlu0 %2842  ;;  %v3135_v2 = vpack.c.bf16 %v2925_v1, %v2923_v0 }
 0x257   : > { %2845 = vst.msk [vmem:[#allocation3 + $0x48] sm:$0xf] %vm4382_vm12, %v2843_v63 }
 0x258   : > { %v2753_v3 = vpop.permute.xlu1 %2752  ;;  %3136 = vmatpush1.bf16.msra.mxu0 %v3135_v2 }
 0x259   : > { %2755 = vst.msk [vmem:[#allocation3 + $0x40] sm:$0xf] %vm384_vm8, %v2753_v3 }
 0x25b   : > { %v2861_v4 = vpop.permute.xlu0 %2860 }
 0x25c   : > { %2863 = vst.msk [vmem:[#allocation3 + $0x48] sm:$0xf] %vm4383_vm1, %v2861_v4 }
 0x25d   : > { %v2771_v5 = vpop.permute.xlu1 %2770 }
 0x25e   : > { %2773 = vst.msk [vmem:[#allocation3 + $0x40] sm:$0xf] %vm403_vm9, %v2771_v5 }
 0x260   : > { %v2879_v6 = vpop.permute.xlu0 %2878 }
 0x261   : > { %2881 = vst.msk [vmem:[#allocation3 + $0x48] sm:$0xf] %vm365_vm0, %v2879_v6 }
 0x264   : > { %v2897_v7 = vpop.permute.xlu0 %2896 }
 0x265   : > { %2899 = vst.msk [vmem:[#allocation3 + $0x48] sm:$0xf] %vm384_vm8, %v2897_v7  ;;  %v2927_v11 = vld [vmem:[#allocation3 + $0x40] sm:$0xf] }
 0x268   : > { %v2915_v8 = vpop.permute.xlu0 %2914 }
 0x269   : > { %2917 = vst.msk [vmem:[#allocation3 + $0x48] sm:$0xf] %vm403_vm9, %v2915_v8 }
 0x270   : > { %v2928_v9 = vld [vmem:[#allocation3 + $0x48] sm:$0xf] }
 0x271   : > { %3119 = vmatprep.subr.msk.mxu0 %vm2939_vm13, %v2928_v9 }
 0x272   : > { %3120 = vmatpush1.msk.msra.mxu0 %vm2939_vm13, %v2927_v11 }
 0x273   : > { %3121 = vmatmul.mubr.msk.f32.vlgmr.msra.gmra.mrb[0].mxu0 %vm2935_vm5, %v2918_v10 }
 0x279   : > { %v2933_v12 = vpop.permute.xlu0 %2932 }
 0x346   : > { %v3012_v13 = vpop.f32.mrb[0].mxu0 }
 0x347   : > { %v3013_v14 = vadd.f32 %v3012_v13, %v2933_v12  ;;  %v3014_v15 = vpop.f32.mrb[1].mxu0 }
 0x348   : > { %v3015_v16 = vadd.f32 %v3014_v15, %v2933_v12 }
 0x349   : > { %vm3017_vm0 = vcmp.gt.f32.partialorder %v3013_v14, 0.0  ;;  %v3019_v17 = vmul.f32 0.2, %v3013_v14 }
 0x34a   : > { %vm3018_vm8 = vcmp.gt.f32.partialorder %v3015_v16, 0.0  ;;  %v3020_v18 = vmul.f32 0.2, %v3015_v16 }
 0x34b   : > { %v3021_v19 = vsel %vm3017_vm0, %v3013_v14, %v3019_v17 }
 0x34c   : > { %3023 = vst [vmem:[%s188_s30] sm:$0xff] %v3021_v19  ;;  %v3022_v20 = vsel %vm3018_vm8, %v3015_v16, %v3020_v18 }
 0x34d   : > { %3024 = vst [vmem:[%s188_s30 + $0x8] sm:$0xff] %v3022_v20 }
 0x34e   : > { %3255 = shalt.err (!%p3252_p2)
}
 0x34f   : > { %s3256_s5 = scalar_lea.hbm %s4294_s23, 256  ;;  %s3260_s20 = scalar_lea.hbm %s4341_s3, 512 }
 0x350   : > { %p3257_p4 = scmp.ne.s32.totalorder %s4294_s23, %s3256_s5  ;;  %p3261_p9 = scmp.lt.u32.totalorder %s4294_s23, %s4341_s3 }
 0x351   : > { %p3262_p1 = scmp.lt.u32.totalorder %s3260_s20, %s3256_s5  ;;  %p3264_p6 = scmp.lt.u32.totalorder %s3256_s5, %s4294_s23 }
 0x352   : > { %p3258_p5 = pnand %p3257_p4, %p4384_p11 }
 0x353   : > { %p3263_p3 = por %p3262_p1, %p3261_p9 }
 0x354   : > { %p3259_p7 = pneg %p3258_p5 }
 0x355   : > { %p3265_p12 = por %p3264_p6, %p3263_p3 }
 0x357   : > { %p3266_p13 = pnand %p3265_p12, %p3259_p7 }
 0x359   : > { %3269 = shalt.err (!%p3266_p13)
}
 0x35a   : > { %3139 = dma.vmem_to_hbm [thread:$0]  (%p4384_p11), %s4296_s9, 256, %s4294_s23, %s3026_s16  }
 0x35b PF: > { %s3052_s27 = sand.u32 1, %s3296_s12   ;;  %p4385_p8 = scmp.ne.s32.totalorder %s4357_s25, 0 }
 0x35c   : > { %p4386_p10 = scmp.ge.s32.totalorder %s3308_s15, 2  ;;  %s3053_s28 = scalar_lea.sflag [#allocation6], %s3052_s27 }
 0x35e   : > { %p3146_p0 = pnand %p4386_p10, %p4385_p8 }
 0x360   : > { %3291 = dma.done.wait (!%p3146_p0), %s3053_s28, 256  }
 0x361   : > { %3293 = vsyncadd (!%p3146_p0), %s3053_s28, 4294967040  ;;  %p16_p2 = scmp.ge.s32.totalorder %s3385_s18, 4   ;;  %s4387_s12 = smov %s3300_s13 }
 0x362   : > { %s4388_s13 = smov %s3304_s14  ;;  %s4389_s14 = smov %s3397_s21 }
 0x363   : > { %s4390_s15 = smov %s3385_s18  ;;  %18 = sbr.rel (!%p16_p2) target bundleno = 5 (0x5), region = 77 }
 0x36a   :  { %3058 = vsyncpa [#allocation5], 1 }
 0x36b   :  { %3060 = vsyncpa [#allocation5 + $0x1], 1 }
 0x36c   :  { %3061 = vsyncpa [#allocation6], 1 }
 0x36d   :  { %3063 = vsyncpa [#allocation6 + $0x1], 1 }

</bundles_post_ra>
